<compile_context>
chip_gen: v6e
topology: v6e:2x2x1
jax: 0.10.0
libtpu: 0.0.40
codegen_flags: <defaults>
</compile_context>

<pallas_src>
import jax
import jax.numpy as jnp
from jax.experimental import pallas as pl

SPIKE_THRESHOLD = 0.5
TIME_STEPS = 100          # fixed by the module


def neuromorphic_kernel(x_ref, w_ref, spikes_ref, pot_ref, act_ref):
    D = x_ref.shape[-1]

    # --- (1) MXU: the synaptic drive x @ W is constant over time; compute once.
    drive = jnp.dot(x_ref[...], w_ref[...],
                    preferred_element_type=jnp.float32)          # (1, D)

    # --- (2) Loop-invariant splats hoisted out of the unroll.
    thr = jnp.full_like(drive, SPIKE_THRESHOLD)
    zero = jnp.zeros_like(drive)

    # --- (3) Exact LIF recurrence, fully unrolled; direct static-offset stores.
    mp = zero                              # membrane_potential init (zeros param)
    for t in range(TIME_STEPS):
        mp_new = mp + drive                               # carried op 1
        fired = mp_new >= thr                             # carried op 2
        spike = fired.astype(jnp.float32)                 # off-chain (recorded pre-reset)
        mp = jnp.where(fired, zero, mp_new)               # carried op 3 (reset)
        spikes_ref[pl.ds(t, 1), :] = spike                # static row offset
        pot_ref[pl.ds(t, 1), :] = mp                      # static row offset

    # --- (4) synaptic_activity = mean(|W|), lane-dense (1, D) broadcast row.
    act_ref[...] = jnp.broadcast_to(jnp.mean(jnp.abs(w_ref[...])), (1, D))


def neuromorphic_core(x, w):
    """x: (D,) float32, w: (D, D) float32 -> (spikes (T, D), aux dict)."""
    D = x.shape[0]
    T = TIME_STEPS
    x2d = x.reshape(1, D)

    spikes, potentials, act = pl.pallas_call(
        neuromorphic_kernel,
        out_shape=(
            jax.ShapeDtypeStruct((T, D), jnp.float32),   # spikes
            jax.ShapeDtypeStruct((T, D), jnp.float32),   # membrane_potentials
            jax.ShapeDtypeStruct((1, D), jnp.float32),   # synaptic_activity (bcast)
        ),
        in_specs=[
            pl.BlockSpec((1, D), lambda: (0, 0)),
            pl.BlockSpec((D, D), lambda: (0, 0)),
        ],
        out_specs=(
            pl.BlockSpec((T, D), lambda: (0, 0)),
            pl.BlockSpec((T, D), lambda: (0, 0)),
            pl.BlockSpec((1, D), lambda: (0, 0)),
        ),
    )(x2d, w)

    return spikes, {
        "membrane_potentials": potentials,
        "synaptic_activity": act[0, 0],
    }


# --- tiny helper kernel (identical MXU matmul lowering) used only for the check ---
# NOTE: bit-exactness vs PyTorch is defined relative to the MXU-lowered drive;
# torch.matmul may order the f32 reduction differently, so a neuron sitting
# exactly at 0.5 could in principle flip vs the CPU reference (documented,
# not detectable by this in-file check which reuses the same drive).
def _drive_kernel(x_ref, w_ref, o_ref):
    o_ref[...] = jnp.dot(x_ref[...], w_ref[...], preferred_element_type=jnp.float32)


def _drive_matmul(x2d, w):
    D = w.shape[0]
    return pl.pallas_call(
        _drive_kernel,
        out_shape=jax.ShapeDtypeStruct((1, D), jnp.float32),
        in_specs=[pl.BlockSpec((1, D), lambda: (0, 0)),
                  pl.BlockSpec((D, D), lambda: (0, 0))],
        out_specs=pl.BlockSpec((1, D), lambda: (0, 0)),
    )(x2d, w)


if __name__ == "__main__":
    D = 128  # input_dim (lane-aligned, small)
    key = jax.random.PRNGKey(0)
    kw, kx = jax.random.split(key)

    # Deterministic parameter / input init (matches module __init__ shapes):
    #   synaptic_weights = randn(D, D) * 0.01 ; membrane_potential = zeros(D)
    w = jax.random.normal(kw, (D, D), dtype=jnp.float32) * 0.01
    x = jax.random.normal(kx, (D,), dtype=jnp.float32)

    spikes, aux = neuromorphic_core(x, w)
    jax.block_until_ready((spikes, aux))

    # --- correctness check vs. a pure-JAX sequential reference using the same
    #     (bit-identical, MXU-lowered) drive ---
    drive = _drive_matmul(x.reshape(1, D), w)
    mp = jnp.zeros((1, D), jnp.float32)
    ref_spikes, ref_pots = [], []
    for _ in range(TIME_STEPS):
        mp = mp + drive
        s = (mp >= SPIKE_THRESHOLD).astype(jnp.float32)
        mp = jnp.where(s > 0.0, 0.0, mp)
        ref_spikes.append(s[0])
        ref_pots.append(mp[0])
    ref_spikes = jnp.stack(ref_spikes)
    ref_pots = jnp.stack(ref_pots)

    assert spikes.shape == (TIME_STEPS, D)
    assert aux["membrane_potentials"].shape == (TIME_STEPS, D)
    assert jnp.allclose(spikes, ref_spikes), "spike trains mismatch"
    assert jnp.allclose(aux["membrane_potentials"], ref_pots, atol=1e-6), \
        "membrane potentials mismatch"
    assert jnp.allclose(aux["synaptic_activity"], jnp.mean(jnp.abs(w)), rtol=1e-4), \
        "synaptic activity mismatch"

    print("KERNEL_OK")
</pallas_src>

<mosaic_0001>
module attributes {stable_mosaic.version = 11 : i64} {
  func.func @neuromorphic_kernel(%arg0: memref<1x128xf32, #tpu.memory_space<vmem>>, %arg1: memref<128x128xf32, #tpu.memory_space<vmem>>, %arg2: memref<100x128xf32, #tpu.memory_space<vmem>>, %arg3: memref<100x128xf32, #tpu.memory_space<vmem>>, %arg4: memref<1x128xf32, #tpu.memory_space<vmem>>) attributes {dimension_semantics = [], scalar_prefetch = 0 : i64, scratch_operands = 0 : i64, tpu.core_type = #tpu.core_type<tc>} {
    %c0 = arith.constant 0 : index
    %c0_0 = arith.constant 0 : index
    %0 = vector.load %arg0[%c0, %c0_0] : memref<1x128xf32, #tpu.memory_space<vmem>>, vector<1x128xf32>
    %c0_1 = arith.constant 0 : index
    %c0_2 = arith.constant 0 : index
    %1 = vector.load %arg1[%c0_1, %c0_2] : memref<128x128xf32, #tpu.memory_space<vmem>>, vector<128x128xf32>
    %cst = arith.constant dense<0.000000e+00> : vector<1x128xf32>
    %2 = tpu.matmul %0, %1, %cst {dimension_numbers = #tpu.dot_dimension_numbers<[1], [0], [0], [1], [0, 0, 1, 1], [], []>} : vector<1x128xf32>, vector<128x128xf32>, vector<1x128xf32> -> vector<1x128xf32>
    %cst_3 = arith.constant 5.000000e-01 : f32
    %3 = vector.broadcast %cst_3 : f32 to vector<1x128xf32>
    %cst_4 = arith.constant 0.000000e+00 : f32
    %4 = vector.broadcast %cst_4 : f32 to vector<1x128xf32>
    %5 = arith.addf %4, %2 : vector<1x128xf32>
    %6 = arith.cmpf oge, %5, %3 : vector<1x128xf32>
    %7 = arith.extui %6 : vector<1x128xi1> to vector<1x128xi32>
    %8 = arith.sitofp %7 : vector<1x128xi32> to vector<1x128xf32>
    %9 = arith.select %6, %4, %5 : vector<1x128xi1>, vector<1x128xf32>
    %c0_5 = arith.constant 0 : index
    %c0_6 = arith.constant 0 : index
    %10 = vector.load %arg2[%c0_5, %c0_6] : memref<100x128xf32, #tpu.memory_space<vmem>>, vector<1x128xf32>
    tpu.vector_store %arg2[%c0_5, %c0_6], %8 {strides = array<i32>} : memref<100x128xf32, #tpu.memory_space<vmem>>, vector<1x128xf32>,
    %c0_7 = arith.constant 0 : index
    %c0_8 = arith.constant 0 : index
    %11 = vector.load %arg3[%c0_7, %c0_8] : memref<100x128xf32, #tpu.memory_space<vmem>>, vector<1x128xf32>
    tpu.vector_store %arg3[%c0_7, %c0_8], %9 {strides = array<i32>} : memref<100x128xf32, #tpu.memory_space<vmem>>, vector<1x128xf32>,
    %12 = arith.addf %9, %2 : vector<1x128xf32>
    %13 = arith.cmpf oge, %12, %3 : vector<1x128xf32>
    %14 = arith.extui %13 : vector<1x128xi1> to vector<1x128xi32>
    %15 = arith.sitofp %14 : vector<1x128xi32> to vector<1x128xf32>
    %16 = arith.select %13, %4, %12 : vector<1x128xi1>, vector<1x128xf32>
    %c1 = arith.constant 1 : index
    %c0_9 = arith.constant 0 : index
    %17 = vector.load %arg2[%c1, %c0_9] : memref<100x128xf32, #tpu.memory_space<vmem>>, vector<1x128xf32>
    tpu.vector_store %arg2[%c1, %c0_9], %15 {strides = array<i32>} : memref<100x128xf32, #tpu.memory_space<vmem>>, vector<1x128xf32>,
    %c1_10 = arith.constant 1 : index
    %c0_11 = arith.constant 0 : index
    %18 = vector.load %arg3[%c1_10, %c0_11] : memref<100x128xf32, #tpu.memory_space<vmem>>, vector<1x128xf32>
    tpu.vector_store %arg3[%c1_10, %c0_11], %16 {strides = array<i32>} : memref<100x128xf32, #tpu.memory_space<vmem>>, vector<1x128xf32>,
    %19 = arith.addf %16, %2 : vector<1x128xf32>
    %20 = arith.cmpf oge, %19, %3 : vector<1x128xf32>
    %21 = arith.extui %20 : vector<1x128xi1> to vector<1x128xi32>
    %22 = arith.sitofp %21 : vector<1x128xi32> to vector<1x128xf32>
    %23 = arith.select %20, %4, %19 : vector<1x128xi1>, vector<1x128xf32>
    %c2 = arith.constant 2 : index
    %c0_12 = arith.constant 0 : index
    %24 = vector.load %arg2[%c2, %c0_12] : memref<100x128xf32, #tpu.memory_space<vmem>>, vector<1x128xf32>
    tpu.vector_store %arg2[%c2, %c0_12], %22 {strides = array<i32>} : memref<100x128xf32, #tpu.memory_space<vmem>>, vector<1x128xf32>,
    %c2_13 = arith.constant 2 : index
    %c0_14 = arith.constant 0 : index
    %25 = vector.load %arg3[%c2_13, %c0_14] : memref<100x128xf32, #tpu.memory_space<vmem>>, vector<1x128xf32>
    tpu.vector_store %arg3[%c2_13, %c0_14], %23 {strides = array<i32>} : memref<100x128xf32, #tpu.memory_space<vmem>>, vector<1x128xf32>,
    %26 = arith.addf %23, %2 : vector<1x128xf32>
    %27 = arith.cmpf oge, %26, %3 : vector<1x128xf32>
    %28 = arith.extui %27 : vector<1x128xi1> to vector<1x128xi32>
    %29 = arith.sitofp %28 : vector<1x128xi32> to vector<1x128xf32>
    %30 = arith.select %27, %4, %26 : vector<1x128xi1>, vector<1x128xf32>
    %c3 = arith.constant 3 : index
    %c0_15 = arith.constant 0 : index
    %31 = vector.load %arg2[%c3, %c0_15] : memref<100x128xf32, #tpu.memory_space<vmem>>, vector<1x128xf32>
    tpu.vector_store %arg2[%c3, %c0_15], %29 {strides = array<i32>} : memref<100x128xf32, #tpu.memory_space<vmem>>, vector<1x128xf32>,
    %c3_16 = arith.constant 3 : index
    %c0_17 = arith.constant 0 : index
    %32 = vector.load %arg3[%c3_16, %c0_17] : memref<100x128xf32, #tpu.memory_space<vmem>>, vector<1x128xf32>
    tpu.vector_store %arg3[%c3_16, %c0_17], %30 {strides = array<i32>} : memref<100x128xf32, #tpu.memory_space<vmem>>, vector<1x128xf32>,
    %33 = arith.addf %30, %2 : vector<1x128xf32>
    %34 = arith.cmpf oge, %33, %3 : vector<1x128xf32>
    %35 = arith.extui %34 : vector<1x128xi1> to vector<1x128xi32>
    %36 = arith.sitofp %35 : vector<1x128xi32> to vector<1x128xf32>
    %37 = arith.select %34, %4, %33 : vector<1x128xi1>, vector<1x128xf32>
    %c4 = arith.constant 4 : index
    %c0_18 = arith.constant 0 : index
    %38 = vector.load %arg2[%c4, %c0_18] : memref<100x128xf32, #tpu.memory_space<vmem>>, vector<1x128xf32>
    tpu.vector_store %arg2[%c4, %c0_18], %36 {strides = array<i32>} : memref<100x128xf32, #tpu.memory_space<vmem>>, vector<1x128xf32>,
    %c4_19 = arith.constant 4 : index
    %c0_20 = arith.constant 0 : index
    %39 = vector.load %arg3[%c4_19, %c0_20] : memref<100x128xf32, #tpu.memory_space<vmem>>, vector<1x128xf32>
    tpu.vector_store %arg3[%c4_19, %c0_20], %37 {strides = array<i32>} : memref<100x128xf32, #tpu.memory_space<vmem>>, vector<1x128xf32>,
    %40 = arith.addf %37, %2 : vector<1x128xf32>
    %41 = arith.cmpf oge, %40, %3 : vector<1x128xf32>
    %42 = arith.extui %41 : vector<1x128xi1> to vector<1x128xi32>
    %43 = arith.sitofp %42 : vector<1x128xi32> to vector<1x128xf32>
    %44 = arith.select %41, %4, %40 : vector<1x128xi1>, vector<1x128xf32>
    %c5 = arith.constant 5 : index
    %c0_21 = arith.constant 0 : index
    %45 = vector.load %arg2[%c5, %c0_21] : memref<100x128xf32, #tpu.memory_space<vmem>>, vector<1x128xf32>
    tpu.vector_store %arg2[%c5, %c0_21], %43 {strides = array<i32>} : memref<100x128xf32, #tpu.memory_space<vmem>>, vector<1x128xf32>,
    %c5_22 = arith.constant 5 : index
    %c0_23 = arith.constant 0 : index
    %46 = vector.load %arg3[%c5_22, %c0_23] : memref<100x128xf32, #tpu.memory_space<vmem>>, vector<1x128xf32>
    tpu.vector_store %arg3[%c5_22, %c0_23], %44 {strides = array<i32>} : memref<100x128xf32, #tpu.memory_space<vmem>>, vector<1x128xf32>,
    %47 = arith.addf %44, %2 : vector<1x128xf32>
    %48 = arith.cmpf oge, %47, %3 : vector<1x128xf32>
    %49 = arith.extui %48 : vector<1x128xi1> to vector<1x128xi32>
    %50 = arith.sitofp %49 : vector<1x128xi32> to vector<1x128xf32>
    %51 = arith.select %48, %4, %47 : vector<1x128xi1>, vector<1x128xf32>
    %c6 = arith.constant 6 : index
    %c0_24 = arith.constant 0 : index
    %52 = vector.load %arg2[%c6, %c0_24] : memref<100x128xf32, #tpu.memory_space<vmem>>, vector<1x128xf32>
    tpu.vector_store %arg2[%c6, %c0_24], %50 {strides = array<i32>} : memref<100x128xf32, #tpu.memory_space<vmem>>, vector<1x128xf32>,
    %c6_25 = arith.constant 6 : index
    %c0_26 = arith.constant 0 : index
    %53 = vector.load %arg3[%c6_25, %c0_26] : memref<100x128xf32, #tpu.memory_space<vmem>>, vector<1x128xf32>
    tpu.vector_store %arg3[%c6_25, %c0_26], %51 {strides = array<i32>} : memref<100x128xf32, #tpu.memory_space<vmem>>, vector<1x128xf32>,
    %54 = arith.addf %51, %2 : vector<1x128xf32>
    %55 = arith.cmpf oge, %54, %3 : vector<1x128xf32>
    %56 = arith.extui %55 : vector<1x128xi1> to vector<1x128xi32>
    %57 = arith.sitofp %56 : vector<1x128xi32> to vector<1x128xf32>
    %58 = arith.select %55, %4, %54 : vector<1x128xi1>, vector<1x128xf32>
    %c7 = arith.constant 7 : index
    %c0_27 = arith.constant 0 : index
    %59 = vector.load %arg2[%c7, %c0_27] : memref<100x128xf32, #tpu.memory_space<vmem>>, vector<1x128xf32>
    tpu.vector_store %arg2[%c7, %c0_27], %57 {strides = array<i32>} : memref<100x128xf32, #tpu.memory_space<vmem>>, vector<1x128xf32>,
    %c7_28 = arith.constant 7 : index
    %c0_29 = arith.constant 0 : index
    %60 = vector.load %arg3[%c7_28, %c0_29] : memref<100x128xf32, #tpu.memory_space<vmem>>, vector<1x128xf32>
    tpu.vector_store %arg3[%c7_28, %c0_29], %58 {strides = array<i32>} : memref<100x128xf32, #tpu.memory_space<vmem>>, vector<1x128xf32>,
    %61 = arith.addf %58, %2 : vector<1x128xf32>
    %62 = arith.cmpf oge, %61, %3 : vector<1x128xf32>
    %63 = arith.extui %62 : vector<1x128xi1> to vector<1x128xi32>
    %64 = arith.sitofp %63 : vector<1x128xi32> to vector<1x128xf32>
    %65 = arith.select %62, %4, %61 : vector<1x128xi1>, vector<1x128xf32>
    %c8 = arith.constant 8 : index
    %c0_30 = arith.constant 0 : index
    %66 = vector.load %arg2[%c8, %c0_30] : memref<100x128xf32, #tpu.memory_space<vmem>>, vector<1x128xf32>
    tpu.vector_store %arg2[%c8, %c0_30], %64 {strides = array<i32>} : memref<100x128xf32, #tpu.memory_space<vmem>>, vector<1x128xf32>,
    %c8_31 = arith.constant 8 : index
    %c0_32 = arith.constant 0 : index
    %67 = vector.load %arg3[%c8_31, %c0_32] : memref<100x128xf32, #tpu.memory_space<vmem>>, vector<1x128xf32>
    tpu.vector_store %arg3[%c8_31, %c0_32], %65 {strides = array<i32>} : memref<100x128xf32, #tpu.memory_space<vmem>>, vector<1x128xf32>,
    %68 = arith.addf %65, %2 : vector<1x128xf32>
    %69 = arith.cmpf oge, %68, %3 : vector<1x128xf32>
    %70 = arith.extui %69 : vector<1x128xi1> to vector<1x128xi32>
    %71 = arith.sitofp %70 : vector<1x128xi32> to vector<1x128xf32>
    %72 = arith.select %69, %4, %68 : vector<1x128xi1>, vector<1x128xf32>
    %c9 = arith.constant 9 : index
    %c0_33 = arith.constant 0 : index
    %73 = vector.load %arg2[%c9, %c0_33] : memref<100x128xf32, #tpu.memory_space<vmem>>, vector<1x128xf32>
    tpu.vector_store %arg2[%c9, %c0_33], %71 {strides = array<i32>} : memref<100x128xf32, #tpu.memory_space<vmem>>, vector<1x128xf32>,
    %c9_34 = arith.constant 9 : index
    %c0_35 = arith.constant 0 : index
    %74 = vector.load %arg3[%c9_34, %c0_35] : memref<100x128xf32, #tpu.memory_space<vmem>>, vector<1x128xf32>
    tpu.vector_store %arg3[%c9_34, %c0_35], %72 {strides = array<i32>} : memref<100x128xf32, #tpu.memory_space<vmem>>, vector<1x128xf32>,
    %75 = arith.addf %72, %2 : vector<1x128xf32>
    %76 = arith.cmpf oge, %75, %3 : vector<1x128xf32>
    %77 = arith.extui %76 : vector<1x128xi1> to vector<1x128xi32>
    %78 = arith.sitofp %77 : vector<1x128xi32> to vector<1x128xf32>
    %79 = arith.select %76, %4, %75 : vector<1x128xi1>, vector<1x128xf32>
    %c10 = arith.constant 10 : index
    %c0_36 = arith.constant 0 : index
    %80 = vector.load %arg2[%c10, %c0_36] : memref<100x128xf32, #tpu.memory_space<vmem>>, vector<1x128xf32>
    tpu.vector_store %arg2[%c10, %c0_36], %78 {strides = array<i32>} : memref<100x128xf32, #tpu.memory_space<vmem>>, vector<1x128xf32>,
    %c10_37 = arith.constant 10 : index
    %c0_38 = arith.constant 0 : index
    %81 = vector.load %arg3[%c10_37, %c0_38] : memref<100x128xf32, #tpu.memory_space<vmem>>, vector<1x128xf32>
    tpu.vector_store %arg3[%c10_37, %c0_38], %79 {strides = array<i32>} : memref<100x128xf32, #tpu.memory_space<vmem>>, vector<1x128xf32>,
    %82 = arith.addf %79, %2 : vector<1x128xf32>
    %83 = arith.cmpf oge, %82, %3 : vector<1x128xf32>
    %84 = arith.extui %83 : vector<1x128xi1> to vector<1x128xi32>
    %85 = arith.sitofp %84 : vector<1x128xi32> to vector<1x128xf32>
    %86 = arith.select %83, %4, %82 : vector<1x128xi1>, vector<1x128xf32>
    %c11 = arith.constant 11 : index
    %c0_39 = arith.constant 0 : index
    %87 = vector.load %arg2[%c11, %c0_39] : memref<100x128xf32, #tpu.memory_space<vmem>>, vector<1x128xf32>
    tpu.vector_store %arg2[%c11, %c0_39], %85 {strides = array<i32>} : memref<100x128xf32, #tpu.memory_space<vmem>>, vector<1x128xf32>,
    %c11_40 = arith.constant 11 : index
    %c0_41 = arith.constant 0 : index
    %88 = vector.load %arg3[%c11_40, %c0_41] : memref<100x128xf32, #tpu.memory_space<vmem>>, vector<1x128xf32>
    tpu.vector_store %arg3[%c11_40, %c0_41], %86 {strides = array<i32>} : memref<100x128xf32, #tpu.memory_space<vmem>>, vector<1x128xf32>,
    %89 = arith.addf %86, %2 : vector<1x128xf32>
    %90 = arith.cmpf oge, %89, %3 : vector<1x128xf32>
    %91 = arith.extui %90 : vector<1x128xi1> to vector<1x128xi32>
    %92 = arith.sitofp %91 : vector<1x128xi32> to vector<1x128xf32>
    %93 = arith.select %90, %4, %89 : vector<1x128xi1>, vector<1x128xf32>
    %c12 = arith.constant 12 : index
    %c0_42 = arith.constant 0 : index
    %94 = vector.load %arg2[%c12, %c0_42] : memref<100x128xf32, #tpu.memory_space<vmem>>, vector<1x128xf32>
    tpu.vector_store %arg2[%c12, %c0_42], %92 {strides = array<i32>} : memref<100x128xf32, #tpu.memory_space<vmem>>, vector<1x128xf32>,
    %c12_43 = arith.constant 12 : index
    %c0_44 = arith.constant 0 : index
    %95 = vector.load %arg3[%c12_43, %c0_44] : memref<100x128xf32, #tpu.memory_space<vmem>>, vector<1x128xf32>
    tpu.vector_store %arg3[%c12_43, %c0_44], %93 {strides = array<i32>} : memref<100x128xf32, #tpu.memory_space<vmem>>, vector<1x128xf32>,
    %96 = arith.addf %93, %2 : vector<1x128xf32>
    %97 = arith.cmpf oge, %96, %3 : vector<1x128xf32>
    %98 = arith.extui %97 : vector<1x128xi1> to vector<1x128xi32>
    %99 = arith.sitofp %98 : vector<1x128xi32> to vector<1x128xf32>
    %100 = arith.select %97, %4, %96 : vector<1x128xi1>, vector<1x128xf32>
    %c13 = arith.constant 13 : index
    %c0_45 = arith.constant 0 : index
    %101 = vector.load %arg2[%c13, %c0_45] : memref<100x128xf32, #tpu.memory_space<vmem>>, vector<1x128xf32>
    tpu.vector_store %arg2[%c13, %c0_45], %99 {strides = array<i32>} : memref<100x128xf32, #tpu.memory_space<vmem>>, vector<1x128xf32>,
    %c13_46 = arith.constant 13 : index
    %c0_47 = arith.constant 0 : index
    %102 = vector.load %arg3[%c13_46, %c0_47] : memref<100x128xf32, #tpu.memory_space<vmem>>, vector<1x128xf32>
    tpu.vector_store %arg3[%c13_46, %c0_47], %100 {strides = array<i32>} : memref<100x128xf32, #tpu.memory_space<vmem>>, vector<1x128xf32>,
    %103 = arith.addf %100, %2 : vector<1x128xf32>
    %104 = arith.cmpf oge, %103, %3 : vector<1x128xf32>
    %105 = arith.extui %104 : vector<1x128xi1> to vector<1x128xi32>
    %106 = arith.sitofp %105 : vector<1x128xi32> to vector<1x128xf32>
    %107 = arith.select %104, %4, %103 : vector<1x128xi1>, vector<1x128xf32>
    %c14 = arith.constant 14 : index
    %c0_48 = arith.constant 0 : index
    %108 = vector.load %arg2[%c14, %c0_48] : memref<100x128xf32, #tpu.memory_space<vmem>>, vector<1x128xf32>
    tpu.vector_store %arg2[%c14, %c0_48], %106 {strides = array<i32>} : memref<100x128xf32, #tpu.memory_space<vmem>>, vector<1x128xf32>,
    %c14_49 = arith.constant 14 : index
    %c0_50 = arith.constant 0 : index
    %109 = vector.load %arg3[%c14_49, %c0_50] : memref<100x128xf32, #tpu.memory_space<vmem>>, vector<1x128xf32>
    tpu.vector_store %arg3[%c14_49, %c0_50], %107 {strides = array<i32>} : memref<100x128xf32, #tpu.memory_space<vmem>>, vector<1x128xf32>,
    %110 = arith.addf %107, %2 : vector<1x128xf32>
    %111 = arith.cmpf oge, %110, %3 : vector<1x128xf32>
    %112 = arith.extui %111 : vector<1x128xi1> to vector<1x128xi32>
    %113 = arith.sitofp %112 : vector<1x128xi32> to vector<1x128xf32>
    %114 = arith.select %111, %4, %110 : vector<1x128xi1>, vector<1x128xf32>
    %c15 = arith.constant 15 : index
    %c0_51 = arith.constant 0 : index
    %115 = vector.load %arg2[%c15, %c0_51] : memref<100x128xf32, #tpu.memory_space<vmem>>, vector<1x128xf32>
    tpu.vector_store %arg2[%c15, %c0_51], %113 {strides = array<i32>} : memref<100x128xf32, #tpu.memory_space<vmem>>, vector<1x128xf32>,
    %c15_52 = arith.constant 15 : index
    %c0_53 = arith.constant 0 : index
    %116 = vector.load %arg3[%c15_52, %c0_53] : memref<100x128xf32, #tpu.memory_space<vmem>>, vector<1x128xf32>
    tpu.vector_store %arg3[%c15_52, %c0_53], %114 {strides = array<i32>} : memref<100x128xf32, #tpu.memory_space<vmem>>, vector<1x128xf32>,
    %117 = arith.addf %114, %2 : vector<1x128xf32>
    %118 = arith.cmpf oge, %117, %3 : vector<1x128xf32>
    %119 = arith.extui %118 : vector<1x128xi1> to vector<1x128xi32>
    %120 = arith.sitofp %119 : vector<1x128xi32> to vector<1x128xf32>
    %121 = arith.select %118, %4, %117 : vector<1x128xi1>, vector<1x128xf32>
    %c16 = arith.constant 16 : index
    %c0_54 = arith.constant 0 : index
    %122 = vector.load %arg2[%c16, %c0_54] : memref<100x128xf32, #tpu.memory_space<vmem>>, vector<1x128xf32>
    tpu.vector_store %arg2[%c16, %c0_54], %120 {strides = array<i32>} : memref<100x128xf32, #tpu.memory_space<vmem>>, vector<1x128xf32>,
    %c16_55 = arith.constant 16 : index
    %c0_56 = arith.constant 0 : index
    %123 = vector.load %arg3[%c16_55, %c0_56] : memref<100x128xf32, #tpu.memory_space<vmem>>, vector<1x128xf32>
    tpu.vector_store %arg3[%c16_55, %c0_56], %121 {strides = array<i32>} : memref<100x128xf32, #tpu.memory_space<vmem>>, vector<1x128xf32>,
    %124 = arith.addf %121, %2 : vector<1x128xf32>
    %125 = arith.cmpf oge, %124, %3 : vector<1x128xf32>
    %126 = arith.extui %125 : vector<1x128xi1> to vector<1x128xi32>
    %127 = arith.sitofp %126 : vector<1x128xi32> to vector<1x128xf32>
    %128 = arith.select %125, %4, %124 : vector<1x128xi1>, vector<1x128xf32>
    %c17 = arith.constant 17 : index
    %c0_57 = arith.constant 0 : index
    %129 = vector.load %arg2[%c17, %c0_57] : memref<100x128xf32, #tpu.memory_space<vmem>>, vector<1x128xf32>
    tpu.vector_store %arg2[%c17, %c0_57], %127 {strides = array<i32>} : memref<100x128xf32, #tpu.memory_space<vmem>>, vector<1x128xf32>,
    %c17_58 = arith.constant 17 : index
    %c0_59 = arith.constant 0 : index
    %130 = vector.load %arg3[%c17_58, %c0_59] : memref<100x128xf32, #tpu.memory_space<vmem>>, vector<1x128xf32>
    tpu.vector_store %arg3[%c17_58, %c0_59], %128 {strides = array<i32>} : memref<100x128xf32, #tpu.memory_space<vmem>>, vector<1x128xf32>,
    %131 = arith.addf %128, %2 : vector<1x128xf32>
    %132 = arith.cmpf oge, %131, %3 : vector<1x128xf32>
    %133 = arith.extui %132 : vector<1x128xi1> to vector<1x128xi32>
    %134 = arith.sitofp %133 : vector<1x128xi32> to vector<1x128xf32>
    %135 = arith.select %132, %4, %131 : vector<1x128xi1>, vector<1x128xf32>
    %c18 = arith.constant 18 : index
    %c0_60 = arith.constant 0 : index
    %136 = vector.load %arg2[%c18, %c0_60] : memref<100x128xf32, #tpu.memory_space<vmem>>, vector<1x128xf32>
    tpu.vector_store %arg2[%c18, %c0_60], %134 {strides = array<i32>} : memref<100x128xf32, #tpu.memory_space<vmem>>, vector<1x128xf32>,
    %c18_61 = arith.constant 18 : index
    %c0_62 = arith.constant 0 : index
    %137 = vector.load %arg3[%c18_61, %c0_62] : memref<100x128xf32, #tpu.memory_space<vmem>>, vector<1x128xf32>
    tpu.vector_store %arg3[%c18_61, %c0_62], %135 {strides = array<i32>} : memref<100x128xf32, #tpu.memory_space<vmem>>, vector<1x128xf32>,
    %138 = arith.addf %135, %2 : vector<1x128xf32>
    %139 = arith.cmpf oge, %138, %3 : vector<1x128xf32>
    %140 = arith.extui %139 : vector<1x128xi1> to vector<1x128xi32>
    %141 = arith.sitofp %140 : vector<1x128xi32> to vector<1x128xf32>
    %142 = arith.select %139, %4, %138 : vector<1x128xi1>, vector<1x128xf32>
    %c19 = arith.constant 19 : index
    %c0_63 = arith.constant 0 : index
    %143 = vector.load %arg2[%c19, %c0_63] : memref<100x128xf32, #tpu.memory_space<vmem>>, vector<1x128xf32>
    tpu.vector_store %arg2[%c19, %c0_63], %141 {strides = array<i32>} : memref<100x128xf32, #tpu.memory_space<vmem>>, vector<1x128xf32>,
    %c19_64 = arith.constant 19 : index
    %c0_65 = arith.constant 0 : index
    %144 = vector.load %arg3[%c19_64, %c0_65] : memref<100x128xf32, #tpu.memory_space<vmem>>, vector<1x128xf32>
    tpu.vector_store %arg3[%c19_64, %c0_65], %142 {strides = array<i32>} : memref<100x128xf32, #tpu.memory_space<vmem>>, vector<1x128xf32>,
    %145 = arith.addf %142, %2 : vector<1x128xf32>
    %146 = arith.cmpf oge, %145, %3 : vector<1x128xf32>
    %147 = arith.extui %146 : vector<1x128xi1> to vector<1x128xi32>
    %148 = arith.sitofp %147 : vector<1x128xi32> to vector<1x128xf32>
    %149 = arith.select %146, %4, %145 : vector<1x128xi1>, vector<1x128xf32>
    %c20 = arith.constant 20 : index
    %c0_66 = arith.constant 0 : index
    %150 = vector.load %arg2[%c20, %c0_66] : memref<100x128xf32, #tpu.memory_space<vmem>>, vector<1x128xf32>
    tpu.vector_store %arg2[%c20, %c0_66], %148 {strides = array<i32>} : memref<100x128xf32, #tpu.memory_space<vmem>>, vector<1x128xf32>,
    %c20_67 = arith.constant 20 : index
    %c0_68 = arith.constant 0 : index
    %151 = vector.load %arg3[%c20_67, %c0_68] : memref<100x128xf32, #tpu.memory_space<vmem>>, vector<1x128xf32>
    tpu.vector_store %arg3[%c20_67, %c0_68], %149 {strides = array<i32>} : memref<100x128xf32, #tpu.memory_space<vmem>>, vector<1x128xf32>,
    %152 = arith.addf %149, %2 : vector<1x128xf32>
    %153 = arith.cmpf oge, %152, %3 : vector<1x128xf32>
    %154 = arith.extui %153 : vector<1x128xi1> to vector<1x128xi32>
    %155 = arith.sitofp %154 : vector<1x128xi32> to vector<1x128xf32>
    %156 = arith.select %153, %4, %152 : vector<1x128xi1>, vector<1x128xf32>
    %c21 = arith.constant 21 : index
    %c0_69 = arith.constant 0 : index
    %157 = vector.load %arg2[%c21, %c0_69] : memref<100x128xf32, #tpu.memory_space<vmem>>, vector<1x128xf32>
    tpu.vector_store %arg2[%c21, %c0_69], %155 {strides = array<i32>} : memref<100x128xf32, #tpu.memory_space<vmem>>, vector<1x128xf32>,
    %c21_70 = arith.constant 21 : index
    %c0_71 = arith.constant 0 : index
    %158 = vector.load %arg3[%c21_70, %c0_71] : memref<100x128xf32, #tpu.memory_space<vmem>>, vector<1x128xf32>
    tpu.vector_store %arg3[%c21_70, %c0_71], %156 {strides = array<i32>} : memref<100x128xf32, #tpu.memory_space<vmem>>, vector<1x128xf32>,
    %159 = arith.addf %156, %2 : vector<1x128xf32>
    %160 = arith.cmpf oge, %159, %3 : vector<1x128xf32>
    %161 = arith.extui %160 : vector<1x128xi1> to vector<1x128xi32>
    %162 = arith.sitofp %161 : vector<1x128xi32> to vector<1x128xf32>
    %163 = arith.select %160, %4, %159 : vector<1x128xi1>, vector<1x128xf32>
    %c22 = arith.constant 22 : index
    %c0_72 = arith.constant 0 : index
    %164 = vector.load %arg2[%c22, %c0_72] : memref<100x128xf32, #tpu.memory_space<vmem>>, vector<1x128xf32>
    tpu.vector_store %arg2[%c22, %c0_72], %162 {strides = array<i32>} : memref<100x128xf32, #tpu.memory_space<vmem>>, vector<1x128xf32>,
    %c22_73 = arith.constant 22 : index
    %c0_74 = arith.constant 0 : index
    %165 = vector.load %arg3[%c22_73, %c0_74] : memref<100x128xf32, #tpu.memory_space<vmem>>, vector<1x128xf32>
    tpu.vector_store %arg3[%c22_73, %c0_74], %163 {strides = array<i32>} : memref<100x128xf32, #tpu.memory_space<vmem>>, vector<1x128xf32>,
    %166 = arith.addf %163, %2 : vector<1x128xf32>
    %167 = arith.cmpf oge, %166, %3 : vector<1x128xf32>
    %168 = arith.extui %167 : vector<1x128xi1> to vector<1x128xi32>
    %169 = arith.sitofp %168 : vector<1x128xi32> to vector<1x128xf32>
    %170 = arith.select %167, %4, %166 : vector<1x128xi1>, vector<1x128xf32>
    %c23 = arith.constant 23 : index
    %c0_75 = arith.constant 0 : index
    %171 = vector.load %arg2[%c23, %c0_75] : memref<100x128xf32, #tpu.memory_space<vmem>>, vector<1x128xf32>
    tpu.vector_store %arg2[%c23, %c0_75], %169 {strides = array<i32>} : memref<100x128xf32, #tpu.memory_space<vmem>>, vector<1x128xf32>,
    %c23_76 = arith.constant 23 : index
    %c0_77 = arith.constant 0 : index
    %172 = vector.load %arg3[%c23_76, %c0_77] : memref<100x128xf32, #tpu.memory_space<vmem>>, vector<1x128xf32>
    tpu.vector_store %arg3[%c23_76, %c0_77], %170 {strides = array<i32>} : memref<100x128xf32, #tpu.memory_space<vmem>>, vector<1x128xf32>,
    %173 = arith.addf %170, %2 : vector<1x128xf32>
    %174 = arith.cmpf oge, %173, %3 : vector<1x128xf32>
    %175 = arith.extui %174 : vector<1x128xi1> to vector<1x128xi32>
    %176 = arith.sitofp %175 : vector<1x128xi32> to vector<1x128xf32>
    %177 = arith.select %174, %4, %173 : vector<1x128xi1>, vector<1x128xf32>
    %c24 = arith.constant 24 : index
    %c0_78 = arith.constant 0 : index
    %178 = vector.load %arg2[%c24, %c0_78] : memref<100x128xf32, #tpu.memory_space<vmem>>, vector<1x128xf32>
    tpu.vector_store %arg2[%c24, %c0_78], %176 {strides = array<i32>} : memref<100x128xf32, #tpu.memory_space<vmem>>, vector<1x128xf32>,
    %c24_79 = arith.constant 24 : index
    %c0_80 = arith.constant 0 : index
    %179 = vector.load %arg3[%c24_79, %c0_80] : memref<100x128xf32, #tpu.memory_space<vmem>>, vector<1x128xf32>
    tpu.vector_store %arg3[%c24_79, %c0_80], %177 {strides = array<i32>} : memref<100x128xf32, #tpu.memory_space<vmem>>, vector<1x128xf32>,
    %180 = arith.addf %177, %2 : vector<1x128xf32>
    %181 = arith.cmpf oge, %180, %3 : vector<1x128xf32>
    %182 = arith.extui %181 : vector<1x128xi1> to vector<1x128xi32>
    %183 = arith.sitofp %182 : vector<1x128xi32> to vector<1x128xf32>
    %184 = arith.select %181, %4, %180 : vector<1x128xi1>, vector<1x128xf32>
    %c25 = arith.constant 25 : index
    %c0_81 = arith.constant 0 : index
    %185 = vector.load %arg2[%c25, %c0_81] : memref<100x128xf32, #tpu.memory_space<vmem>>, vector<1x128xf32>
    tpu.vector_store %arg2[%c25, %c0_81], %183 {strides = array<i32>} : memref<100x128xf32, #tpu.memory_space<vmem>>, vector<1x128xf32>,
    %c25_82 = arith.constant 25 : index
    %c0_83 = arith.constant 0 : index
    %186 = vector.load %arg3[%c25_82, %c0_83] : memref<100x128xf32, #tpu.memory_space<vmem>>, vector<1x128xf32>
    tpu.vector_store %arg3[%c25_82, %c0_83], %184 {strides = array<i32>} : memref<100x128xf32, #tpu.memory_space<vmem>>, vector<1x128xf32>,
    %187 = arith.addf %184, %2 : vector<1x128xf32>
    %188 = arith.cmpf oge, %187, %3 : vector<1x128xf32>
    %189 = arith.extui %188 : vector<1x128xi1> to vector<1x128xi32>
    %190 = arith.sitofp %189 : vector<1x128xi32> to vector<1x128xf32>
    %191 = arith.select %188, %4, %187 : vector<1x128xi1>, vector<1x128xf32>
    %c26 = arith.constant 26 : index
    %c0_84 = arith.constant 0 : index
    %192 = vector.load %arg2[%c26, %c0_84] : memref<100x128xf32, #tpu.memory_space<vmem>>, vector<1x128xf32>
    tpu.vector_store %arg2[%c26, %c0_84], %190 {strides = array<i32>} : memref<100x128xf32, #tpu.memory_space<vmem>>, vector<1x128xf32>,
    %c26_85 = arith.constant 26 : index
    %c0_86 = arith.constant 0 : index
    %193 = vector.load %arg3[%c26_85, %c0_86] : memref<100x128xf32, #tpu.memory_space<vmem>>, vector<1x128xf32>
    tpu.vector_store %arg3[%c26_85, %c0_86], %191 {strides = array<i32>} : memref<100x128xf32, #tpu.memory_space<vmem>>, vector<1x128xf32>,
    %194 = arith.addf %191, %2 : vector<1x128xf32>
    %195 = arith.cmpf oge, %194, %3 : vector<1x128xf32>
    %196 = arith.extui %195 : vector<1x128xi1> to vector<1x128xi32>
    %197 = arith.sitofp %196 : vector<1x128xi32> to vector<1x128xf32>
    %198 = arith.select %195, %4, %194 : vector<1x128xi1>, vector<1x128xf32>
    %c27 = arith.constant 27 : index
    %c0_87 = arith.constant 0 : index
    %199 = vector.load %arg2[%c27, %c0_87] : memref<100x128xf32, #tpu.memory_space<vmem>>, vector<1x128xf32>
    tpu.vector_store %arg2[%c27, %c0_87], %197 {strides = array<i32>} : memref<100x128xf32, #tpu.memory_space<vmem>>, vector<1x128xf32>,
    %c27_88 = arith.constant 27 : index
    %c0_89 = arith.constant 0 : index
    %200 = vector.load %arg3[%c27_88, %c0_89] : memref<100x128xf32, #tpu.memory_space<vmem>>, vector<1x128xf32>
    tpu.vector_store %arg3[%c27_88, %c0_89], %198 {strides = array<i32>} : memref<100x128xf32, #tpu.memory_space<vmem>>, vector<1x128xf32>,
    %201 = arith.addf %198, %2 : vector<1x128xf32>
    %202 = arith.cmpf oge, %201, %3 : vector<1x128xf32>
    %203 = arith.extui %202 : vector<1x128xi1> to vector<1x128xi32>
    %204 = arith.sitofp %203 : vector<1x128xi32> to vector<1x128xf32>
    %205 = arith.select %202, %4, %201 : vector<1x128xi1>, vector<1x128xf32>
    %c28 = arith.constant 28 : index
    %c0_90 = arith.constant 0 : index
    %206 = vector.load %arg2[%c28, %c0_90] : memref<100x128xf32, #tpu.memory_space<vmem>>, vector<1x128xf32>
    tpu.vector_store %arg2[%c28, %c0_90], %204 {strides = array<i32>} : memref<100x128xf32, #tpu.memory_space<vmem>>, vector<1x128xf32>,
    %c28_91 = arith.constant 28 : index
    %c0_92 = arith.constant 0 : index
    %207 = vector.load %arg3[%c28_91, %c0_92] : memref<100x128xf32, #tpu.memory_space<vmem>>, vector<1x128xf32>
    tpu.vector_store %arg3[%c28_91, %c0_92], %205 {strides = array<i32>} : memref<100x128xf32, #tpu.memory_space<vmem>>, vector<1x128xf32>,
    %208 = arith.addf %205, %2 : vector<1x128xf32>
    %209 = arith.cmpf oge, %208, %3 : vector<1x128xf32>
    %210 = arith.extui %209 : vector<1x128xi1> to vector<1x128xi32>
    %211 = arith.sitofp %210 : vector<1x128xi32> to vector<1x128xf32>
    %212 = arith.select %209, %4, %208 : vector<1x128xi1>, vector<1x128xf32>
    %c29 = arith.constant 29 : index
    %c0_93 = arith.constant 0 : index
    %213 = vector.load %arg2[%c29, %c0_93] : memref<100x128xf32, #tpu.memory_space<vmem>>, vector<1x128xf32>
    tpu.vector_store %arg2[%c29, %c0_93], %211 {strides = array<i32>} : memref<100x128xf32, #tpu.memory_space<vmem>>, vector<1x128xf32>,
    %c29_94 = arith.constant 29 : index
    %c0_95 = arith.constant 0 : index
    %214 = vector.load %arg3[%c29_94, %c0_95] : memref<100x128xf32, #tpu.memory_space<vmem>>, vector<1x128xf32>
    tpu.vector_store %arg3[%c29_94, %c0_95], %212 {strides = array<i32>} : memref<100x128xf32, #tpu.memory_space<vmem>>, vector<1x128xf32>,
    %215 = arith.addf %212, %2 : vector<1x128xf32>
    %216 = arith.cmpf oge, %215, %3 : vector<1x128xf32>
    %217 = arith.extui %216 : vector<1x128xi1> to vector<1x128xi32>
    %218 = arith.sitofp %217 : vector<1x128xi32> to vector<1x128xf32>
    %219 = arith.select %216, %4, %215 : vector<1x128xi1>, vector<1x128xf32>
    %c30 = arith.constant 30 : index
    %c0_96 = arith.constant 0 : index
    %220 = vector.load %arg2[%c30, %c0_96] : memref<100x128xf32, #tpu.memory_space<vmem>>, vector<1x128xf32>
    tpu.vector_store %arg2[%c30, %c0_96], %218 {strides = array<i32>} : memref<100x128xf32, #tpu.memory_space<vmem>>, vector<1x128xf32>,
    %c30_97 = arith.constant 30 : index
    %c0_98 = arith.constant 0 : index
    %221 = vector.load %arg3[%c30_97, %c0_98] : memref<100x128xf32, #tpu.memory_space<vmem>>, vector<1x128xf32>
    tpu.vector_store %arg3[%c30_97, %c0_98], %219 {strides = array<i32>} : memref<100x128xf32, #tpu.memory_space<vmem>>, vector<1x128xf32>,
    %222 = arith.addf %219, %2 : vector<1x128xf32>
    %223 = arith.cmpf oge, %222, %3 : vector<1x128xf32>
    %224 = arith.extui %223 : vector<1x128xi1> to vector<1x128xi32>
    %225 = arith.sitofp %224 : vector<1x128xi32> to vector<1x128xf32>
    %226 = arith.select %223, %4, %222 : vector<1x128xi1>, vector<1x128xf32>
    %c31 = arith.constant 31 : index
    %c0_99 = arith.constant 0 : index
    %227 = vector.load %arg2[%c31, %c0_99] : memref<100x128xf32, #tpu.memory_space<vmem>>, vector<1x128xf32>
    tpu.vector_store %arg2[%c31, %c0_99], %225 {strides = array<i32>} : memref<100x128xf32, #tpu.memory_space<vmem>>, vector<1x128xf32>,
    %c31_100 = arith.constant 31 : index
    %c0_101 = arith.constant 0 : index
    %228 = vector.load %arg3[%c31_100, %c0_101] : memref<100x128xf32, #tpu.memory_space<vmem>>, vector<1x128xf32>
    tpu.vector_store %arg3[%c31_100, %c0_101], %226 {strides = array<i32>} : memref<100x128xf32, #tpu.memory_space<vmem>>, vector<1x128xf32>,
    %229 = arith.addf %226, %2 : vector<1x128xf32>
    %230 = arith.cmpf oge, %229, %3 : vector<1x128xf32>
    %231 = arith.extui %230 : vector<1x128xi1> to vector<1x128xi32>
    %232 = arith.sitofp %231 : vector<1x128xi32> to vector<1x128xf32>
    %233 = arith.select %230, %4, %229 : vector<1x128xi1>, vector<1x128xf32>
    %c32 = arith.constant 32 : index
    %c0_102 = arith.constant 0 : index
    %234 = vector.load %arg2[%c32, %c0_102] : memref<100x128xf32, #tpu.memory_space<vmem>>, vector<1x128xf32>
    tpu.vector_store %arg2[%c32, %c0_102], %232 {strides = array<i32>} : memref<100x128xf32, #tpu.memory_space<vmem>>, vector<1x128xf32>,
    %c32_103 = arith.constant 32 : index
    %c0_104 = arith.constant 0 : index
    %235 = vector.load %arg3[%c32_103, %c0_104] : memref<100x128xf32, #tpu.memory_space<vmem>>, vector<1x128xf32>
    tpu.vector_store %arg3[%c32_103, %c0_104], %233 {strides = array<i32>} : memref<100x128xf32, #tpu.memory_space<vmem>>, vector<1x128xf32>,
    %236 = arith.addf %233, %2 : vector<1x128xf32>
    %237 = arith.cmpf oge, %236, %3 : vector<1x128xf32>
    %238 = arith.extui %237 : vector<1x128xi1> to vector<1x128xi32>
    %239 = arith.sitofp %238 : vector<1x128xi32> to vector<1x128xf32>
    %240 = arith.select %237, %4, %236 : vector<1x128xi1>, vector<1x128xf32>
    %c33 = arith.constant 33 : index
    %c0_105 = arith.constant 0 : index
    %241 = vector.load %arg2[%c33, %c0_105] : memref<100x128xf32, #tpu.memory_space<vmem>>, vector<1x128xf32>
    tpu.vector_store %arg2[%c33, %c0_105], %239 {strides = array<i32>} : memref<100x128xf32, #tpu.memory_space<vmem>>, vector<1x128xf32>,
    %c33_106 = arith.constant 33 : index
    %c0_107 = arith.constant 0 : index
    %242 = vector.load %arg3[%c33_106, %c0_107] : memref<100x128xf32, #tpu.memory_space<vmem>>, vector<1x128xf32>
    tpu.vector_store %arg3[%c33_106, %c0_107], %240 {strides = array<i32>} : memref<100x128xf32, #tpu.memory_space<vmem>>, vector<1x128xf32>,
    %243 = arith.addf %240, %2 : vector<1x128xf32>
    %244 = arith.cmpf oge, %243, %3 : vector<1x128xf32>
    %245 = arith.extui %244 : vector<1x128xi1> to vector<1x128xi32>
    %246 = arith.sitofp %245 : vector<1x128xi32> to vector<1x128xf32>
    %247 = arith.select %244, %4, %243 : vector<1x128xi1>, vector<1x128xf32>
    %c34 = arith.constant 34 : index
    %c0_108 = arith.constant 0 : index
    %248 = vector.load %arg2[%c34, %c0_108] : memref<100x128xf32, #tpu.memory_space<vmem>>, vector<1x128xf32>
    tpu.vector_store %arg2[%c34, %c0_108], %246 {strides = array<i32>} : memref<100x128xf32, #tpu.memory_space<vmem>>, vector<1x128xf32>,
    %c34_109 = arith.constant 34 : index
    %c0_110 = arith.constant 0 : index
    %249 = vector.load %arg3[%c34_109, %c0_110] : memref<100x128xf32, #tpu.memory_space<vmem>>, vector<1x128xf32>
    tpu.vector_store %arg3[%c34_109, %c0_110], %247 {strides = array<i32>} : memref<100x128xf32, #tpu.memory_space<vmem>>, vector<1x128xf32>,
    %250 = arith.addf %247, %2 : vector<1x128xf32>
    %251 = arith.cmpf oge, %250, %3 : vector<1x128xf32>
    %252 = arith.extui %251 : vector<1x128xi1> to vector<1x128xi32>
    %253 = arith.sitofp %252 : vector<1x128xi32> to vector<1x128xf32>
    %254 = arith.select %251, %4, %250 : vector<1x128xi1>, vector<1x128xf32>
    %c35 = arith.constant 35 : index
    %c0_111 = arith.constant 0 : index
    %255 = vector.load %arg2[%c35, %c0_111] : memref<100x128xf32, #tpu.memory_space<vmem>>, vector<1x128xf32>
    tpu.vector_store %arg2[%c35, %c0_111], %253 {strides = array<i32>} : memref<100x128xf32, #tpu.memory_space<vmem>>, vector<1x128xf32>,
    %c35_112 = arith.constant 35 : index
    %c0_113 = arith.constant 0 : index
    %256 = vector.load %arg3[%c35_112, %c0_113] : memref<100x128xf32, #tpu.memory_space<vmem>>, vector<1x128xf32>
    tpu.vector_store %arg3[%c35_112, %c0_113], %254 {strides = array<i32>} : memref<100x128xf32, #tpu.memory_space<vmem>>, vector<1x128xf32>,
    %257 = arith.addf %254, %2 : vector<1x128xf32>
    %258 = arith.cmpf oge, %257, %3 : vector<1x128xf32>
    %259 = arith.extui %258 : vector<1x128xi1> to vector<1x128xi32>
    %260 = arith.sitofp %259 : vector<1x128xi32> to vector<1x128xf32>
    %261 = arith.select %258, %4, %257 : vector<1x128xi1>, vector<1x128xf32>
    %c36 = arith.constant 36 : index
    %c0_114 = arith.constant 0 : index
    %262 = vector.load %arg2[%c36, %c0_114] : memref<100x128xf32, #tpu.memory_space<vmem>>, vector<1x128xf32>
    tpu.vector_store %arg2[%c36, %c0_114], %260 {strides = array<i32>} : memref<100x128xf32, #tpu.memory_space<vmem>>, vector<1x128xf32>,
    %c36_115 = arith.constant 36 : index
    %c0_116 = arith.constant 0 : index
    %263 = vector.load %arg3[%c36_115, %c0_116] : memref<100x128xf32, #tpu.memory_space<vmem>>, vector<1x128xf32>
    tpu.vector_store %arg3[%c36_115, %c0_116], %261 {strides = array<i32>} : memref<100x128xf32, #tpu.memory_space<vmem>>, vector<1x128xf32>,
    %264 = arith.addf %261, %2 : vector<1x128xf32>
    %265 = arith.cmpf oge, %264, %3 : vector<1x128xf32>
    %266 = arith.extui %265 : vector<1x128xi1> to vector<1x128xi32>
    %267 = arith.sitofp %266 : vector<1x128xi32> to vector<1x128xf32>
    %268 = arith.select %265, %4, %264 : vector<1x128xi1>, vector<1x128xf32>
    %c37 = arith.constant 37 : index
    %c0_117 = arith.constant 0 : index
    %269 = vector.load %arg2[%c37, %c0_117] : memref<100x128xf32, #tpu.memory_space<vmem>>, vector<1x128xf32>
    tpu.vector_store %arg2[%c37, %c0_117], %267 {strides = array<i32>} : memref<100x128xf32, #tpu.memory_space<vmem>>, vector<1x128xf32>,
    %c37_118 = arith.constant 37 : index
    %c0_119 = arith.constant 0 : index
    %270 = vector.load %arg3[%c37_118, %c0_119] : memref<100x128xf32, #tpu.memory_space<vmem>>, vector<1x128xf32>
    tpu.vector_store %arg3[%c37_118, %c0_119], %268 {strides = array<i32>} : memref<100x128xf32, #tpu.memory_space<vmem>>, vector<1x128xf32>,
    %271 = arith.addf %268, %2 : vector<1x128xf32>
    %272 = arith.cmpf oge, %271, %3 : vector<1x128xf32>
    %273 = arith.extui %272 : vector<1x128xi1> to vector<1x128xi32>
    %274 = arith.sitofp %273 : vector<1x128xi32> to vector<1x128xf32>
    %275 = arith.select %272, %4, %271 : vector<1x128xi1>, vector<1x128xf32>
    %c38 = arith.constant 38 : index
    %c0_120 = arith.constant 0 : index
    %276 = vector.load %arg2[%c38, %c0_120] : memref<100x128xf32, #tpu.memory_space<vmem>>, vector<1x128xf32>
    tpu.vector_store %arg2[%c38, %c0_120], %274 {strides = array<i32>} : memref<100x128xf32, #tpu.memory_space<vmem>>, vector<1x128xf32>,
    %c38_121 = arith.constant 38 : index
    %c0_122 = arith.constant 0 : index
    %277 = vector.load %arg3[%c38_121, %c0_122] : memref<100x128xf32, #tpu.memory_space<vmem>>, vector<1x128xf32>
    tpu.vector_store %arg3[%c38_121, %c0_122], %275 {strides = array<i32>} : memref<100x128xf32, #tpu.memory_space<vmem>>, vector<1x128xf32>,
    %278 = arith.addf %275, %2 : vector<1x128xf32>
    %279 = arith.cmpf oge, %278, %3 : vector<1x128xf32>
    %280 = arith.extui %279 : vector<1x128xi1> to vector<1x128xi32>
    %281 = arith.sitofp %280 : vector<1x128xi32> to vector<1x128xf32>
    %282 = arith.select %279, %4, %278 : vector<1x128xi1>, vector<1x128xf32>
    %c39 = arith.constant 39 : index
    %c0_123 = arith.constant 0 : index
    %283 = vector.load %arg2[%c39, %c0_123] : memref<100x128xf32, #tpu.memory_space<vmem>>, vector<1x128xf32>
    tpu.vector_store %arg2[%c39, %c0_123], %281 {strides = array<i32>} : memref<100x128xf32, #tpu.memory_space<vmem>>, vector<1x128xf32>,
    %c39_124 = arith.constant 39 : index
    %c0_125 = arith.constant 0 : index
    %284 = vector.load %arg3[%c39_124, %c0_125] : memref<100x128xf32, #tpu.memory_space<vmem>>, vector<1x128xf32>
    tpu.vector_store %arg3[%c39_124, %c0_125], %282 {strides = array<i32>} : memref<100x128xf32, #tpu.memory_space<vmem>>, vector<1x128xf32>,
    %285 = arith.addf %282, %2 : vector<1x128xf32>
    %286 = arith.cmpf oge, %285, %3 : vector<1x128xf32>
    %287 = arith.extui %286 : vector<1x128xi1> to vector<1x128xi32>
    %288 = arith.sitofp %287 : vector<1x128xi32> to vector<1x128xf32>
    %289 = arith.select %286, %4, %285 : vector<1x128xi1>, vector<1x128xf32>
    %c40 = arith.constant 40 : index
    %c0_126 = arith.constant 0 : index
    %290 = vector.load %arg2[%c40, %c0_126] : memref<100x128xf32, #tpu.memory_space<vmem>>, vector<1x128xf32>
    tpu.vector_store %arg2[%c40, %c0_126], %288 {strides = array<i32>} : memref<100x128xf32, #tpu.memory_space<vmem>>, vector<1x128xf32>,
    %c40_127 = arith.constant 40 : index
    %c0_128 = arith.constant 0 : index
    %291 = vector.load %arg3[%c40_127, %c0_128] : memref<100x128xf32, #tpu.memory_space<vmem>>, vector<1x128xf32>
    tpu.vector_store %arg3[%c40_127, %c0_128], %289 {strides = array<i32>} : memref<100x128xf32, #tpu.memory_space<vmem>>, vector<1x128xf32>,
    %292 = arith.addf %289, %2 : vector<1x128xf32>
    %293 = arith.cmpf oge, %292, %3 : vector<1x128xf32>
    %294 = arith.extui %293 : vector<1x128xi1> to vector<1x128xi32>
    %295 = arith.sitofp %294 : vector<1x128xi32> to vector<1x128xf32>
    %296 = arith.select %293, %4, %292 : vector<1x128xi1>, vector<1x128xf32>
    %c41 = arith.constant 41 : index
    %c0_129 = arith.constant 0 : index
    %297 = vector.load %arg2[%c41, %c0_129] : memref<100x128xf32, #tpu.memory_space<vmem>>, vector<1x128xf32>
    tpu.vector_store %arg2[%c41, %c0_129], %295 {strides = array<i32>} : memref<100x128xf32, #tpu.memory_space<vmem>>, vector<1x128xf32>,
    %c41_130 = arith.constant 41 : index
    %c0_131 = arith.constant 0 : index
    %298 = vector.load %arg3[%c41_130, %c0_131] : memref<100x128xf32, #tpu.memory_space<vmem>>, vector<1x128xf32>
    tpu.vector_store %arg3[%c41_130, %c0_131], %296 {strides = array<i32>} : memref<100x128xf32, #tpu.memory_space<vmem>>, vector<1x128xf32>,
    %299 = arith.addf %296, %2 : vector<1x128xf32>
    %300 = arith.cmpf oge, %299, %3 : vector<1x128xf32>
    %301 = arith.extui %300 : vector<1x128xi1> to vector<1x128xi32>
    %302 = arith.sitofp %301 : vector<1x128xi32> to vector<1x128xf32>
    %303 = arith.select %300, %4, %299 : vector<1x128xi1>, vector<1x128xf32>
    %c42 = arith.constant 42 : index
    %c0_132 = arith.constant 0 : index
    %304 = vector.load %arg2[%c42, %c0_132] : memref<100x128xf32, #tpu.memory_space<vmem>>, vector<1x128xf32>
    tpu.vector_store %arg2[%c42, %c0_132], %302 {strides = array<i32>} : memref<100x128xf32, #tpu.memory_space<vmem>>, vector<1x128xf32>,
    %c42_133 = arith.constant 42 : index
    %c0_134 = arith.constant 0 : index
    %305 = vector.load %arg3[%c42_133, %c0_134] : memref<100x128xf32, #tpu.memory_space<vmem>>, vector<1x128xf32>
    tpu.vector_store %arg3[%c42_133, %c0_134], %303 {strides = array<i32>} : memref<100x128xf32, #tpu.memory_space<vmem>>, vector<1x128xf32>,
    %306 = arith.addf %303, %2 : vector<1x128xf32>
    %307 = arith.cmpf oge, %306, %3 : vector<1x128xf32>
    %308 = arith.extui %307 : vector<1x128xi1> to vector<1x128xi32>
    %309 = arith.sitofp %308 : vector<1x128xi32> to vector<1x128xf32>
    %310 = arith.select %307, %4, %306 : vector<1x128xi1>, vector<1x128xf32>
    %c43 = arith.constant 43 : index
    %c0_135 = arith.constant 0 : index
    %311 = vector.load %arg2[%c43, %c0_135] : memref<100x128xf32, #tpu.memory_space<vmem>>, vector<1x128xf32>
    tpu.vector_store %arg2[%c43, %c0_135], %309 {strides = array<i32>} : memref<100x128xf32, #tpu.memory_space<vmem>>, vector<1x128xf32>,
    %c43_136 = arith.constant 43 : index
    %c0_137 = arith.constant 0 : index
    %312 = vector.load %arg3[%c43_136, %c0_137] : memref<100x128xf32, #tpu.memory_space<vmem>>, vector<1x128xf32>
    tpu.vector_store %arg3[%c43_136, %c0_137], %310 {strides = array<i32>} : memref<100x128xf32, #tpu.memory_space<vmem>>, vector<1x128xf32>,
    %313 = arith.addf %310, %2 : vector<1x128xf32>
    %314 = arith.cmpf oge, %313, %3 : vector<1x128xf32>
    %315 = arith.extui %314 : vector<1x128xi1> to vector<1x128xi32>
    %316 = arith.sitofp %315 : vector<1x128xi32> to vector<1x128xf32>
    %317 = arith.select %314, %4, %313 : vector<1x128xi1>, vector<1x128xf32>
    %c44 = arith.constant 44 : index
    %c0_138 = arith.constant 0 : index
    %318 = vector.load %arg2[%c44, %c0_138] : memref<100x128xf32, #tpu.memory_space<vmem>>, vector<1x128xf32>
    tpu.vector_store %arg2[%c44, %c0_138], %316 {strides = array<i32>} : memref<100x128xf32, #tpu.memory_space<vmem>>, vector<1x128xf32>,
    %c44_139 = arith.constant 44 : index
    %c0_140 = arith.constant 0 : index
    %319 = vector.load %arg3[%c44_139, %c0_140] : memref<100x128xf32, #tpu.memory_space<vmem>>, vector<1x128xf32>
    tpu.vector_store %arg3[%c44_139, %c0_140], %317 {strides = array<i32>} : memref<100x128xf32, #tpu.memory_space<vmem>>, vector<1x128xf32>,
    %320 = arith.addf %317, %2 : vector<1x128xf32>
    %321 = arith.cmpf oge, %320, %3 : vector<1x128xf32>
    %322 = arith.extui %321 : vector<1x128xi1> to vector<1x128xi32>
    %323 = arith.sitofp %322 : vector<1x128xi32> to vector<1x128xf32>
    %324 = arith.select %321, %4, %320 : vector<1x128xi1>, vector<1x128xf32>
    %c45 = arith.constant 45 : index
    %c0_141 = arith.constant 0 : index
    %325 = vector.load %arg2[%c45, %c0_141] : memref<100x128xf32, #tpu.memory_space<vmem>>, vector<1x128xf32>
    tpu.vector_store %arg2[%c45, %c0_141], %323 {strides = array<i32>} : memref<100x128xf32, #tpu.memory_space<vmem>>, vector<1x128xf32>,
    %c45_142 = arith.constant 45 : index
    %c0_143 = arith.constant 0 : index
    %326 = vector.load %arg3[%c45_142, %c0_143] : memref<100x128xf32, #tpu.memory_space<vmem>>, vector<1x128xf32>
    tpu.vector_store %arg3[%c45_142, %c0_143], %324 {strides = array<i32>} : memref<100x128xf32, #tpu.memory_space<vmem>>, vector<1x128xf32>,
    %327 = arith.addf %324, %2 : vector<1x128xf32>
    %328 = arith.cmpf oge, %327, %3 : vector<1x128xf32>
    %329 = arith.extui %328 : vector<1x128xi1> to vector<1x128xi32>
    %330 = arith.sitofp %329 : vector<1x128xi32> to vector<1x128xf32>
    %331 = arith.select %328, %4, %327 : vector<1x128xi1>, vector<1x128xf32>
    %c46 = arith.constant 46 : index
    %c0_144 = arith.constant 0 : index
    %332 = vector.load %arg2[%c46, %c0_144] : memref<100x128xf32, #tpu.memory_space<vmem>>, vector<1x128xf32>
    tpu.vector_store %arg2[%c46, %c0_144], %330 {strides = array<i32>} : memref<100x128xf32, #tpu.memory_space<vmem>>, vector<1x128xf32>,
    %c46_145 = arith.constant 46 : index
    %c0_146 = arith.constant 0 : index
    %333 = vector.load %arg3[%c46_145, %c0_146] : memref<100x128xf32, #tpu.memory_space<vmem>>, vector<1x128xf32>
    tpu.vector_store %arg3[%c46_145, %c0_146], %331 {strides = array<i32>} : memref<100x128xf32, #tpu.memory_space<vmem>>, vector<1x128xf32>,
    %334 = arith.addf %331, %2 : vector<1x128xf32>
    %335 = arith.cmpf oge, %334, %3 : vector<1x128xf32>
    %336 = arith.extui %335 : vector<1x128xi1> to vector<1x128xi32>
    %337 = arith.sitofp %336 : vector<1x128xi32> to vector<1x128xf32>
    %338 = arith.select %335, %4, %334 : vector<1x128xi1>, vector<1x128xf32>
    %c47 = arith.constant 47 : index
    %c0_147 = arith.constant 0 : index
    %339 = vector.load %arg2[%c47, %c0_147] : memref<100x128xf32, #tpu.memory_space<vmem>>, vector<1x128xf32>
    tpu.vector_store %arg2[%c47, %c0_147], %337 {strides = array<i32>} : memref<100x128xf32, #tpu.memory_space<vmem>>, vector<1x128xf32>,
    %c47_148 = arith.constant 47 : index
    %c0_149 = arith.constant 0 : index
    %340 = vector.load %arg3[%c47_148, %c0_149] : memref<100x128xf32, #tpu.memory_space<vmem>>, vector<1x128xf32>
    tpu.vector_store %arg3[%c47_148, %c0_149], %338 {strides = array<i32>} : memref<100x128xf32, #tpu.memory_space<vmem>>, vector<1x128xf32>,
    %341 = arith.addf %338, %2 : vector<1x128xf32>
    %342 = arith.cmpf oge, %341, %3 : vector<1x128xf32>
    %343 = arith.extui %342 : vector<1x128xi1> to vector<1x128xi32>
    %344 = arith.sitofp %343 : vector<1x128xi32> to vector<1x128xf32>
    %345 = arith.select %342, %4, %341 : vector<1x128xi1>, vector<1x128xf32>
    %c48 = arith.constant 48 : index
    %c0_150 = arith.constant 0 : index
    %346 = vector.load %arg2[%c48, %c0_150] : memref<100x128xf32, #tpu.memory_space<vmem>>, vector<1x128xf32>
    tpu.vector_store %arg2[%c48, %c0_150], %344 {strides = array<i32>} : memref<100x128xf32, #tpu.memory_space<vmem>>, vector<1x128xf32>,
    %c48_151 = arith.constant 48 : index
    %c0_152 = arith.constant 0 : index
    %347 = vector.load %arg3[%c48_151, %c0_152] : memref<100x128xf32, #tpu.memory_space<vmem>>, vector<1x128xf32>
    tpu.vector_store %arg3[%c48_151, %c0_152], %345 {strides = array<i32>} : memref<100x128xf32, #tpu.memory_space<vmem>>, vector<1x128xf32>,
    %348 = arith.addf %345, %2 : vector<1x128xf32>
    %349 = arith.cmpf oge, %348, %3 : vector<1x128xf32>
    %350 = arith.extui %349 : vector<1x128xi1> to vector<1x128xi32>
    %351 = arith.sitofp %350 : vector<1x128xi32> to vector<1x128xf32>
    %352 = arith.select %349, %4, %348 : vector<1x128xi1>, vector<1x128xf32>
    %c49 = arith.constant 49 : index
    %c0_153 = arith.constant 0 : index
    %353 = vector.load %arg2[%c49, %c0_153] : memref<100x128xf32, #tpu.memory_space<vmem>>, vector<1x128xf32>
    tpu.vector_store %arg2[%c49, %c0_153], %351 {strides = array<i32>} : memref<100x128xf32, #tpu.memory_space<vmem>>, vector<1x128xf32>,
    %c49_154 = arith.constant 49 : index
    %c0_155 = arith.constant 0 : index
    %354 = vector.load %arg3[%c49_154, %c0_155] : memref<100x128xf32, #tpu.memory_space<vmem>>, vector<1x128xf32>
    tpu.vector_store %arg3[%c49_154, %c0_155], %352 {strides = array<i32>} : memref<100x128xf32, #tpu.memory_space<vmem>>, vector<1x128xf32>,
    %355 = arith.addf %352, %2 : vector<1x128xf32>
    %356 = arith.cmpf oge, %355, %3 : vector<1x128xf32>
    %357 = arith.extui %356 : vector<1x128xi1> to vector<1x128xi32>
    %358 = arith.sitofp %357 : vector<1x128xi32> to vector<1x128xf32>
    %359 = arith.select %356, %4, %355 : vector<1x128xi1>, vector<1x128xf32>
    %c50 = arith.constant 50 : index
    %c0_156 = arith.constant 0 : index
    %360 = vector.load %arg2[%c50, %c0_156] : memref<100x128xf32, #tpu.memory_space<vmem>>, vector<1x128xf32>
    tpu.vector_store %arg2[%c50, %c0_156], %358 {strides = array<i32>} : memref<100x128xf32, #tpu.memory_space<vmem>>, vector<1x128xf32>,
    %c50_157 = arith.constant 50 : index
    %c0_158 = arith.constant 0 : index
    %361 = vector.load %arg3[%c50_157, %c0_158] : memref<100x128xf32, #tpu.memory_space<vmem>>, vector<1x128xf32>
    tpu.vector_store %arg3[%c50_157, %c0_158], %359 {strides = array<i32>} : memref<100x128xf32, #tpu.memory_space<vmem>>, vector<1x128xf32>,
    %362 = arith.addf %359, %2 : vector<1x128xf32>
    %363 = arith.cmpf oge, %362, %3 : vector<1x128xf32>
    %364 = arith.extui %363 : vector<1x128xi1> to vector<1x128xi32>
    %365 = arith.sitofp %364 : vector<1x128xi32> to vector<1x128xf32>
    %366 = arith.select %363, %4, %362 : vector<1x128xi1>, vector<1x128xf32>
    %c51 = arith.constant 51 : index
    %c0_159 = arith.constant 0 : index
    %367 = vector.load %arg2[%c51, %c0_159] : memref<100x128xf32, #tpu.memory_space<vmem>>, vector<1x128xf32>
    tpu.vector_store %arg2[%c51, %c0_159], %365 {strides = array<i32>} : memref<100x128xf32, #tpu.memory_space<vmem>>, vector<1x128xf32>,
    %c51_160 = arith.constant 51 : index
    %c0_161 = arith.constant 0 : index
    %368 = vector.load %arg3[%c51_160, %c0_161] : memref<100x128xf32, #tpu.memory_space<vmem>>, vector<1x128xf32>
    tpu.vector_store %arg3[%c51_160, %c0_161], %366 {strides = array<i32>} : memref<100x128xf32, #tpu.memory_space<vmem>>, vector<1x128xf32>,
    %369 = arith.addf %366, %2 : vector<1x128xf32>
    %370 = arith.cmpf oge, %369, %3 : vector<1x128xf32>
    %371 = arith.extui %370 : vector<1x128xi1> to vector<1x128xi32>
    %372 = arith.sitofp %371 : vector<1x128xi32> to vector<1x128xf32>
    %373 = arith.select %370, %4, %369 : vector<1x128xi1>, vector<1x128xf32>
    %c52 = arith.constant 52 : index
    %c0_162 = arith.constant 0 : index
    %374 = vector.load %arg2[%c52, %c0_162] : memref<100x128xf32, #tpu.memory_space<vmem>>, vector<1x128xf32>
    tpu.vector_store %arg2[%c52, %c0_162], %372 {strides = array<i32>} : memref<100x128xf32, #tpu.memory_space<vmem>>, vector<1x128xf32>,
    %c52_163 = arith.constant 52 : index
    %c0_164 = arith.constant 0 : index
    %375 = vector.load %arg3[%c52_163, %c0_164] : memref<100x128xf32, #tpu.memory_space<vmem>>, vector<1x128xf32>
    tpu.vector_store %arg3[%c52_163, %c0_164], %373 {strides = array<i32>} : memref<100x128xf32, #tpu.memory_space<vmem>>, vector<1x128xf32>,
    %376 = arith.addf %373, %2 : vector<1x128xf32>
    %377 = arith.cmpf oge, %376, %3 : vector<1x128xf32>
    %378 = arith.extui %377 : vector<1x128xi1> to vector<1x128xi32>
    %379 = arith.sitofp %378 : vector<1x128xi32> to vector<1x128xf32>
    %380 = arith.select %377, %4, %376 : vector<1x128xi1>, vector<1x128xf32>
    %c53 = arith.constant 53 : index
    %c0_165 = arith.constant 0 : index
    %381 = vector.load %arg2[%c53, %c0_165] : memref<100x128xf32, #tpu.memory_space<vmem>>, vector<1x128xf32>
    tpu.vector_store %arg2[%c53, %c0_165], %379 {strides = array<i32>} : memref<100x128xf32, #tpu.memory_space<vmem>>, vector<1x128xf32>,
    %c53_166 = arith.constant 53 : index
    %c0_167 = arith.constant 0 : index
    %382 = vector.load %arg3[%c53_166, %c0_167] : memref<100x128xf32, #tpu.memory_space<vmem>>, vector<1x128xf32>
    tpu.vector_store %arg3[%c53_166, %c0_167], %380 {strides = array<i32>} : memref<100x128xf32, #tpu.memory_space<vmem>>, vector<1x128xf32>,
    %383 = arith.addf %380, %2 : vector<1x128xf32>
    %384 = arith.cmpf oge, %383, %3 : vector<1x128xf32>
    %385 = arith.extui %384 : vector<1x128xi1> to vector<1x128xi32>
    %386 = arith.sitofp %385 : vector<1x128xi32> to vector<1x128xf32>
    %387 = arith.select %384, %4, %383 : vector<1x128xi1>, vector<1x128xf32>
    %c54 = arith.constant 54 : index
    %c0_168 = arith.constant 0 : index
    %388 = vector.load %arg2[%c54, %c0_168] : memref<100x128xf32, #tpu.memory_space<vmem>>, vector<1x128xf32>
    tpu.vector_store %arg2[%c54, %c0_168], %386 {strides = array<i32>} : memref<100x128xf32, #tpu.memory_space<vmem>>, vector<1x128xf32>,
    %c54_169 = arith.constant 54 : index
    %c0_170 = arith.constant 0 : index
    %389 = vector.load %arg3[%c54_169, %c0_170] : memref<100x128xf32, #tpu.memory_space<vmem>>, vector<1x128xf32>
    tpu.vector_store %arg3[%c54_169, %c0_170], %387 {strides = array<i32>} : memref<100x128xf32, #tpu.memory_space<vmem>>, vector<1x128xf32>,
    %390 = arith.addf %387, %2 : vector<1x128xf32>
    %391 = arith.cmpf oge, %390, %3 : vector<1x128xf32>
    %392 = arith.extui %391 : vector<1x128xi1> to vector<1x128xi32>
    %393 = arith.sitofp %392 : vector<1x128xi32> to vector<1x128xf32>
    %394 = arith.select %391, %4, %390 : vector<1x128xi1>, vector<1x128xf32>
    %c55 = arith.constant 55 : index
    %c0_171 = arith.constant 0 : index
    %395 = vector.load %arg2[%c55, %c0_171] : memref<100x128xf32, #tpu.memory_space<vmem>>, vector<1x128xf32>
    tpu.vector_store %arg2[%c55, %c0_171], %393 {strides = array<i32>} : memref<100x128xf32, #tpu.memory_space<vmem>>, vector<1x128xf32>,
    %c55_172 = arith.constant 55 : index
    %c0_173 = arith.constant 0 : index
    %396 = vector.load %arg3[%c55_172, %c0_173] : memref<100x128xf32, #tpu.memory_space<vmem>>, vector<1x128xf32>
    tpu.vector_store %arg3[%c55_172, %c0_173], %394 {strides = array<i32>} : memref<100x128xf32, #tpu.memory_space<vmem>>, vector<1x128xf32>,
    %397 = arith.addf %394, %2 : vector<1x128xf32>
    %398 = arith.cmpf oge, %397, %3 : vector<1x128xf32>
    %399 = arith.extui %398 : vector<1x128xi1> to vector<1x128xi32>
    %400 = arith.sitofp %399 : vector<1x128xi32> to vector<1x128xf32>
    %401 = arith.select %398, %4, %397 : vector<1x128xi1>, vector<1x128xf32>
    %c56 = arith.constant 56 : index
    %c0_174 = arith.constant 0 : index
    %402 = vector.load %arg2[%c56, %c0_174] : memref<100x128xf32, #tpu.memory_space<vmem>>, vector<1x128xf32>
    tpu.vector_store %arg2[%c56, %c0_174], %400 {strides = array<i32>} : memref<100x128xf32, #tpu.memory_space<vmem>>, vector<1x128xf32>,
    %c56_175 = arith.constant 56 : index
    %c0_176 = arith.constant 0 : index
    %403 = vector.load %arg3[%c56_175, %c0_176] : memref<100x128xf32, #tpu.memory_space<vmem>>, vector<1x128xf32>
    tpu.vector_store %arg3[%c56_175, %c0_176], %401 {strides = array<i32>} : memref<100x128xf32, #tpu.memory_space<vmem>>, vector<1x128xf32>,
    %404 = arith.addf %401, %2 : vector<1x128xf32>
    %405 = arith.cmpf oge, %404, %3 : vector<1x128xf32>
    %406 = arith.extui %405 : vector<1x128xi1> to vector<1x128xi32>
    %407 = arith.sitofp %406 : vector<1x128xi32> to vector<1x128xf32>
    %408 = arith.select %405, %4, %404 : vector<1x128xi1>, vector<1x128xf32>
    %c57 = arith.constant 57 : index
    %c0_177 = arith.constant 0 : index
    %409 = vector.load %arg2[%c57, %c0_177] : memref<100x128xf32, #tpu.memory_space<vmem>>, vector<1x128xf32>
    tpu.vector_store %arg2[%c57, %c0_177], %407 {strides = array<i32>} : memref<100x128xf32, #tpu.memory_space<vmem>>, vector<1x128xf32>,
    %c57_178 = arith.constant 57 : index
    %c0_179 = arith.constant 0 : index
    %410 = vector.load %arg3[%c57_178, %c0_179] : memref<100x128xf32, #tpu.memory_space<vmem>>, vector<1x128xf32>
    tpu.vector_store %arg3[%c57_178, %c0_179], %408 {strides = array<i32>} : memref<100x128xf32, #tpu.memory_space<vmem>>, vector<1x128xf32>,
    %411 = arith.addf %408, %2 : vector<1x128xf32>
    %412 = arith.cmpf oge, %411, %3 : vector<1x128xf32>
    %413 = arith.extui %412 : vector<1x128xi1> to vector<1x128xi32>
    %414 = arith.sitofp %413 : vector<1x128xi32> to vector<1x128xf32>
    %415 = arith.select %412, %4, %411 : vector<1x128xi1>, vector<1x128xf32>
    %c58 = arith.constant 58 : index
    %c0_180 = arith.constant 0 : index
    %416 = vector.load %arg2[%c58, %c0_180] : memref<100x128xf32, #tpu.memory_space<vmem>>, vector<1x128xf32>
    tpu.vector_store %arg2[%c58, %c0_180], %414 {strides = array<i32>} : memref<100x128xf32, #tpu.memory_space<vmem>>, vector<1x128xf32>,
    %c58_181 = arith.constant 58 : index
    %c0_182 = arith.constant 0 : index
    %417 = vector.load %arg3[%c58_181, %c0_182] : memref<100x128xf32, #tpu.memory_space<vmem>>, vector<1x128xf32>
    tpu.vector_store %arg3[%c58_181, %c0_182], %415 {strides = array<i32>} : memref<100x128xf32, #tpu.memory_space<vmem>>, vector<1x128xf32>,
    %418 = arith.addf %415, %2 : vector<1x128xf32>
    %419 = arith.cmpf oge, %418, %3 : vector<1x128xf32>
    %420 = arith.extui %419 : vector<1x128xi1> to vector<1x128xi32>
    %421 = arith.sitofp %420 : vector<1x128xi32> to vector<1x128xf32>
    %422 = arith.select %419, %4, %418 : vector<1x128xi1>, vector<1x128xf32>
    %c59 = arith.constant 59 : index
    %c0_183 = arith.constant 0 : index
    %423 = vector.load %arg2[%c59, %c0_183] : memref<100x128xf32, #tpu.memory_space<vmem>>, vector<1x128xf32>
    tpu.vector_store %arg2[%c59, %c0_183], %421 {strides = array<i32>} : memref<100x128xf32, #tpu.memory_space<vmem>>, vector<1x128xf32>,
    %c59_184 = arith.constant 59 : index
    %c0_185 = arith.constant 0 : index
    %424 = vector.load %arg3[%c59_184, %c0_185] : memref<100x128xf32, #tpu.memory_space<vmem>>, vector<1x128xf32>
    tpu.vector_store %arg3[%c59_184, %c0_185], %422 {strides = array<i32>} : memref<100x128xf32, #tpu.memory_space<vmem>>, vector<1x128xf32>,
    %425 = arith.addf %422, %2 : vector<1x128xf32>
    %426 = arith.cmpf oge, %425, %3 : vector<1x128xf32>
    %427 = arith.extui %426 : vector<1x128xi1> to vector<1x128xi32>
    %428 = arith.sitofp %427 : vector<1x128xi32> to vector<1x128xf32>
    %429 = arith.select %426, %4, %425 : vector<1x128xi1>, vector<1x128xf32>
    %c60 = arith.constant 60 : index
    %c0_186 = arith.constant 0 : index
    %430 = vector.load %arg2[%c60, %c0_186] : memref<100x128xf32, #tpu.memory_space<vmem>>, vector<1x128xf32>
    tpu.vector_store %arg2[%c60, %c0_186], %428 {strides = array<i32>} : memref<100x128xf32, #tpu.memory_space<vmem>>, vector<1x128xf32>,
    %c60_187 = arith.constant 60 : index
    %c0_188 = arith.constant 0 : index
    %431 = vector.load %arg3[%c60_187, %c0_188] : memref<100x128xf32, #tpu.memory_space<vmem>>, vector<1x128xf32>
    tpu.vector_store %arg3[%c60_187, %c0_188], %429 {strides = array<i32>} : memref<100x128xf32, #tpu.memory_space<vmem>>, vector<1x128xf32>,
    %432 = arith.addf %429, %2 : vector<1x128xf32>
    %433 = arith.cmpf oge, %432, %3 : vector<1x128xf32>
    %434 = arith.extui %433 : vector<1x128xi1> to vector<1x128xi32>
    %435 = arith.sitofp %434 : vector<1x128xi32> to vector<1x128xf32>
    %436 = arith.select %433, %4, %432 : vector<1x128xi1>, vector<1x128xf32>
    %c61 = arith.constant 61 : index
    %c0_189 = arith.constant 0 : index
    %437 = vector.load %arg2[%c61, %c0_189] : memref<100x128xf32, #tpu.memory_space<vmem>>, vector<1x128xf32>
    tpu.vector_store %arg2[%c61, %c0_189], %435 {strides = array<i32>} : memref<100x128xf32, #tpu.memory_space<vmem>>, vector<1x128xf32>,
    %c61_190 = arith.constant 61 : index
    %c0_191 = arith.constant 0 : index
    %438 = vector.load %arg3[%c61_190, %c0_191] : memref<100x128xf32, #tpu.memory_space<vmem>>, vector<1x128xf32>
    tpu.vector_store %arg3[%c61_190, %c0_191], %436 {strides = array<i32>} : memref<100x128xf32, #tpu.memory_space<vmem>>, vector<1x128xf32>,
    %439 = arith.addf %436, %2 : vector<1x128xf32>
    %440 = arith.cmpf oge, %439, %3 : vector<1x128xf32>
    %441 = arith.extui %440 : vector<1x128xi1> to vector<1x128xi32>
    %442 = arith.sitofp %441 : vector<1x128xi32> to vector<1x128xf32>
    %443 = arith.select %440, %4, %439 : vector<1x128xi1>, vector<1x128xf32>
    %c62 = arith.constant 62 : index
    %c0_192 = arith.constant 0 : index
    %444 = vector.load %arg2[%c62, %c0_192] : memref<100x128xf32, #tpu.memory_space<vmem>>, vector<1x128xf32>
    tpu.vector_store %arg2[%c62, %c0_192], %442 {strides = array<i32>} : memref<100x128xf32, #tpu.memory_space<vmem>>, vector<1x128xf32>,
    %c62_193 = arith.constant 62 : index
    %c0_194 = arith.constant 0 : index
    %445 = vector.load %arg3[%c62_193, %c0_194] : memref<100x128xf32, #tpu.memory_space<vmem>>, vector<1x128xf32>
    tpu.vector_store %arg3[%c62_193, %c0_194], %443 {strides = array<i32>} : memref<100x128xf32, #tpu.memory_space<vmem>>, vector<1x128xf32>,
    %446 = arith.addf %443, %2 : vector<1x128xf32>
    %447 = arith.cmpf oge, %446, %3 : vector<1x128xf32>
    %448 = arith.extui %447 : vector<1x128xi1> to vector<1x128xi32>
    %449 = arith.sitofp %448 : vector<1x128xi32> to vector<1x128xf32>
    %450 = arith.select %447, %4, %446 : vector<1x128xi1>, vector<1x128xf32>
    %c63 = arith.constant 63 : index
    %c0_195 = arith.constant 0 : index
    %451 = vector.load %arg2[%c63, %c0_195] : memref<100x128xf32, #tpu.memory_space<vmem>>, vector<1x128xf32>
    tpu.vector_store %arg2[%c63, %c0_195], %449 {strides = array<i32>} : memref<100x128xf32, #tpu.memory_space<vmem>>, vector<1x128xf32>,
    %c63_196 = arith.constant 63 : index
    %c0_197 = arith.constant 0 : index
    %452 = vector.load %arg3[%c63_196, %c0_197] : memref<100x128xf32, #tpu.memory_space<vmem>>, vector<1x128xf32>
    tpu.vector_store %arg3[%c63_196, %c0_197], %450 {strides = array<i32>} : memref<100x128xf32, #tpu.memory_space<vmem>>, vector<1x128xf32>,
    %453 = arith.addf %450, %2 : vector<1x128xf32>
    %454 = arith.cmpf oge, %453, %3 : vector<1x128xf32>
    %455 = arith.extui %454 : vector<1x128xi1> to vector<1x128xi32>
    %456 = arith.sitofp %455 : vector<1x128xi32> to vector<1x128xf32>
    %457 = arith.select %454, %4, %453 : vector<1x128xi1>, vector<1x128xf32>
    %c64 = arith.constant 64 : index
    %c0_198 = arith.constant 0 : index
    %458 = vector.load %arg2[%c64, %c0_198] : memref<100x128xf32, #tpu.memory_space<vmem>>, vector<1x128xf32>
    tpu.vector_store %arg2[%c64, %c0_198], %456 {strides = array<i32>} : memref<100x128xf32, #tpu.memory_space<vmem>>, vector<1x128xf32>,
    %c64_199 = arith.constant 64 : index
    %c0_200 = arith.constant 0 : index
    %459 = vector.load %arg3[%c64_199, %c0_200] : memref<100x128xf32, #tpu.memory_space<vmem>>, vector<1x128xf32>
    tpu.vector_store %arg3[%c64_199, %c0_200], %457 {strides = array<i32>} : memref<100x128xf32, #tpu.memory_space<vmem>>, vector<1x128xf32>,
    %460 = arith.addf %457, %2 : vector<1x128xf32>
    %461 = arith.cmpf oge, %460, %3 : vector<1x128xf32>
    %462 = arith.extui %461 : vector<1x128xi1> to vector<1x128xi32>
    %463 = arith.sitofp %462 : vector<1x128xi32> to vector<1x128xf32>
    %464 = arith.select %461, %4, %460 : vector<1x128xi1>, vector<1x128xf32>
    %c65 = arith.constant 65 : index
    %c0_201 = arith.constant 0 : index
    %465 = vector.load %arg2[%c65, %c0_201] : memref<100x128xf32, #tpu.memory_space<vmem>>, vector<1x128xf32>
    tpu.vector_store %arg2[%c65, %c0_201], %463 {strides = array<i32>} : memref<100x128xf32, #tpu.memory_space<vmem>>, vector<1x128xf32>,
    %c65_202 = arith.constant 65 : index
    %c0_203 = arith.constant 0 : index
    %466 = vector.load %arg3[%c65_202, %c0_203] : memref<100x128xf32, #tpu.memory_space<vmem>>, vector<1x128xf32>
    tpu.vector_store %arg3[%c65_202, %c0_203], %464 {strides = array<i32>} : memref<100x128xf32, #tpu.memory_space<vmem>>, vector<1x128xf32>,
    %467 = arith.addf %464, %2 : vector<1x128xf32>
    %468 = arith.cmpf oge, %467, %3 : vector<1x128xf32>
    %469 = arith.extui %468 : vector<1x128xi1> to vector<1x128xi32>
    %470 = arith.sitofp %469 : vector<1x128xi32> to vector<1x128xf32>
    %471 = arith.select %468, %4, %467 : vector<1x128xi1>, vector<1x128xf32>
    %c66 = arith.constant 66 : index
    %c0_204 = arith.constant 0 : index
    %472 = vector.load %arg2[%c66, %c0_204] : memref<100x128xf32, #tpu.memory_space<vmem>>, vector<1x128xf32>
    tpu.vector_store %arg2[%c66, %c0_204], %470 {strides = array<i32>} : memref<100x128xf32, #tpu.memory_space<vmem>>, vector<1x128xf32>,
    %c66_205 = arith.constant 66 : index
    %c0_206 = arith.constant 0 : index
    %473 = vector.load %arg3[%c66_205, %c0_206] : memref<100x128xf32, #tpu.memory_space<vmem>>, vector<1x128xf32>
    tpu.vector_store %arg3[%c66_205, %c0_206], %471 {strides = array<i32>} : memref<100x128xf32, #tpu.memory_space<vmem>>, vector<1x128xf32>,
    %474 = arith.addf %471, %2 : vector<1x128xf32>
    %475 = arith.cmpf oge, %474, %3 : vector<1x128xf32>
    %476 = arith.extui %475 : vector<1x128xi1> to vector<1x128xi32>
    %477 = arith.sitofp %476 : vector<1x128xi32> to vector<1x128xf32>
    %478 = arith.select %475, %4, %474 : vector<1x128xi1>, vector<1x128xf32>
    %c67 = arith.constant 67 : index
    %c0_207 = arith.constant 0 : index
    %479 = vector.load %arg2[%c67, %c0_207] : memref<100x128xf32, #tpu.memory_space<vmem>>, vector<1x128xf32>
    tpu.vector_store %arg2[%c67, %c0_207], %477 {strides = array<i32>} : memref<100x128xf32, #tpu.memory_space<vmem>>, vector<1x128xf32>,
    %c67_208 = arith.constant 67 : index
    %c0_209 = arith.constant 0 : index
    %480 = vector.load %arg3[%c67_208, %c0_209] : memref<100x128xf32, #tpu.memory_space<vmem>>, vector<1x128xf32>
    tpu.vector_store %arg3[%c67_208, %c0_209], %478 {strides = array<i32>} : memref<100x128xf32, #tpu.memory_space<vmem>>, vector<1x128xf32>,
    %481 = arith.addf %478, %2 : vector<1x128xf32>
    %482 = arith.cmpf oge, %481, %3 : vector<1x128xf32>
    %483 = arith.extui %482 : vector<1x128xi1> to vector<1x128xi32>
    %484 = arith.sitofp %483 : vector<1x128xi32> to vector<1x128xf32>
    %485 = arith.select %482, %4, %481 : vector<1x128xi1>, vector<1x128xf32>
    %c68 = arith.constant 68 : index
    %c0_210 = arith.constant 0 : index
    %486 = vector.load %arg2[%c68, %c0_210] : memref<100x128xf32, #tpu.memory_space<vmem>>, vector<1x128xf32>
    tpu.vector_store %arg2[%c68, %c0_210], %484 {strides = array<i32>} : memref<100x128xf32, #tpu.memory_space<vmem>>, vector<1x128xf32>,
    %c68_211 = arith.constant 68 : index
    %c0_212 = arith.constant 0 : index
    %487 = vector.load %arg3[%c68_211, %c0_212] : memref<100x128xf32, #tpu.memory_space<vmem>>, vector<1x128xf32>
    tpu.vector_store %arg3[%c68_211, %c0_212], %485 {strides = array<i32>} : memref<100x128xf32, #tpu.memory_space<vmem>>, vector<1x128xf32>,
    %488 = arith.addf %485, %2 : vector<1x128xf32>
    %489 = arith.cmpf oge, %488, %3 : vector<1x128xf32>
    %490 = arith.extui %489 : vector<1x128xi1> to vector<1x128xi32>
    %491 = arith.sitofp %490 : vector<1x128xi32> to vector<1x128xf32>
    %492 = arith.select %489, %4, %488 : vector<1x128xi1>, vector<1x128xf32>
    %c69 = arith.constant 69 : index
    %c0_213 = arith.constant 0 : index
    %493 = vector.load %arg2[%c69, %c0_213] : memref<100x128xf32, #tpu.memory_space<vmem>>, vector<1x128xf32>
    tpu.vector_store %arg2[%c69, %c0_213], %491 {strides = array<i32>} : memref<100x128xf32, #tpu.memory_space<vmem>>, vector<1x128xf32>,
    %c69_214 = arith.constant 69 : index
    %c0_215 = arith.constant 0 : index
    %494 = vector.load %arg3[%c69_214, %c0_215] : memref<100x128xf32, #tpu.memory_space<vmem>>, vector<1x128xf32>
    tpu.vector_store %arg3[%c69_214, %c0_215], %492 {strides = array<i32>} : memref<100x128xf32, #tpu.memory_space<vmem>>, vector<1x128xf32>,
    %495 = arith.addf %492, %2 : vector<1x128xf32>
    %496 = arith.cmpf oge, %495, %3 : vector<1x128xf32>
    %497 = arith.extui %496 : vector<1x128xi1> to vector<1x128xi32>
    %498 = arith.sitofp %497 : vector<1x128xi32> to vector<1x128xf32>
    %499 = arith.select %496, %4, %495 : vector<1x128xi1>, vector<1x128xf32>
    %c70 = arith.constant 70 : index
    %c0_216 = arith.constant 0 : index
    %500 = vector.load %arg2[%c70, %c0_216] : memref<100x128xf32, #tpu.memory_space<vmem>>, vector<1x128xf32>
    tpu.vector_store %arg2[%c70, %c0_216], %498 {strides = array<i32>} : memref<100x128xf32, #tpu.memory_space<vmem>>, vector<1x128xf32>,
    %c70_217 = arith.constant 70 : index
    %c0_218 = arith.constant 0 : index
    %501 = vector.load %arg3[%c70_217, %c0_218] : memref<100x128xf32, #tpu.memory_space<vmem>>, vector<1x128xf32>
    tpu.vector_store %arg3[%c70_217, %c0_218], %499 {strides = array<i32>} : memref<100x128xf32, #tpu.memory_space<vmem>>, vector<1x128xf32>,
    %502 = arith.addf %499, %2 : vector<1x128xf32>
    %503 = arith.cmpf oge, %502, %3 : vector<1x128xf32>
    %504 = arith.extui %503 : vector<1x128xi1> to vector<1x128xi32>
    %505 = arith.sitofp %504 : vector<1x128xi32> to vector<1x128xf32>
    %506 = arith.select %503, %4, %502 : vector<1x128xi1>, vector<1x128xf32>
    %c71 = arith.constant 71 : index
    %c0_219 = arith.constant 0 : index
    %507 = vector.load %arg2[%c71, %c0_219] : memref<100x128xf32, #tpu.memory_space<vmem>>, vector<1x128xf32>
    tpu.vector_store %arg2[%c71, %c0_219], %505 {strides = array<i32>} : memref<100x128xf32, #tpu.memory_space<vmem>>, vector<1x128xf32>,
    %c71_220 = arith.constant 71 : index
    %c0_221 = arith.constant 0 : index
    %508 = vector.load %arg3[%c71_220, %c0_221] : memref<100x128xf32, #tpu.memory_space<vmem>>, vector<1x128xf32>
    tpu.vector_store %arg3[%c71_220, %c0_221], %506 {strides = array<i32>} : memref<100x128xf32, #tpu.memory_space<vmem>>, vector<1x128xf32>,
    %509 = arith.addf %506, %2 : vector<1x128xf32>
    %510 = arith.cmpf oge, %509, %3 : vector<1x128xf32>
    %511 = arith.extui %510 : vector<1x128xi1> to vector<1x128xi32>
    %512 = arith.sitofp %511 : vector<1x128xi32> to vector<1x128xf32>
    %513 = arith.select %510, %4, %509 : vector<1x128xi1>, vector<1x128xf32>
    %c72 = arith.constant 72 : index
    %c0_222 = arith.constant 0 : index
    %514 = vector.load %arg2[%c72, %c0_222] : memref<100x128xf32, #tpu.memory_space<vmem>>, vector<1x128xf32>
    tpu.vector_store %arg2[%c72, %c0_222], %512 {strides = array<i32>} : memref<100x128xf32, #tpu.memory_space<vmem>>, vector<1x128xf32>,
    %c72_223 = arith.constant 72 : index
    %c0_224 = arith.constant 0 : index
    %515 = vector.load %arg3[%c72_223, %c0_224] : memref<100x128xf32, #tpu.memory_space<vmem>>, vector<1x128xf32>
    tpu.vector_store %arg3[%c72_223, %c0_224], %513 {strides = array<i32>} : memref<100x128xf32, #tpu.memory_space<vmem>>, vector<1x128xf32>,
    %516 = arith.addf %513, %2 : vector<1x128xf32>
    %517 = arith.cmpf oge, %516, %3 : vector<1x128xf32>
    %518 = arith.extui %517 : vector<1x128xi1> to vector<1x128xi32>
    %519 = arith.sitofp %518 : vector<1x128xi32> to vector<1x128xf32>
    %520 = arith.select %517, %4, %516 : vector<1x128xi1>, vector<1x128xf32>
    %c73 = arith.constant 73 : index
    %c0_225 = arith.constant 0 : index
    %521 = vector.load %arg2[%c73, %c0_225] : memref<100x128xf32, #tpu.memory_space<vmem>>, vector<1x128xf32>
    tpu.vector_store %arg2[%c73, %c0_225], %519 {strides = array<i32>} : memref<100x128xf32, #tpu.memory_space<vmem>>, vector<1x128xf32>,
    %c73_226 = arith.constant 73 : index
    %c0_227 = arith.constant 0 : index
    %522 = vector.load %arg3[%c73_226, %c0_227] : memref<100x128xf32, #tpu.memory_space<vmem>>, vector<1x128xf32>
    tpu.vector_store %arg3[%c73_226, %c0_227], %520 {strides = array<i32>} : memref<100x128xf32, #tpu.memory_space<vmem>>, vector<1x128xf32>,
    %523 = arith.addf %520, %2 : vector<1x128xf32>
    %524 = arith.cmpf oge, %523, %3 : vector<1x128xf32>
    %525 = arith.extui %524 : vector<1x128xi1> to vector<1x128xi32>
    %526 = arith.sitofp %525 : vector<1x128xi32> to vector<1x128xf32>
    %527 = arith.select %524, %4, %523 : vector<1x128xi1>, vector<1x128xf32>
    %c74 = arith.constant 74 : index
    %c0_228 = arith.constant 0 : index
    %528 = vector.load %arg2[%c74, %c0_228] : memref<100x128xf32, #tpu.memory_space<vmem>>, vector<1x128xf32>
    tpu.vector_store %arg2[%c74, %c0_228], %526 {strides = array<i32>} : memref<100x128xf32, #tpu.memory_space<vmem>>, vector<1x128xf32>,
    %c74_229 = arith.constant 74 : index
    %c0_230 = arith.constant 0 : index
    %529 = vector.load %arg3[%c74_229, %c0_230] : memref<100x128xf32, #tpu.memory_space<vmem>>, vector<1x128xf32>
    tpu.vector_store %arg3[%c74_229, %c0_230], %527 {strides = array<i32>} : memref<100x128xf32, #tpu.memory_space<vmem>>, vector<1x128xf32>,
    %530 = arith.addf %527, %2 : vector<1x128xf32>
    %531 = arith.cmpf oge, %530, %3 : vector<1x128xf32>
    %532 = arith.extui %531 : vector<1x128xi1> to vector<1x128xi32>
    %533 = arith.sitofp %532 : vector<1x128xi32> to vector<1x128xf32>
    %534 = arith.select %531, %4, %530 : vector<1x128xi1>, vector<1x128xf32>
    %c75 = arith.constant 75 : index
    %c0_231 = arith.constant 0 : index
    %535 = vector.load %arg2[%c75, %c0_231] : memref<100x128xf32, #tpu.memory_space<vmem>>, vector<1x128xf32>
    tpu.vector_store %arg2[%c75, %c0_231], %533 {strides = array<i32>} : memref<100x128xf32, #tpu.memory_space<vmem>>, vector<1x128xf32>,
    %c75_232 = arith.constant 75 : index
    %c0_233 = arith.constant 0 : index
    %536 = vector.load %arg3[%c75_232, %c0_233] : memref<100x128xf32, #tpu.memory_space<vmem>>, vector<1x128xf32>
    tpu.vector_store %arg3[%c75_232, %c0_233], %534 {strides = array<i32>} : memref<100x128xf32, #tpu.memory_space<vmem>>, vector<1x128xf32>,
    %537 = arith.addf %534, %2 : vector<1x128xf32>
    %538 = arith.cmpf oge, %537, %3 : vector<1x128xf32>
    %539 = arith.extui %538 : vector<1x128xi1> to vector<1x128xi32>
    %540 = arith.sitofp %539 : vector<1x128xi32> to vector<1x128xf32>
    %541 = arith.select %538, %4, %537 : vector<1x128xi1>, vector<1x128xf32>
    %c76 = arith.constant 76 : index
    %c0_234 = arith.constant 0 : index
    %542 = vector.load %arg2[%c76, %c0_234] : memref<100x128xf32, #tpu.memory_space<vmem>>, vector<1x128xf32>
    tpu.vector_store %arg2[%c76, %c0_234], %540 {strides = array<i32>} : memref<100x128xf32, #tpu.memory_space<vmem>>, vector<1x128xf32>,
    %c76_235 = arith.constant 76 : index
    %c0_236 = arith.constant 0 : index
    %543 = vector.load %arg3[%c76_235, %c0_236] : memref<100x128xf32, #tpu.memory_space<vmem>>, vector<1x128xf32>
    tpu.vector_store %arg3[%c76_235, %c0_236], %541 {strides = array<i32>} : memref<100x128xf32, #tpu.memory_space<vmem>>, vector<1x128xf32>,
    %544 = arith.addf %541, %2 : vector<1x128xf32>
    %545 = arith.cmpf oge, %544, %3 : vector<1x128xf32>
    %546 = arith.extui %545 : vector<1x128xi1> to vector<1x128xi32>
    %547 = arith.sitofp %546 : vector<1x128xi32> to vector<1x128xf32>
    %548 = arith.select %545, %4, %544 : vector<1x128xi1>, vector<1x128xf32>
    %c77 = arith.constant 77 : index
    %c0_237 = arith.constant 0 : index
    %549 = vector.load %arg2[%c77, %c0_237] : memref<100x128xf32, #tpu.memory_space<vmem>>, vector<1x128xf32>
    tpu.vector_store %arg2[%c77, %c0_237], %547 {strides = array<i32>} : memref<100x128xf32, #tpu.memory_space<vmem>>, vector<1x128xf32>,
    %c77_238 = arith.constant 77 : index
    %c0_239 = arith.constant 0 : index
    %550 = vector.load %arg3[%c77_238, %c0_239] : memref<100x128xf32, #tpu.memory_space<vmem>>, vector<1x128xf32>
    tpu.vector_store %arg3[%c77_238, %c0_239], %548 {strides = array<i32>} : memref<100x128xf32, #tpu.memory_space<vmem>>, vector<1x128xf32>,
    %551 = arith.addf %548, %2 : vector<1x128xf32>
    %552 = arith.cmpf oge, %551, %3 : vector<1x128xf32>
    %553 = arith.extui %552 : vector<1x128xi1> to vector<1x128xi32>
    %554 = arith.sitofp %553 : vector<1x128xi32> to vector<1x128xf32>
    %555 = arith.select %552, %4, %551 : vector<1x128xi1>, vector<1x128xf32>
    %c78 = arith.constant 78 : index
    %c0_240 = arith.constant 0 : index
    %556 = vector.load %arg2[%c78, %c0_240] : memref<100x128xf32, #tpu.memory_space<vmem>>, vector<1x128xf32>
    tpu.vector_store %arg2[%c78, %c0_240], %554 {strides = array<i32>} : memref<100x128xf32, #tpu.memory_space<vmem>>, vector<1x128xf32>,
    %c78_241 = arith.constant 78 : index
    %c0_242 = arith.constant 0 : index
    %557 = vector.load %arg3[%c78_241, %c0_242] : memref<100x128xf32, #tpu.memory_space<vmem>>, vector<1x128xf32>
    tpu.vector_store %arg3[%c78_241, %c0_242], %555 {strides = array<i32>} : memref<100x128xf32, #tpu.memory_space<vmem>>, vector<1x128xf32>,
    %558 = arith.addf %555, %2 : vector<1x128xf32>
    %559 = arith.cmpf oge, %558, %3 : vector<1x128xf32>
    %560 = arith.extui %559 : vector<1x128xi1> to vector<1x128xi32>
    %561 = arith.sitofp %560 : vector<1x128xi32> to vector<1x128xf32>
    %562 = arith.select %559, %4, %558 : vector<1x128xi1>, vector<1x128xf32>
    %c79 = arith.constant 79 : index
    %c0_243 = arith.constant 0 : index
    %563 = vector.load %arg2[%c79, %c0_243] : memref<100x128xf32, #tpu.memory_space<vmem>>, vector<1x128xf32>
    tpu.vector_store %arg2[%c79, %c0_243], %561 {strides = array<i32>} : memref<100x128xf32, #tpu.memory_space<vmem>>, vector<1x128xf32>,
    %c79_244 = arith.constant 79 : index
    %c0_245 = arith.constant 0 : index
    %564 = vector.load %arg3[%c79_244, %c0_245] : memref<100x128xf32, #tpu.memory_space<vmem>>, vector<1x128xf32>
    tpu.vector_store %arg3[%c79_244, %c0_245], %562 {strides = array<i32>} : memref<100x128xf32, #tpu.memory_space<vmem>>, vector<1x128xf32>,
    %565 = arith.addf %562, %2 : vector<1x128xf32>
    %566 = arith.cmpf oge, %565, %3 : vector<1x128xf32>
    %567 = arith.extui %566 : vector<1x128xi1> to vector<1x128xi32>
    %568 = arith.sitofp %567 : vector<1x128xi32> to vector<1x128xf32>
    %569 = arith.select %566, %4, %565 : vector<1x128xi1>, vector<1x128xf32>
    %c80 = arith.constant 80 : index
    %c0_246 = arith.constant 0 : index
    %570 = vector.load %arg2[%c80, %c0_246] : memref<100x128xf32, #tpu.memory_space<vmem>>, vector<1x128xf32>
    tpu.vector_store %arg2[%c80, %c0_246], %568 {strides = array<i32>} : memref<100x128xf32, #tpu.memory_space<vmem>>, vector<1x128xf32>,
    %c80_247 = arith.constant 80 : index
    %c0_248 = arith.constant 0 : index
    %571 = vector.load %arg3[%c80_247, %c0_248] : memref<100x128xf32, #tpu.memory_space<vmem>>, vector<1x128xf32>
    tpu.vector_store %arg3[%c80_247, %c0_248], %569 {strides = array<i32>} : memref<100x128xf32, #tpu.memory_space<vmem>>, vector<1x128xf32>,
    %572 = arith.addf %569, %2 : vector<1x128xf32>
    %573 = arith.cmpf oge, %572, %3 : vector<1x128xf32>
    %574 = arith.extui %573 : vector<1x128xi1> to vector<1x128xi32>
    %575 = arith.sitofp %574 : vector<1x128xi32> to vector<1x128xf32>
    %576 = arith.select %573, %4, %572 : vector<1x128xi1>, vector<1x128xf32>
    %c81 = arith.constant 81 : index
    %c0_249 = arith.constant 0 : index
    %577 = vector.load %arg2[%c81, %c0_249] : memref<100x128xf32, #tpu.memory_space<vmem>>, vector<1x128xf32>
    tpu.vector_store %arg2[%c81, %c0_249], %575 {strides = array<i32>} : memref<100x128xf32, #tpu.memory_space<vmem>>, vector<1x128xf32>,
    %c81_250 = arith.constant 81 : index
    %c0_251 = arith.constant 0 : index
    %578 = vector.load %arg3[%c81_250, %c0_251] : memref<100x128xf32, #tpu.memory_space<vmem>>, vector<1x128xf32>
    tpu.vector_store %arg3[%c81_250, %c0_251], %576 {strides = array<i32>} : memref<100x128xf32, #tpu.memory_space<vmem>>, vector<1x128xf32>,
    %579 = arith.addf %576, %2 : vector<1x128xf32>
    %580 = arith.cmpf oge, %579, %3 : vector<1x128xf32>
    %581 = arith.extui %580 : vector<1x128xi1> to vector<1x128xi32>
    %582 = arith.sitofp %581 : vector<1x128xi32> to vector<1x128xf32>
    %583 = arith.select %580, %4, %579 : vector<1x128xi1>, vector<1x128xf32>
    %c82 = arith.constant 82 : index
    %c0_252 = arith.constant 0 : index
    %584 = vector.load %arg2[%c82, %c0_252] : memref<100x128xf32, #tpu.memory_space<vmem>>, vector<1x128xf32>
    tpu.vector_store %arg2[%c82, %c0_252], %582 {strides = array<i32>} : memref<100x128xf32, #tpu.memory_space<vmem>>, vector<1x128xf32>,
    %c82_253 = arith.constant 82 : index
    %c0_254 = arith.constant 0 : index
    %585 = vector.load %arg3[%c82_253, %c0_254] : memref<100x128xf32, #tpu.memory_space<vmem>>, vector<1x128xf32>
    tpu.vector_store %arg3[%c82_253, %c0_254], %583 {strides = array<i32>} : memref<100x128xf32, #tpu.memory_space<vmem>>, vector<1x128xf32>,
    %586 = arith.addf %583, %2 : vector<1x128xf32>
    %587 = arith.cmpf oge, %586, %3 : vector<1x128xf32>
    %588 = arith.extui %587 : vector<1x128xi1> to vector<1x128xi32>
    %589 = arith.sitofp %588 : vector<1x128xi32> to vector<1x128xf32>
    %590 = arith.select %587, %4, %586 : vector<1x128xi1>, vector<1x128xf32>
    %c83 = arith.constant 83 : index
    %c0_255 = arith.constant 0 : index
    %591 = vector.load %arg2[%c83, %c0_255] : memref<100x128xf32, #tpu.memory_space<vmem>>, vector<1x128xf32>
    tpu.vector_store %arg2[%c83, %c0_255], %589 {strides = array<i32>} : memref<100x128xf32, #tpu.memory_space<vmem>>, vector<1x128xf32>,
    %c83_256 = arith.constant 83 : index
    %c0_257 = arith.constant 0 : index
    %592 = vector.load %arg3[%c83_256, %c0_257] : memref<100x128xf32, #tpu.memory_space<vmem>>, vector<1x128xf32>
    tpu.vector_store %arg3[%c83_256, %c0_257], %590 {strides = array<i32>} : memref<100x128xf32, #tpu.memory_space<vmem>>, vector<1x128xf32>,
    %593 = arith.addf %590, %2 : vector<1x128xf32>
    %594 = arith.cmpf oge, %593, %3 : vector<1x128xf32>
    %595 = arith.extui %594 : vector<1x128xi1> to vector<1x128xi32>
    %596 = arith.sitofp %595 : vector<1x128xi32> to vector<1x128xf32>
    %597 = arith.select %594, %4, %593 : vector<1x128xi1>, vector<1x128xf32>
    %c84 = arith.constant 84 : index
    %c0_258 = arith.constant 0 : index
    %598 = vector.load %arg2[%c84, %c0_258] : memref<100x128xf32, #tpu.memory_space<vmem>>, vector<1x128xf32>
    tpu.vector_store %arg2[%c84, %c0_258], %596 {strides = array<i32>} : memref<100x128xf32, #tpu.memory_space<vmem>>, vector<1x128xf32>,
    %c84_259 = arith.constant 84 : index
    %c0_260 = arith.constant 0 : index
    %599 = vector.load %arg3[%c84_259, %c0_260] : memref<100x128xf32, #tpu.memory_space<vmem>>, vector<1x128xf32>
    tpu.vector_store %arg3[%c84_259, %c0_260], %597 {strides = array<i32>} : memref<100x128xf32, #tpu.memory_space<vmem>>, vector<1x128xf32>,
    %600 = arith.addf %597, %2 : vector<1x128xf32>
    %601 = arith.cmpf oge, %600, %3 : vector<1x128xf32>
    %602 = arith.extui %601 : vector<1x128xi1> to vector<1x128xi32>
    %603 = arith.sitofp %602 : vector<1x128xi32> to vector<1x128xf32>
    %604 = arith.select %601, %4, %600 : vector<1x128xi1>, vector<1x128xf32>
    %c85 = arith.constant 85 : index
    %c0_261 = arith.constant 0 : index
    %605 = vector.load %arg2[%c85, %c0_261] : memref<100x128xf32, #tpu.memory_space<vmem>>, vector<1x128xf32>
    tpu.vector_store %arg2[%c85, %c0_261], %603 {strides = array<i32>} : memref<100x128xf32, #tpu.memory_space<vmem>>, vector<1x128xf32>,
    %c85_262 = arith.constant 85 : index
    %c0_263 = arith.constant 0 : index
    %606 = vector.load %arg3[%c85_262, %c0_263] : memref<100x128xf32, #tpu.memory_space<vmem>>, vector<1x128xf32>
    tpu.vector_store %arg3[%c85_262, %c0_263], %604 {strides = array<i32>} : memref<100x128xf32, #tpu.memory_space<vmem>>, vector<1x128xf32>,
    %607 = arith.addf %604, %2 : vector<1x128xf32>
    %608 = arith.cmpf oge, %607, %3 : vector<1x128xf32>
    %609 = arith.extui %608 : vector<1x128xi1> to vector<1x128xi32>
    %610 = arith.sitofp %609 : vector<1x128xi32> to vector<1x128xf32>
    %611 = arith.select %608, %4, %607 : vector<1x128xi1>, vector<1x128xf32>
    %c86 = arith.constant 86 : index
    %c0_264 = arith.constant 0 : index
    %612 = vector.load %arg2[%c86, %c0_264] : memref<100x128xf32, #tpu.memory_space<vmem>>, vector<1x128xf32>
    tpu.vector_store %arg2[%c86, %c0_264], %610 {strides = array<i32>} : memref<100x128xf32, #tpu.memory_space<vmem>>, vector<1x128xf32>,
    %c86_265 = arith.constant 86 : index
    %c0_266 = arith.constant 0 : index
    %613 = vector.load %arg3[%c86_265, %c0_266] : memref<100x128xf32, #tpu.memory_space<vmem>>, vector<1x128xf32>
    tpu.vector_store %arg3[%c86_265, %c0_266], %611 {strides = array<i32>} : memref<100x128xf32, #tpu.memory_space<vmem>>, vector<1x128xf32>,
    %614 = arith.addf %611, %2 : vector<1x128xf32>
    %615 = arith.cmpf oge, %614, %3 : vector<1x128xf32>
    %616 = arith.extui %615 : vector<1x128xi1> to vector<1x128xi32>
    %617 = arith.sitofp %616 : vector<1x128xi32> to vector<1x128xf32>
    %618 = arith.select %615, %4, %614 : vector<1x128xi1>, vector<1x128xf32>
    %c87 = arith.constant 87 : index
    %c0_267 = arith.constant 0 : index
    %619 = vector.load %arg2[%c87, %c0_267] : memref<100x128xf32, #tpu.memory_space<vmem>>, vector<1x128xf32>
    tpu.vector_store %arg2[%c87, %c0_267], %617 {strides = array<i32>} : memref<100x128xf32, #tpu.memory_space<vmem>>, vector<1x128xf32>,
    %c87_268 = arith.constant 87 : index
    %c0_269 = arith.constant 0 : index
    %620 = vector.load %arg3[%c87_268, %c0_269] : memref<100x128xf32, #tpu.memory_space<vmem>>, vector<1x128xf32>
    tpu.vector_store %arg3[%c87_268, %c0_269], %618 {strides = array<i32>} : memref<100x128xf32, #tpu.memory_space<vmem>>, vector<1x128xf32>,
    %621 = arith.addf %618, %2 : vector<1x128xf32>
    %622 = arith.cmpf oge, %621, %3 : vector<1x128xf32>
    %623 = arith.extui %622 : vector<1x128xi1> to vector<1x128xi32>
    %624 = arith.sitofp %623 : vector<1x128xi32> to vector<1x128xf32>
    %625 = arith.select %622, %4, %621 : vector<1x128xi1>, vector<1x128xf32>
    %c88 = arith.constant 88 : index
    %c0_270 = arith.constant 0 : index
    %626 = vector.load %arg2[%c88, %c0_270] : memref<100x128xf32, #tpu.memory_space<vmem>>, vector<1x128xf32>
    tpu.vector_store %arg2[%c88, %c0_270], %624 {strides = array<i32>} : memref<100x128xf32, #tpu.memory_space<vmem>>, vector<1x128xf32>,
    %c88_271 = arith.constant 88 : index
    %c0_272 = arith.constant 0 : index
    %627 = vector.load %arg3[%c88_271, %c0_272] : memref<100x128xf32, #tpu.memory_space<vmem>>, vector<1x128xf32>
    tpu.vector_store %arg3[%c88_271, %c0_272], %625 {strides = array<i32>} : memref<100x128xf32, #tpu.memory_space<vmem>>, vector<1x128xf32>,
    %628 = arith.addf %625, %2 : vector<1x128xf32>
    %629 = arith.cmpf oge, %628, %3 : vector<1x128xf32>
    %630 = arith.extui %629 : vector<1x128xi1> to vector<1x128xi32>
    %631 = arith.sitofp %630 : vector<1x128xi32> to vector<1x128xf32>
    %632 = arith.select %629, %4, %628 : vector<1x128xi1>, vector<1x128xf32>
    %c89 = arith.constant 89 : index
    %c0_273 = arith.constant 0 : index
    %633 = vector.load %arg2[%c89, %c0_273] : memref<100x128xf32, #tpu.memory_space<vmem>>, vector<1x128xf32>
    tpu.vector_store %arg2[%c89, %c0_273], %631 {strides = array<i32>} : memref<100x128xf32, #tpu.memory_space<vmem>>, vector<1x128xf32>,
    %c89_274 = arith.constant 89 : index
    %c0_275 = arith.constant 0 : index
    %634 = vector.load %arg3[%c89_274, %c0_275] : memref<100x128xf32, #tpu.memory_space<vmem>>, vector<1x128xf32>
    tpu.vector_store %arg3[%c89_274, %c0_275], %632 {strides = array<i32>} : memref<100x128xf32, #tpu.memory_space<vmem>>, vector<1x128xf32>,
    %635 = arith.addf %632, %2 : vector<1x128xf32>
    %636 = arith.cmpf oge, %635, %3 : vector<1x128xf32>
    %637 = arith.extui %636 : vector<1x128xi1> to vector<1x128xi32>
    %638 = arith.sitofp %637 : vector<1x128xi32> to vector<1x128xf32>
    %639 = arith.select %636, %4, %635 : vector<1x128xi1>, vector<1x128xf32>
    %c90 = arith.constant 90 : index
    %c0_276 = arith.constant 0 : index
    %640 = vector.load %arg2[%c90, %c0_276] : memref<100x128xf32, #tpu.memory_space<vmem>>, vector<1x128xf32>
    tpu.vector_store %arg2[%c90, %c0_276], %638 {strides = array<i32>} : memref<100x128xf32, #tpu.memory_space<vmem>>, vector<1x128xf32>,
    %c90_277 = arith.constant 90 : index
    %c0_278 = arith.constant 0 : index
    %641 = vector.load %arg3[%c90_277, %c0_278] : memref<100x128xf32, #tpu.memory_space<vmem>>, vector<1x128xf32>
    tpu.vector_store %arg3[%c90_277, %c0_278], %639 {strides = array<i32>} : memref<100x128xf32, #tpu.memory_space<vmem>>, vector<1x128xf32>,
    %642 = arith.addf %639, %2 : vector<1x128xf32>
    %643 = arith.cmpf oge, %642, %3 : vector<1x128xf32>
    %644 = arith.extui %643 : vector<1x128xi1> to vector<1x128xi32>
    %645 = arith.sitofp %644 : vector<1x128xi32> to vector<1x128xf32>
    %646 = arith.select %643, %4, %642 : vector<1x128xi1>, vector<1x128xf32>
    %c91 = arith.constant 91 : index
    %c0_279 = arith.constant 0 : index
    %647 = vector.load %arg2[%c91, %c0_279] : memref<100x128xf32, #tpu.memory_space<vmem>>, vector<1x128xf32>
    tpu.vector_store %arg2[%c91, %c0_279], %645 {strides = array<i32>} : memref<100x128xf32, #tpu.memory_space<vmem>>, vector<1x128xf32>,
    %c91_280 = arith.constant 91 : index
    %c0_281 = arith.constant 0 : index
    %648 = vector.load %arg3[%c91_280, %c0_281] : memref<100x128xf32, #tpu.memory_space<vmem>>, vector<1x128xf32>
    tpu.vector_store %arg3[%c91_280, %c0_281], %646 {strides = array<i32>} : memref<100x128xf32, #tpu.memory_space<vmem>>, vector<1x128xf32>,
    %649 = arith.addf %646, %2 : vector<1x128xf32>
    %650 = arith.cmpf oge, %649, %3 : vector<1x128xf32>
    %651 = arith.extui %650 : vector<1x128xi1> to vector<1x128xi32>
    %652 = arith.sitofp %651 : vector<1x128xi32> to vector<1x128xf32>
    %653 = arith.select %650, %4, %649 : vector<1x128xi1>, vector<1x128xf32>
    %c92 = arith.constant 92 : index
    %c0_282 = arith.constant 0 : index
    %654 = vector.load %arg2[%c92, %c0_282] : memref<100x128xf32, #tpu.memory_space<vmem>>, vector<1x128xf32>
    tpu.vector_store %arg2[%c92, %c0_282], %652 {strides = array<i32>} : memref<100x128xf32, #tpu.memory_space<vmem>>, vector<1x128xf32>,
    %c92_283 = arith.constant 92 : index
    %c0_284 = arith.constant 0 : index
    %655 = vector.load %arg3[%c92_283, %c0_284] : memref<100x128xf32, #tpu.memory_space<vmem>>, vector<1x128xf32>
    tpu.vector_store %arg3[%c92_283, %c0_284], %653 {strides = array<i32>} : memref<100x128xf32, #tpu.memory_space<vmem>>, vector<1x128xf32>,
    %656 = arith.addf %653, %2 : vector<1x128xf32>
    %657 = arith.cmpf oge, %656, %3 : vector<1x128xf32>
    %658 = arith.extui %657 : vector<1x128xi1> to vector<1x128xi32>
    %659 = arith.sitofp %658 : vector<1x128xi32> to vector<1x128xf32>
    %660 = arith.select %657, %4, %656 : vector<1x128xi1>, vector<1x128xf32>
    %c93 = arith.constant 93 : index
    %c0_285 = arith.constant 0 : index
    %661 = vector.load %arg2[%c93, %c0_285] : memref<100x128xf32, #tpu.memory_space<vmem>>, vector<1x128xf32>
    tpu.vector_store %arg2[%c93, %c0_285], %659 {strides = array<i32>} : memref<100x128xf32, #tpu.memory_space<vmem>>, vector<1x128xf32>,
    %c93_286 = arith.constant 93 : index
    %c0_287 = arith.constant 0 : index
    %662 = vector.load %arg3[%c93_286, %c0_287] : memref<100x128xf32, #tpu.memory_space<vmem>>, vector<1x128xf32>
    tpu.vector_store %arg3[%c93_286, %c0_287], %660 {strides = array<i32>} : memref<100x128xf32, #tpu.memory_space<vmem>>, vector<1x128xf32>,
    %663 = arith.addf %660, %2 : vector<1x128xf32>
    %664 = arith.cmpf oge, %663, %3 : vector<1x128xf32>
    %665 = arith.extui %664 : vector<1x128xi1> to vector<1x128xi32>
    %666 = arith.sitofp %665 : vector<1x128xi32> to vector<1x128xf32>
    %667 = arith.select %664, %4, %663 : vector<1x128xi1>, vector<1x128xf32>
    %c94 = arith.constant 94 : index
    %c0_288 = arith.constant 0 : index
    %668 = vector.load %arg2[%c94, %c0_288] : memref<100x128xf32, #tpu.memory_space<vmem>>, vector<1x128xf32>
    tpu.vector_store %arg2[%c94, %c0_288], %666 {strides = array<i32>} : memref<100x128xf32, #tpu.memory_space<vmem>>, vector<1x128xf32>,
    %c94_289 = arith.constant 94 : index
    %c0_290 = arith.constant 0 : index
    %669 = vector.load %arg3[%c94_289, %c0_290] : memref<100x128xf32, #tpu.memory_space<vmem>>, vector<1x128xf32>
    tpu.vector_store %arg3[%c94_289, %c0_290], %667 {strides = array<i32>} : memref<100x128xf32, #tpu.memory_space<vmem>>, vector<1x128xf32>,
    %670 = arith.addf %667, %2 : vector<1x128xf32>
    %671 = arith.cmpf oge, %670, %3 : vector<1x128xf32>
    %672 = arith.extui %671 : vector<1x128xi1> to vector<1x128xi32>
    %673 = arith.sitofp %672 : vector<1x128xi32> to vector<1x128xf32>
    %674 = arith.select %671, %4, %670 : vector<1x128xi1>, vector<1x128xf32>
    %c95 = arith.constant 95 : index
    %c0_291 = arith.constant 0 : index
    %675 = vector.load %arg2[%c95, %c0_291] : memref<100x128xf32, #tpu.memory_space<vmem>>, vector<1x128xf32>
    tpu.vector_store %arg2[%c95, %c0_291], %673 {strides = array<i32>} : memref<100x128xf32, #tpu.memory_space<vmem>>, vector<1x128xf32>,
    %c95_292 = arith.constant 95 : index
    %c0_293 = arith.constant 0 : index
    %676 = vector.load %arg3[%c95_292, %c0_293] : memref<100x128xf32, #tpu.memory_space<vmem>>, vector<1x128xf32>
    tpu.vector_store %arg3[%c95_292, %c0_293], %674 {strides = array<i32>} : memref<100x128xf32, #tpu.memory_space<vmem>>, vector<1x128xf32>,
    %677 = arith.addf %674, %2 : vector<1x128xf32>
    %678 = arith.cmpf oge, %677, %3 : vector<1x128xf32>
    %679 = arith.extui %678 : vector<1x128xi1> to vector<1x128xi32>
    %680 = arith.sitofp %679 : vector<1x128xi32> to vector<1x128xf32>
    %681 = arith.select %678, %4, %677 : vector<1x128xi1>, vector<1x128xf32>
    %c96 = arith.constant 96 : index
    %c0_294 = arith.constant 0 : index
    %682 = vector.load %arg2[%c96, %c0_294] : memref<100x128xf32, #tpu.memory_space<vmem>>, vector<1x128xf32>
    tpu.vector_store %arg2[%c96, %c0_294], %680 {strides = array<i32>} : memref<100x128xf32, #tpu.memory_space<vmem>>, vector<1x128xf32>,
    %c96_295 = arith.constant 96 : index
    %c0_296 = arith.constant 0 : index
    %683 = vector.load %arg3[%c96_295, %c0_296] : memref<100x128xf32, #tpu.memory_space<vmem>>, vector<1x128xf32>
    tpu.vector_store %arg3[%c96_295, %c0_296], %681 {strides = array<i32>} : memref<100x128xf32, #tpu.memory_space<vmem>>, vector<1x128xf32>,
    %684 = arith.addf %681, %2 : vector<1x128xf32>
    %685 = arith.cmpf oge, %684, %3 : vector<1x128xf32>
    %686 = arith.extui %685 : vector<1x128xi1> to vector<1x128xi32>
    %687 = arith.sitofp %686 : vector<1x128xi32> to vector<1x128xf32>
    %688 = arith.select %685, %4, %684 : vector<1x128xi1>, vector<1x128xf32>
    %c97 = arith.constant 97 : index
    %c0_297 = arith.constant 0 : index
    %689 = vector.load %arg2[%c97, %c0_297] : memref<100x128xf32, #tpu.memory_space<vmem>>, vector<1x128xf32>
    tpu.vector_store %arg2[%c97, %c0_297], %687 {strides = array<i32>} : memref<100x128xf32, #tpu.memory_space<vmem>>, vector<1x128xf32>,
    %c97_298 = arith.constant 97 : index
    %c0_299 = arith.constant 0 : index
    %690 = vector.load %arg3[%c97_298, %c0_299] : memref<100x128xf32, #tpu.memory_space<vmem>>, vector<1x128xf32>
    tpu.vector_store %arg3[%c97_298, %c0_299], %688 {strides = array<i32>} : memref<100x128xf32, #tpu.memory_space<vmem>>, vector<1x128xf32>,
    %691 = arith.addf %688, %2 : vector<1x128xf32>
    %692 = arith.cmpf oge, %691, %3 : vector<1x128xf32>
    %693 = arith.extui %692 : vector<1x128xi1> to vector<1x128xi32>
    %694 = arith.sitofp %693 : vector<1x128xi32> to vector<1x128xf32>
    %695 = arith.select %692, %4, %691 : vector<1x128xi1>, vector<1x128xf32>
    %c98 = arith.constant 98 : index
    %c0_300 = arith.constant 0 : index
    %696 = vector.load %arg2[%c98, %c0_300] : memref<100x128xf32, #tpu.memory_space<vmem>>, vector<1x128xf32>
    tpu.vector_store %arg2[%c98, %c0_300], %694 {strides = array<i32>} : memref<100x128xf32, #tpu.memory_space<vmem>>, vector<1x128xf32>,
    %c98_301 = arith.constant 98 : index
    %c0_302 = arith.constant 0 : index
    %697 = vector.load %arg3[%c98_301, %c0_302] : memref<100x128xf32, #tpu.memory_space<vmem>>, vector<1x128xf32>
    tpu.vector_store %arg3[%c98_301, %c0_302], %695 {strides = array<i32>} : memref<100x128xf32, #tpu.memory_space<vmem>>, vector<1x128xf32>,
    %698 = arith.addf %695, %2 : vector<1x128xf32>
    %699 = arith.cmpf oge, %698, %3 : vector<1x128xf32>
    %700 = arith.extui %699 : vector<1x128xi1> to vector<1x128xi32>
    %701 = arith.sitofp %700 : vector<1x128xi32> to vector<1x128xf32>
    %702 = arith.select %699, %4, %698 : vector<1x128xi1>, vector<1x128xf32>
    %c99 = arith.constant 99 : index
    %c0_303 = arith.constant 0 : index
    %703 = vector.load %arg2[%c99, %c0_303] : memref<100x128xf32, #tpu.memory_space<vmem>>, vector<1x128xf32>
    tpu.vector_store %arg2[%c99, %c0_303], %701 {strides = array<i32>} : memref<100x128xf32, #tpu.memory_space<vmem>>, vector<1x128xf32>,
    %c99_304 = arith.constant 99 : index
    %c0_305 = arith.constant 0 : index
    %704 = vector.load %arg3[%c99_304, %c0_305] : memref<100x128xf32, #tpu.memory_space<vmem>>, vector<1x128xf32>
    tpu.vector_store %arg3[%c99_304, %c0_305], %702 {strides = array<i32>} : memref<100x128xf32, #tpu.memory_space<vmem>>, vector<1x128xf32>,
    %c0_306 = arith.constant 0 : index
    %c0_307 = arith.constant 0 : index
    %705 = vector.load %arg1[%c0_306, %c0_307] : memref<128x128xf32, #tpu.memory_space<vmem>>, vector<128x128xf32>
    %706 = math.absf %705 : vector<128x128xf32>
    %707 = vector.shape_cast %706 : vector<128x128xf32> to vector<1x128x128xf32>
    %cst_308 = arith.constant dense<0.000000e+00> : vector<1xf32>
    %708 = vector.multi_reduction <add>, %707, %cst_308 [1, 2] : vector<1x128x128xf32> to vector<1xf32>
    %709 = vector.shape_cast %708 : vector<1xf32> to vector<1x1x1xf32>
    %710 = vector.extract %709[0, 0, 0] : f32 from vector<1x1x1xf32>
    %cst_309 = arith.constant 1.638400e+04 : f32
    %711 = arith.divf %710, %cst_309 : f32
    %712 = vector.broadcast %711 : f32 to vector<1x128xf32>
    %c0_310 = arith.constant 0 : index
    %c0_311 = arith.constant 0 : index
    %713 = vector.load %arg4[%c0_310, %c0_311] : memref<1x128xf32, #tpu.memory_space<vmem>>, vector<1x128xf32>
    tpu.vector_store %arg4[%c0_310, %c0_311], %712 {strides = array<i32>} : memref<1x128xf32, #tpu.memory_space<vmem>>, vector<1x128xf32>,
    return
  }
}

</mosaic_0001>

<bundles_post_ra>
// kernel: tpu_custom_call.1
= control target key start
LH: loop header
LB: loop body
LE: loop exit
PB: predicated region body
PF: predicated region fallthrough
CT: control target
= control target key end

     0   :  { %10 = vsyncpa [#allocation3], 0  ;;  %s1546_s0 = inlined_call_operand.hbm [shape: f32[1,128], index: 0, kind: input, shape index: {}]   ;;  %s1547_s1 = inlined_call_operand.hbm [shape: f32[128,128], index: 1, kind: input, shape index: {}]   ;;  %s1548_s2 = inlined_call_operand.hbm [shape: f32[100,128], index: 2, kind: output, shape index: {0}]   ;;  %s1549_s3 = inlined_call_operand.hbm [shape: f32[100,128], index: 3, kind: output, shape index: {1}]   ;;  %s1550_s4 = inlined_call_operand.hbm [shape: f32[1,128], index: 4, kind: output, shape index: {2}]  }
   0x1   :  { %11 = vsyncpa [#allocation6], 0 }
   0x2   :  { %12 = vsyncpa [#allocation4], 0 }
   0x3   :  { %13 = vsyncpa [#allocation9], 0  ;;  %s1208_s15 = smov [#allocation2]   ;;  %s1209_s17 = smov [#allocation5]  }
   0x4   :  { %s20_s16 = sshll.u32 %s1208_s15, 4  ;;  %s29_s18 = sshll.u32 %s1209_s17, 4  ;;  %s21_s16 = int_to_ptr.vmem [resolvable:$true] %s20_s16  ;;  %s30_s18 = int_to_ptr.vmem [resolvable:$true] %s29_s18 }
   0x5   :  { %s1108_s19 = scalar_lea.vmem %s21_s16, 16  ;;  %s1112_s20 = scalar_lea.vmem %s21_s16, 32 }
   0x6   :  { %p1109_p0 = scmp.ne.s32.totalorder %s21_s16, %s1108_s19  ;;  %p1113_p1 = scmp.lt.s32.totalorder %s21_s16, %s21_s16 }
   0x7   :  { %p1114_p2 = scmp.lt.s32.totalorder %s1112_s20, %s1108_s19 }
   0x9   :  { %p1115_p3 = por %p1114_p2, %p1113_p1 }
   0xb   :  { %p1116_p4 = pnand %p1115_p3, %p1109_p0 }
   0xd   :  { %1119 = shalt.err (!%p1116_p4)
}
   0xe   :  { %23 = dma.hbm_to_vmem [thread:$0]  %s1546_s0, 16, %s21_s16, [#allocation3]  }
   0xf   :  { %s1128_s23 = scalar_lea.vmem %s30_s18, 2048  ;;  %p1133_p6 = scmp.lt.s32.totalorder %s30_s18, %s30_s18 }
  0x10   :  { %p1129_p5 = scmp.ne.s32.totalorder %s30_s18, %s1128_s23  ;;  %p1134_p7 = scmp.lt.s32.totalorder %s1128_s23, %s1128_s23 }
  0x12   :  { %p1135_p8 = por %p1134_p7, %p1133_p6 }
  0x14   :  { %p1136_p9 = pnand %p1135_p8, %p1129_p5 }
  0x16   :  { %1139 = shalt.err (!%p1136_p9)
}
  0x17   :  { %s1210_s24 = smov 128   ;;  %s1211_s25 = smov 8  }
  0x18   :  { %35 = dma.hbm_to_vmem [thread:$0]  %s1547_s1, 2048, %s30_s18, [#allocation6], %s1210_s24, %s1210_s24, %s1211_s25  }
  0x19   :  { %1200 = dma.done.wait [#allocation3], 16  }
  0x1a   :  { %1201 = vsyncadd [#allocation3], 4294967280 }
  0x1b   :  { %1202 = dma.done.wait [#allocation6], 2048  }
  0x1c   :  { %1203 = vsyncadd [#allocation6], 4294965248  ;;  %v1212_v0 = vmov 0.0   ;;  %vm1213_vm0 = vmmov 0   ;;  %v1253_v1 = vld [vmem:[#allocation5 + $0x78] sm:$0xff]  ;;  %v1255_v2 = vld [vmem:[#allocation5 + $0x70] sm:$0xff] }
  0x1d   :  { %1054 = vmatprep.subr.mxu0 %v1212_v0  ;;  %1086 = vmatprep.mubr.msk.f32.mxu0 %vm1213_vm0, %v1212_v0  ;;  %v1259_v3 = vld [vmem:[#allocation5 + $0x68] sm:$0xff]  ;;  %v1263_v4 = vld [vmem:[#allocation5 + $0x60] sm:$0xff]  ;;  %v1267_v5 = vld [vmem:[#allocation5 + $0x58] sm:$0xff]  ;;  %s1214_s28 = smov [#allocation8]   ;;  %s1215_s30 = smov [#allocation7]  }
  0x1e   :  { %1055 = vmatpush3.msra.mxu0 %v1253_v1  ;;  %v1271_v6 = vld [vmem:[#allocation5 + $0x50] sm:$0xff]  ;;  %v1275_v7 = vld [vmem:[#allocation5 + $0x48] sm:$0xff]  ;;  %v1279_v8 = vld [vmem:[#allocation5 + $0x40] sm:$0xff]  ;;  %s907_s29 = sshll.u32 %s1214_s28, 4  ;;  %s895_s5 = sshll.u32 %s1215_s30, 4  ;;  %s908_s29 = int_to_ptr.vmem [resolvable:$true] %s907_s29  ;;  %s896_s5 = int_to_ptr.vmem [resolvable:$true] %s895_s5 }
  0x1f   :  { %1056 = vmatprep.subr.mxu0 %v1212_v0  ;;  %v1283_v9 = vld [vmem:[#allocation5 + $0x38] sm:$0xff]  ;;  %v1287_v10 = vld [vmem:[#allocation5 + $0x30] sm:$0xff]  ;;  %v1291_v11 = vld [vmem:[#allocation5 + $0x28] sm:$0xff]  ;;  %s1216_s6 = smov [#allocation10]   ;;  %s1140_s8 = scalar_lea.vmem %s908_s29, 1664 }
  0x20   :  { %1057 = vmatpush3.msra.mxu0 %v1255_v2  ;;  %v1295_v12 = vld [vmem:[#allocation5 + $0x20] sm:$0xff]  ;;  %v1299_v13 = vld [vmem:[#allocation5 + $0x18] sm:$0xff]  ;;  %v1303_v14 = vld [vmem:[#allocation5 + $0x10] sm:$0xff]  ;;  %v850_v58 = vand.u32 2147483647, %v1291_v11  ;;  %s920_s7 = sshll.u32 %s1216_s6, 4  ;;  %p1141_p10 = scmp.ne.s32.totalorder %s908_s29, %s1140_s8  ;;  %s921_s7 = int_to_ptr.vmem [resolvable:$true] %s920_s7 }
  0x21   :  { %1058 = vmatprep.subr.mxu0 %v1212_v0  ;;  %v1307_v15 = vld [vmem:[#allocation5 + $0x8] sm:$0xff]  ;;  %v43_v16 = vld [vmem:[#allocation5] sm:$0xff]  ;;  %v42_v17 = vld [vmem:[#allocation2] sm:$0x1]  ;;  %v847_v46 = vand.u32 2147483647, %v1303_v14  ;;  %p1145_p11 = scmp.lt.s32.totalorder %s908_s29, %s908_s29  ;;  %p1146_p12 = scmp.lt.s32.totalorder %s1140_s8, %s1140_s8 }
  0x22   :  { %1059 = vmatpush3.msra.mxu0 %v1259_v3  ;;  %v845_v44 = vand.u32 2147483647, %v43_v16  ;;  %v846_v45 = vand.u32 2147483647, %v1307_v15  ;;  %v848_v51 = vand.u32 2147483647, %v1299_v13 }
  0x23   :  { %1060 = vmatprep.subr.mxu0 %v1212_v0  ;;  %v849_v53 = vand.u32 2147483647, %v1295_v12  ;;  %v851_v60 = vand.u32 2147483647, %v1287_v10  ;;  %p1147_p13 = por %p1146_p12, %p1145_p11 }
  0x24   :  { %1061 = vmatpush3.msra.mxu0 %v1263_v4  ;;  %v861_v47 = vadd.f32 %v846_v45, %v845_v44 }
  0x25   :  { %1062 = vmatprep.subr.mxu0 %v1212_v0  ;;  %p1148_p0 = pnand %p1147_p13, %p1141_p10 }
  0x26   :  { %1063 = vmatpush3.msra.mxu0 %v1267_v5  ;;  %v862_v52 = vadd.f32 %v861_v47, %v847_v46 }
  0x27   :  { %1064 = vmatprep.subr.mxu0 %v1212_v0 }
  0x28   :  { %1065 = vmatpush3.msra.mxu0 %v1271_v6  ;;  %v863_v54 = vadd.f32 %v862_v52, %v848_v51 }
  0x29   :  { %1066 = vmatprep.subr.mxu0 %v1212_v0 }
  0x2a   :  { %1067 = vmatpush3.msra.mxu0 %v1275_v7  ;;  %v864_v59 = vadd.f32 %v863_v54, %v849_v53 }
  0x2b   :  { %1068 = vmatprep.subr.mxu0 %v1212_v0 }
  0x2c   :  { %1069 = vmatpush3.msra.mxu0 %v1279_v8  ;;  %v865_v61 = vadd.f32 %v864_v59, %v850_v58 }
  0x2d   :  { %1070 = vmatprep.subr.mxu0 %v1212_v0 }
  0x2e   :  { %1071 = vmatpush3.msra.mxu0 %v1283_v9 }
  0x2f   :  { %1072 = vmatprep.subr.mxu0 %v1212_v0 }
  0x30   :  { %1073 = vmatpush3.msra.mxu0 %v1287_v10 }
  0x31   :  { %1074 = vmatprep.subr.mxu0 %v1212_v0 }
  0x32   :  { %1075 = vmatpush3.msra.mxu0 %v1291_v11 }
  0x33   :  { %1076 = vmatprep.subr.mxu0 %v1212_v0 }
  0x34   :  { %1077 = vmatpush3.msra.mxu0 %v1295_v12 }
  0x35   :  { %1078 = vmatprep.subr.mxu0 %v1212_v0 }
  0x36   :  { %1079 = vmatpush3.msra.mxu0 %v1299_v13  ;;  %v852_v13 = vand.u32 2147483647, %v1283_v9 }
  0x37   :  { %1080 = vmatprep.subr.mxu0 %v1212_v0 }
  0x38   :  { %1081 = vmatpush3.msra.mxu0 %v1303_v14  ;;  %v866_v14 = vadd.f32 %v865_v61, %v851_v60 }
  0x39   :  { %1082 = vmatprep.subr.mxu0 %v1212_v0 }
  0x3a   :  { %1083 = vmatpush3.msra.mxu0 %v1307_v15  ;;  %v853_v15 = vand.u32 2147483647, %v1279_v8  ;;  %v867_v11 = vadd.f32 %v866_v14, %v852_v13 }
  0x3b   :  { %1084 = vmatprep.subr.mxu0 %v1212_v0 }
  0x3c   :  { %1085 = vmatpush3.msra.mxu0 %v43_v16 }
  0x3d   :  { %1087 = vmatmul.mubr.f32.vlgmr.msra.gmra.mxu0 %v42_v17 }
  0xfd   :  { %v1313_v18 = vpop.f32.mrf.mxu0 }
  0xfe   :  { %vm130_vm1 = vcmp.ge.f32.partialorder %v1313_v18, 0.5 }
  0xff   :  { %v133_v19 = vsel %vm130_vm1, 0.0, %v1313_v18  ;;  %v1088_v20 = vpop.f32.mrf.mxu0  ;;  %v937_v21 = vsel %vm130_vm1, 1.0, %v1212_v0 }
 0x100   :  { %v136_v22 = vadd.f32 %v133_v19, %v1313_v18  ;;  %135 = vst [vmem:[#allocation8] sm:$0x1] %v133_v19  ;;  %134 = vst [vmem:[#allocation7] sm:$0x1] %v937_v21  ;;  %v854_v19 = vand.u32 2147483647, %v1275_v7  ;;  %v868_v20 = vadd.f32 %v867_v11, %v853_v15 }
 0x101   :  { %v855_v21 = vand.u32 2147483647, %v1271_v6 }
 0x102   :  { %vm137_vm2 = vcmp.ge.f32.partialorder %v136_v22, 0.5  ;;  %v869_v9 = vadd.f32 %v868_v20, %v854_v19 }
 0x103   :  { %v140_v23 = vsel %vm137_vm2, 0.0, %v136_v22  ;;  %v938_v24 = vsel %vm137_vm2, 1.0, %v1212_v0 }
 0x104   :  { %v143_v25 = vadd.f32 %v140_v23, %v1313_v18  ;;  %142 = vst [vmem:[#allocation8 + $0x1] sm:$0x1] %v140_v23  ;;  %141 = vst [vmem:[#allocation7 + $0x1] sm:$0x1] %v938_v24  ;;  %v856_v24 = vand.u32 2147483647, %v1267_v5 }
 0x106   :  { %vm144_vm3 = vcmp.ge.f32.partialorder %v143_v25, 0.5 }
 0x107   :  { %v147_v26 = vsel %vm144_vm3, 0.0, %v143_v25  ;;  %v939_v27 = vsel %vm144_vm3, 1.0, %v1212_v0  ;;  %v870_v25 = vadd.f32 %v869_v9, %v855_v21 }
 0x108   :  { %v150_v28 = vadd.f32 %v147_v26, %v1313_v18  ;;  %149 = vst [vmem:[#allocation8 + $0x2] sm:$0x1] %v147_v26  ;;  %148 = vst [vmem:[#allocation7 + $0x2] sm:$0x1] %v939_v27  ;;  %v857_v26 = vand.u32 2147483647, %v1263_v4 }
 0x109   :  { %v871_v7 = vadd.f32 %v870_v25, %v856_v24 }
 0x10a   :  { %vm151_vm4 = vcmp.ge.f32.partialorder %v150_v28, 0.5 }
 0x10b   :  { %v154_v29 = vsel %vm151_vm4, 0.0, %v150_v28  ;;  %v940_v30 = vsel %vm151_vm4, 1.0, %v1212_v0 }
 0x10c   :  { %v157_v31 = vadd.f32 %v154_v29, %v1313_v18  ;;  %156 = vst [vmem:[#allocation8 + $0x3] sm:$0x1] %v154_v29  ;;  %155 = vst [vmem:[#allocation7 + $0x3] sm:$0x1] %v940_v30  ;;  %v858_v29 = vand.u32 2147483647, %v1259_v3  ;;  %v872_v30 = vadd.f32 %v871_v7, %v857_v26 }
 0x10e   :  { %vm158_vm5 = vcmp.ge.f32.partialorder %v157_v31, 0.5  ;;  %v873_v5 = vadd.f32 %v872_v30, %v858_v29 }
 0x10f   :  { %v161_v32 = vsel %vm158_vm5, 0.0, %v157_v31  ;;  %v941_v33 = vsel %vm158_vm5, 1.0, %v1212_v0  ;;  %v859_v31 = vand.u32 2147483647, %v1255_v2 }
 0x110   :  { %v164_v34 = vadd.f32 %v161_v32, %v1313_v18  ;;  %163 = vst [vmem:[#allocation8 + $0x4] sm:$0x1] %v161_v32  ;;  %162 = vst [vmem:[#allocation7 + $0x4] sm:$0x1] %v941_v33 }
 0x112   :  { %vm165_vm6 = vcmp.ge.f32.partialorder %v164_v34, 0.5 }
 0x113   :  { %v168_v35 = vsel %vm165_vm6, 0.0, %v164_v34  ;;  %v942_v36 = vsel %vm165_vm6, 1.0, %v1212_v0  ;;  %v860_v34 = vand.u32 2147483647, %v1253_v1 }
 0x114   :  { %v171_v37 = vadd.f32 %v168_v35, %v1313_v18  ;;  %170 = vst [vmem:[#allocation8 + $0x5] sm:$0x1] %v168_v35  ;;  %169 = vst [vmem:[#allocation7 + $0x5] sm:$0x1] %v942_v36  ;;  %v874_v35 = vadd.f32 %v873_v5, %v859_v31 }
 0x116   :  { %vm172_vm7 = vcmp.ge.f32.partialorder %v171_v37, 0.5  ;;  %v875_v36 = vadd.f32 %v874_v35, %v860_v34 }
 0x117   :  { %v175_v38 = vsel %vm172_vm7, 0.0, %v171_v37  ;;  %v943_v39 = vsel %vm172_vm7, 1.0, %v1212_v0 }
 0x118   :  { %v178_v40 = vadd.f32 %v175_v38, %v1313_v18  ;;  %177 = vst [vmem:[#allocation8 + $0x6] sm:$0x1] %v175_v38  ;;  %176 = vst [vmem:[#allocation7 + $0x6] sm:$0x1] %v943_v39  ;;  %876 = vadd.xlane.f32.xlu0 %v875_v36 }
 0x11a   :  { %vm179_vm8 = vcmp.ge.f32.partialorder %v178_v40, 0.5 }
 0x11b   :  { %v182_v41 = vsel %vm179_vm8, 0.0, %v178_v40  ;;  %v944_v42 = vsel %vm179_vm8, 1.0, %v1212_v0 }
 0x11c   :  { %v185_v43 = vadd.f32 %v182_v41, %v1313_v18  ;;  %184 = vst [vmem:[#allocation8 + $0x7] sm:$0x1] %v182_v41  ;;  %183 = vst [vmem:[#allocation7 + $0x7] sm:$0x1] %v944_v42 }
 0x11e   :  { %vm186_vm9 = vcmp.ge.f32.partialorder %v185_v43, 0.5 }
 0x11f   :  { %v189_v48 = vsel %vm186_vm9, 0.0, %v185_v43  ;;  %v945_v49 = vsel %vm186_vm9, 1.0, %v1212_v0 }
 0x120   :  { %v192_v50 = vadd.f32 %v189_v48, %v1313_v18  ;;  %191 = vst [vmem:[#allocation8 + $0x8] sm:$0x1] %v189_v48  ;;  %190 = vst [vmem:[#allocation7 + $0x8] sm:$0x1] %v945_v49 }
 0x122   :  { %vm193_vm10 = vcmp.ge.f32.partialorder %v192_v50, 0.5 }
 0x123   :  { %v196_v55 = vsel %vm193_vm10, 0.0, %v192_v50  ;;  %v946_v56 = vsel %vm193_vm10, 1.0, %v1212_v0 }
 0x124   :  { %v199_v57 = vadd.f32 %v196_v55, %v1313_v18  ;;  %198 = vst [vmem:[#allocation8 + $0x9] sm:$0x1] %v196_v55  ;;  %197 = vst [vmem:[#allocation7 + $0x9] sm:$0x1] %v946_v56 }
 0x126   :  { %vm200_vm11 = vcmp.ge.f32.partialorder %v199_v57, 0.5 }
 0x127   :  { %v203_v62 = vsel %vm200_vm11, 0.0, %v199_v57  ;;  %v947_v63 = vsel %vm200_vm11, 1.0, %v1212_v0 }
 0x128   :  { %v206_v12 = vadd.f32 %v203_v62, %v1313_v18  ;;  %205 = vst [vmem:[#allocation8 + $0xa] sm:$0x1] %v203_v62  ;;  %204 = vst [vmem:[#allocation7 + $0xa] sm:$0x1] %v947_v63 }
 0x12a   :  { %vm207_vm12 = vcmp.ge.f32.partialorder %v206_v12, 0.5 }
 0x12b   :  { %v210_v16 = vsel %vm207_vm12, 0.0, %v206_v12  ;;  %v948_v17 = vsel %vm207_vm12, 1.0, %v1212_v0 }
 0x12c   :  { %v213_v10 = vadd.f32 %v210_v16, %v1313_v18  ;;  %212 = vst [vmem:[#allocation8 + $0xb] sm:$0x1] %v210_v16  ;;  %211 = vst [vmem:[#allocation7 + $0xb] sm:$0x1] %v948_v17 }
 0x12e   :  { %vm214_vm13 = vcmp.ge.f32.partialorder %v213_v10, 0.5 }
 0x12f   :  { %v217_v22 = vsel %vm214_vm13, 0.0, %v213_v10  ;;  %v949_v23 = vsel %vm214_vm13, 1.0, %v1212_v0 }
 0x130   :  { %v220_v8 = vadd.f32 %v217_v22, %v1313_v18  ;;  %219 = vst [vmem:[#allocation8 + $0xc] sm:$0x1] %v217_v22  ;;  %218 = vst [vmem:[#allocation7 + $0xc] sm:$0x1] %v949_v23 }
 0x132   :  { %vm221_vm14 = vcmp.ge.f32.partialorder %v220_v8, 0.5 }
 0x133   :  { %v224_v27 = vsel %vm221_vm14, 0.0, %v220_v8  ;;  %v950_v28 = vsel %vm221_vm14, 1.0, %v1212_v0 }
 0x134   :  { %v227_v6 = vadd.f32 %v224_v27, %v1313_v18  ;;  %226 = vst [vmem:[#allocation8 + $0xd] sm:$0x1] %v224_v27  ;;  %225 = vst [vmem:[#allocation7 + $0xd] sm:$0x1] %v950_v28 }
 0x136   :  { %vm228_vm15 = vcmp.ge.f32.partialorder %v227_v6, 0.5 }
 0x137   :  { %v231_v32 = vsel %vm228_vm15, 0.0, %v227_v6  ;;  %v951_v33 = vsel %vm228_vm15, 1.0, %v1212_v0 }
 0x138   :  { %v234_v4 = vadd.f32 %v231_v32, %v1313_v18  ;;  %233 = vst [vmem:[#allocation8 + $0xe] sm:$0x1] %v231_v32  ;;  %232 = vst [vmem:[#allocation7 + $0xe] sm:$0x1] %v951_v33 }
 0x13a   :  { %vm235_vm0 = vcmp.ge.f32.partialorder %v234_v4, 0.5 }
 0x13b   :  { %v238_v37 = vsel %vm235_vm0, 0.0, %v234_v4  ;;  %v952_v3 = vsel %vm235_vm0, 1.0, %v1212_v0 }
 0x13c   :  { %v241_v38 = vadd.f32 %v238_v37, %v1313_v18  ;;  %240 = vst [vmem:[#allocation8 + $0xf] sm:$0x1] %v238_v37  ;;  %239 = vst [vmem:[#allocation7 + $0xf] sm:$0x1] %v952_v3 }
 0x13e   :  { %vm242_vm1 = vcmp.ge.f32.partialorder %v241_v38, 0.5 }
 0x13f   :  { %v245_v2 = vsel %vm242_vm1, 0.0, %v241_v38  ;;  %v953_v39 = vsel %vm242_vm1, 1.0, %v1212_v0 }
 0x140   :  { %v248_v40 = vadd.f32 %v245_v2, %v1313_v18  ;;  %247 = vst [vmem:[#allocation8 + $0x10] sm:$0x1] %v245_v2  ;;  %246 = vst [vmem:[#allocation7 + $0x10] sm:$0x1] %v953_v39 }
 0x142   :  { %vm249_vm2 = vcmp.ge.f32.partialorder %v248_v40, 0.5 }
 0x143   :  { %v252_v1 = vsel %vm249_vm2, 0.0, %v248_v40  ;;  %v954_v41 = vsel %vm249_vm2, 1.0, %v1212_v0 }
 0x144   :  { %v255_v42 = vadd.f32 %v252_v1, %v1313_v18  ;;  %254 = vst [vmem:[#allocation8 + $0x11] sm:$0x1] %v252_v1  ;;  %253 = vst [vmem:[#allocation7 + $0x11] sm:$0x1] %v954_v41 }
 0x146   :  { %vm256_vm3 = vcmp.ge.f32.partialorder %v255_v42, 0.5 }
 0x147   :  { %v259_v43 = vsel %vm256_vm3, 0.0, %v255_v42  ;;  %v955_v44 = vsel %vm256_vm3, 1.0, %v1212_v0 }
 0x148   :  { %v262_v45 = vadd.f32 %v259_v43, %v1313_v18  ;;  %261 = vst [vmem:[#allocation8 + $0x12] sm:$0x1] %v259_v43  ;;  %260 = vst [vmem:[#allocation7 + $0x12] sm:$0x1] %v955_v44 }
 0x14a   :  { %vm263_vm4 = vcmp.ge.f32.partialorder %v262_v45, 0.5 }
 0x14b   :  { %v266_v46 = vsel %vm263_vm4, 0.0, %v262_v45  ;;  %v956_v47 = vsel %vm263_vm4, 1.0, %v1212_v0 }
 0x14c   :  { %v269_v48 = vadd.f32 %v266_v46, %v1313_v18  ;;  %268 = vst [vmem:[#allocation8 + $0x13] sm:$0x1] %v266_v46  ;;  %267 = vst [vmem:[#allocation7 + $0x13] sm:$0x1] %v956_v47 }
 0x14e   :  { %vm270_vm5 = vcmp.ge.f32.partialorder %v269_v48, 0.5 }
 0x14f   :  { %v273_v49 = vsel %vm270_vm5, 0.0, %v269_v48  ;;  %v957_v50 = vsel %vm270_vm5, 1.0, %v1212_v0 }
 0x150   :  { %v276_v51 = vadd.f32 %v273_v49, %v1313_v18  ;;  %275 = vst [vmem:[#allocation8 + $0x14] sm:$0x1] %v273_v49  ;;  %274 = vst [vmem:[#allocation7 + $0x14] sm:$0x1] %v957_v50 }
 0x152   :  { %vm277_vm6 = vcmp.ge.f32.partialorder %v276_v51, 0.5 }
 0x153   :  { %v280_v52 = vsel %vm277_vm6, 0.0, %v276_v51  ;;  %v958_v53 = vsel %vm277_vm6, 1.0, %v1212_v0 }
 0x154   :  { %v283_v54 = vadd.f32 %v280_v52, %v1313_v18  ;;  %282 = vst [vmem:[#allocation8 + $0x15] sm:$0x1] %v280_v52  ;;  %281 = vst [vmem:[#allocation7 + $0x15] sm:$0x1] %v958_v53 }
 0x156   :  { %vm284_vm7 = vcmp.ge.f32.partialorder %v283_v54, 0.5 }
 0x157   :  { %v287_v55 = vsel %vm284_vm7, 0.0, %v283_v54  ;;  %v959_v56 = vsel %vm284_vm7, 1.0, %v1212_v0 }
 0x158   :  { %v290_v57 = vadd.f32 %v287_v55, %v1313_v18  ;;  %289 = vst [vmem:[#allocation8 + $0x16] sm:$0x1] %v287_v55  ;;  %288 = vst [vmem:[#allocation7 + $0x16] sm:$0x1] %v959_v56 }
 0x15a   :  { %vm291_vm8 = vcmp.ge.f32.partialorder %v290_v57, 0.5 }
 0x15b   :  { %v294_v58 = vsel %vm291_vm8, 0.0, %v290_v57  ;;  %v960_v59 = vsel %vm291_vm8, 1.0, %v1212_v0 }
 0x15c   :  { %v297_v60 = vadd.f32 %v294_v58, %v1313_v18  ;;  %296 = vst [vmem:[#allocation8 + $0x17] sm:$0x1] %v294_v58  ;;  %295 = vst [vmem:[#allocation7 + $0x17] sm:$0x1] %v960_v59 }
 0x15e   :  { %vm298_vm9 = vcmp.ge.f32.partialorder %v297_v60, 0.5 }
 0x15f   :  { %v301_v61 = vsel %vm298_vm9, 0.0, %v297_v60  ;;  %v961_v62 = vsel %vm298_vm9, 1.0, %v1212_v0 }
 0x160   :  { %v304_v63 = vadd.f32 %v301_v61, %v1313_v18  ;;  %303 = vst [vmem:[#allocation8 + $0x18] sm:$0x1] %v301_v61  ;;  %302 = vst [vmem:[#allocation7 + $0x18] sm:$0x1] %v961_v62 }
 0x162   :  { %vm305_vm10 = vcmp.ge.f32.partialorder %v304_v63, 0.5 }
 0x163   :  { %v308_v12 = vsel %vm305_vm10, 0.0, %v304_v63  ;;  %v962_v13 = vsel %vm305_vm10, 1.0, %v1212_v0 }
 0x164   :  { %v311_v14 = vadd.f32 %v308_v12, %v1313_v18  ;;  %310 = vst [vmem:[#allocation8 + $0x19] sm:$0x1] %v308_v12  ;;  %309 = vst [vmem:[#allocation7 + $0x19] sm:$0x1] %v962_v13 }
 0x166   :  { %vm312_vm11 = vcmp.ge.f32.partialorder %v311_v14, 0.5 }
 0x167   :  { %v315_v15 = vsel %vm312_vm11, 0.0, %v311_v14  ;;  %v963_v11 = vsel %vm312_vm11, 1.0, %v1212_v0 }
 0x168   :  { %v318_v16 = vadd.f32 %v315_v15, %v1313_v18  ;;  %317 = vst [vmem:[#allocation8 + $0x1a] sm:$0x1] %v315_v15  ;;  %316 = vst [vmem:[#allocation7 + $0x1a] sm:$0x1] %v963_v11 }
 0x16a   :  { %vm319_vm12 = vcmp.ge.f32.partialorder %v318_v16, 0.5 }
 0x16b   :  { %v322_v17 = vsel %vm319_vm12, 0.0, %v318_v16  ;;  %v964_v10 = vsel %vm319_vm12, 1.0, %v1212_v0 }
 0x16c   :  { %v325_v19 = vadd.f32 %v322_v17, %v1313_v18  ;;  %324 = vst [vmem:[#allocation8 + $0x1b] sm:$0x1] %v322_v17  ;;  %323 = vst [vmem:[#allocation7 + $0x1b] sm:$0x1] %v964_v10 }
 0x16e   :  { %vm326_vm13 = vcmp.ge.f32.partialorder %v325_v19, 0.5 }
 0x16f   :  { %v329_v20 = vsel %vm326_vm13, 0.0, %v325_v19  ;;  %v965_v21 = vsel %vm326_vm13, 1.0, %v1212_v0 }
 0x170   :  { %v332_v9 = vadd.f32 %v329_v20, %v1313_v18  ;;  %331 = vst [vmem:[#allocation8 + $0x1c] sm:$0x1] %v329_v20  ;;  %330 = vst [vmem:[#allocation7 + $0x1c] sm:$0x1] %v965_v21 }
 0x172   :  { %vm333_vm14 = vcmp.ge.f32.partialorder %v332_v9, 0.5 }
 0x173   :  { %v336_v22 = vsel %vm333_vm14, 0.0, %v332_v9  ;;  %v966_v23 = vsel %vm333_vm14, 1.0, %v1212_v0 }
 0x174   :  { %v339_v8 = vadd.f32 %v336_v22, %v1313_v18  ;;  %338 = vst [vmem:[#allocation8 + $0x1d] sm:$0x1] %v336_v22  ;;  %337 = vst [vmem:[#allocation7 + $0x1d] sm:$0x1] %v966_v23 }
 0x176   :  { %vm340_vm15 = vcmp.ge.f32.partialorder %v339_v8, 0.5 }
 0x177   :  { %v343_v24 = vsel %vm340_vm15, 0.0, %v339_v8  ;;  %v967_v25 = vsel %vm340_vm15, 1.0, %v1212_v0 }
 0x178   :  { %v346_v26 = vadd.f32 %v343_v24, %v1313_v18  ;;  %345 = vst [vmem:[#allocation8 + $0x1e] sm:$0x1] %v343_v24  ;;  %344 = vst [vmem:[#allocation7 + $0x1e] sm:$0x1] %v967_v25 }
 0x17a   :  { %vm347_vm0 = vcmp.ge.f32.partialorder %v346_v26, 0.5 }
 0x17b   :  { %v350_v7 = vsel %vm347_vm0, 0.0, %v346_v26  ;;  %v968_v27 = vsel %vm347_vm0, 1.0, %v1212_v0 }
 0x17c   :  { %v353_v28 = vadd.f32 %v350_v7, %v1313_v18  ;;  %352 = vst [vmem:[#allocation8 + $0x1f] sm:$0x1] %v350_v7  ;;  %351 = vst [vmem:[#allocation7 + $0x1f] sm:$0x1] %v968_v27 }
 0x17e   :  { %vm354_vm1 = vcmp.ge.f32.partialorder %v353_v28, 0.5 }
 0x17f   :  { %v357_v6 = vsel %vm354_vm1, 0.0, %v353_v28  ;;  %v969_v29 = vsel %vm354_vm1, 1.0, %v1212_v0 }
 0x180   :  { %v360_v30 = vadd.f32 %v357_v6, %v1313_v18  ;;  %359 = vst [vmem:[#allocation8 + $0x20] sm:$0x1] %v357_v6  ;;  %358 = vst [vmem:[#allocation7 + $0x20] sm:$0x1] %v969_v29 }
 0x182   :  { %vm361_vm2 = vcmp.ge.f32.partialorder %v360_v30, 0.5 }
 0x183   :  { %v364_v31 = vsel %vm361_vm2, 0.0, %v360_v30  ;;  %v970_v5 = vsel %vm361_vm2, 1.0, %v1212_v0 }
 0x184   :  { %v367_v32 = vadd.f32 %v364_v31, %v1313_v18  ;;  %366 = vst [vmem:[#allocation8 + $0x21] sm:$0x1] %v364_v31  ;;  %365 = vst [vmem:[#allocation7 + $0x21] sm:$0x1] %v970_v5 }
 0x186   :  { %vm368_vm3 = vcmp.ge.f32.partialorder %v367_v32, 0.5 }
 0x187   :  { %v371_v33 = vsel %vm368_vm3, 0.0, %v367_v32  ;;  %v971_v4 = vsel %vm368_vm3, 1.0, %v1212_v0 }
 0x188   :  { %v374_v34 = vadd.f32 %v371_v33, %v1313_v18  ;;  %373 = vst [vmem:[#allocation8 + $0x22] sm:$0x1] %v371_v33  ;;  %372 = vst [vmem:[#allocation7 + $0x22] sm:$0x1] %v971_v4 }
 0x18a   :  { %vm375_vm4 = vcmp.ge.f32.partialorder %v374_v34, 0.5 }
 0x18b   :  { %v378_v35 = vsel %vm375_vm4, 0.0, %v374_v34  ;;  %v972_v36 = vsel %vm375_vm4, 1.0, %v1212_v0 }
 0x18c   :  { %v381_v37 = vadd.f32 %v378_v35, %v1313_v18  ;;  %380 = vst [vmem:[#allocation8 + $0x23] sm:$0x1] %v378_v35  ;;  %379 = vst [vmem:[#allocation7 + $0x23] sm:$0x1] %v972_v36 }
 0x18e   :  { %vm382_vm5 = vcmp.ge.f32.partialorder %v381_v37, 0.5 }
 0x18f   :  { %v385_v3 = vsel %vm382_vm5, 0.0, %v381_v37  ;;  %v973_v38 = vsel %vm382_vm5, 1.0, %v1212_v0 }
 0x190   :  { %v388_v2 = vadd.f32 %v385_v3, %v1313_v18  ;;  %387 = vst [vmem:[#allocation8 + $0x24] sm:$0x1] %v385_v3  ;;  %386 = vst [vmem:[#allocation7 + $0x24] sm:$0x1] %v973_v38 }
 0x192   :  { %vm389_vm6 = vcmp.ge.f32.partialorder %v388_v2, 0.5 }
 0x193   :  { %v392_v39 = vsel %vm389_vm6, 0.0, %v388_v2  ;;  %v974_v40 = vsel %vm389_vm6, 1.0, %v1212_v0 }
 0x194   :  { %v395_v1 = vadd.f32 %v392_v39, %v1313_v18  ;;  %394 = vst [vmem:[#allocation8 + $0x25] sm:$0x1] %v392_v39  ;;  %393 = vst [vmem:[#allocation7 + $0x25] sm:$0x1] %v974_v40 }
 0x196   :  { %vm396_vm7 = vcmp.ge.f32.partialorder %v395_v1, 0.5 }
 0x197   :  { %v399_v41 = vsel %vm396_vm7, 0.0, %v395_v1  ;;  %v975_v42 = vsel %vm396_vm7, 1.0, %v1212_v0 }
 0x198   :  { %v402_v43 = vadd.f32 %v399_v41, %v1313_v18  ;;  %401 = vst [vmem:[#allocation8 + $0x26] sm:$0x1] %v399_v41  ;;  %400 = vst [vmem:[#allocation7 + $0x26] sm:$0x1] %v975_v42 }
 0x19a   :  { %vm403_vm8 = vcmp.ge.f32.partialorder %v402_v43, 0.5 }
 0x19b   :  { %v406_v44 = vsel %vm403_vm8, 0.0, %v402_v43  ;;  %v976_v45 = vsel %vm403_vm8, 1.0, %v1212_v0 }
 0x19c   :  { %v409_v46 = vadd.f32 %v406_v44, %v1313_v18  ;;  %408 = vst [vmem:[#allocation8 + $0x27] sm:$0x1] %v406_v44  ;;  %407 = vst [vmem:[#allocation7 + $0x27] sm:$0x1] %v976_v45 }
 0x19e   :  { %vm410_vm9 = vcmp.ge.f32.partialorder %v409_v46, 0.5 }
 0x19f   :  { %v413_v47 = vsel %vm410_vm9, 0.0, %v409_v46  ;;  %v977_v48 = vsel %vm410_vm9, 1.0, %v1212_v0 }
 0x1a0   :  { %v416_v49 = vadd.f32 %v413_v47, %v1313_v18  ;;  %415 = vst [vmem:[#allocation8 + $0x28] sm:$0x1] %v413_v47  ;;  %414 = vst [vmem:[#allocation7 + $0x28] sm:$0x1] %v977_v48 }
 0x1a1   :  { %v877_v23 = vpop.xlane.xlu0 %876 }
 0x1a2   :  { %vm417_vm10 = vcmp.ge.f32.partialorder %v416_v49, 0.5  ;;  %v878_v8 = vrot.slane %v877_v23, 4 }
 0x1a3   :  { %v420_v50 = vsel %vm417_vm10, 0.0, %v416_v49  ;;  %v978_v51 = vsel %vm417_vm10, 1.0, %v1212_v0 }
 0x1a4   :  { %v423_v52 = vadd.f32 %v420_v50, %v1313_v18  ;;  %422 = vst [vmem:[#allocation8 + $0x29] sm:$0x1] %v420_v50  ;;  %421 = vst [vmem:[#allocation7 + $0x29] sm:$0x1] %v978_v51  ;;  %v879_v7 = vadd.f32 %v878_v8, %v877_v23 }
 0x1a6   :  { %vm424_vm11 = vcmp.ge.f32.partialorder %v423_v52, 0.5  ;;  %v880_v27 = vrot.slane %v879_v7, 2 }
 0x1a7   :  { %v427_v53 = vsel %vm424_vm11, 0.0, %v423_v52  ;;  %v979_v54 = vsel %vm424_vm11, 1.0, %v1212_v0 }
 0x1a8   :  { %v430_v55 = vadd.f32 %v427_v53, %v1313_v18  ;;  %429 = vst [vmem:[#allocation8 + $0x2a] sm:$0x1] %v427_v53  ;;  %428 = vst [vmem:[#allocation7 + $0x2a] sm:$0x1] %v979_v54  ;;  %v881_v30 = vadd.f32 %v880_v27, %v879_v7 }
 0x1aa   :  { %vm431_vm12 = vcmp.ge.f32.partialorder %v430_v55, 0.5  ;;  %v882_v31 = vrot.slane %v881_v30, 1 }
 0x1ab   :  { %v434_v56 = vsel %vm431_vm12, 0.0, %v430_v55  ;;  %v980_v57 = vsel %vm431_vm12, 1.0, %v1212_v0 }
 0x1ac   :  { %v437_v58 = vadd.f32 %v434_v56, %v1313_v18  ;;  %436 = vst [vmem:[#allocation8 + $0x2b] sm:$0x1] %v434_v56  ;;  %435 = vst [vmem:[#allocation7 + $0x2b] sm:$0x1] %v980_v57  ;;  %v883_v4 = vadd.f32 %v882_v31, %v881_v30 }
 0x1ae   :  { %vm438_vm13 = vcmp.ge.f32.partialorder %v437_v58, 0.5  ;;  %1089 = vpush %v883_v4 }
 0x1af   :  { %v441_v59 = vsel %vm438_vm13, 0.0, %v437_v58  ;;  %v981_v60 = vsel %vm438_vm13, 1.0, %v1212_v0 }
 0x1b0   :  { %v444_v61 = vadd.f32 %v441_v59, %v1313_v18  ;;  %443 = vst [vmem:[#allocation8 + $0x2c] sm:$0x1] %v441_v59  ;;  %442 = vst [vmem:[#allocation7 + $0x2c] sm:$0x1] %v981_v60 }
 0x1b2   :  { %vm445_vm14 = vcmp.ge.f32.partialorder %v444_v61, 0.5 }
 0x1b3   :  { %v448_v62 = vsel %vm445_vm14, 0.0, %v444_v61  ;;  %v982_v63 = vsel %vm445_vm14, 1.0, %v1212_v0 }
 0x1b4   :  { %v451_v12 = vadd.f32 %v448_v62, %v1313_v18  ;;  %450 = vst [vmem:[#allocation8 + $0x2d] sm:$0x1] %v448_v62  ;;  %449 = vst [vmem:[#allocation7 + $0x2d] sm:$0x1] %v982_v63 }
 0x1b6   :  { %vm452_vm15 = vcmp.ge.f32.partialorder %v451_v12, 0.5 }
 0x1b7   :  { %v455_v13 = vsel %vm452_vm15, 0.0, %v451_v12  ;;  %v983_v14 = vsel %vm452_vm15, 1.0, %v1212_v0 }
 0x1b8   :  { %v458_v15 = vadd.f32 %v455_v13, %v1313_v18  ;;  %457 = vst [vmem:[#allocation8 + $0x2e] sm:$0x1] %v455_v13  ;;  %456 = vst [vmem:[#allocation7 + $0x2e] sm:$0x1] %v983_v14 }
 0x1ba   :  { %vm459_vm0 = vcmp.ge.f32.partialorder %v458_v15, 0.5 }
 0x1bb   :  { %v462_v11 = vsel %vm459_vm0, 0.0, %v458_v15  ;;  %v984_v16 = vsel %vm459_vm0, 1.0, %v1212_v0 }
 0x1bc   :  { %v465_v17 = vadd.f32 %v462_v11, %v1313_v18  ;;  %464 = vst [vmem:[#allocation8 + $0x2f] sm:$0x1] %v462_v11  ;;  %463 = vst [vmem:[#allocation7 + $0x2f] sm:$0x1] %v984_v16 }
 0x1be   :  { %vm466_vm1 = vcmp.ge.f32.partialorder %v465_v17, 0.5 }
 0x1bf   :  { %v469_v10 = vsel %vm466_vm1, 0.0, %v465_v17  ;;  %v985_v19 = vsel %vm466_vm1, 1.0, %v1212_v0 }
 0x1c0   :  { %v472_v20 = vadd.f32 %v469_v10, %v1313_v18  ;;  %471 = vst [vmem:[#allocation8 + $0x30] sm:$0x1] %v469_v10  ;;  %470 = vst [vmem:[#allocation7 + $0x30] sm:$0x1] %v985_v19 }
 0x1c2   :  { %vm473_vm2 = vcmp.ge.f32.partialorder %v472_v20, 0.5 }
 0x1c3   :  { %v476_v21 = vsel %vm473_vm2, 0.0, %v472_v20  ;;  %v986_v9 = vsel %vm473_vm2, 1.0, %v1212_v0 }
 0x1c4   :  { %v479_v22 = vadd.f32 %v476_v21, %v1313_v18  ;;  %478 = vst [vmem:[#allocation8 + $0x31] sm:$0x1] %v476_v21  ;;  %477 = vst [vmem:[#allocation7 + $0x31] sm:$0x1] %v986_v9 }
 0x1c6   :  { %vm480_vm3 = vcmp.ge.f32.partialorder %v479_v22, 0.5 }
 0x1c7   :  { %v483_v24 = vsel %vm480_vm3, 0.0, %v479_v22  ;;  %v987_v25 = vsel %vm480_vm3, 1.0, %v1212_v0 }
 0x1c8   :  { %v486_v26 = vadd.f32 %v483_v24, %v1313_v18  ;;  %485 = vst [vmem:[#allocation8 + $0x32] sm:$0x1] %v483_v24  ;;  %484 = vst [vmem:[#allocation7 + $0x32] sm:$0x1] %v987_v25 }
 0x1ca   :  { %vm487_vm4 = vcmp.ge.f32.partialorder %v486_v26, 0.5 }
 0x1cb   :  { %v490_v28 = vsel %vm487_vm4, 0.0, %v486_v26  ;;  %v988_v6 = vsel %vm487_vm4, 1.0, %v1212_v0 }
 0x1cc   :  { %v493_v29 = vadd.f32 %v490_v28, %v1313_v18  ;;  %492 = vst [vmem:[#allocation8 + $0x33] sm:$0x1] %v490_v28  ;;  %491 = vst [vmem:[#allocation7 + $0x33] sm:$0x1] %v988_v6 }
 0x1ce   :  { %vm494_vm5 = vcmp.ge.f32.partialorder %v493_v29, 0.5 }
 0x1cf   :  { %v497_v5 = vsel %vm494_vm5, 0.0, %v493_v29  ;;  %v989_v32 = vsel %vm494_vm5, 1.0, %v1212_v0 }
 0x1d0   :  { %v500_v33 = vadd.f32 %v497_v5, %v1313_v18  ;;  %499 = vst [vmem:[#allocation8 + $0x34] sm:$0x1] %v497_v5  ;;  %498 = vst [vmem:[#allocation7 + $0x34] sm:$0x1] %v989_v32 }
 0x1d2   :  { %vm501_vm6 = vcmp.ge.f32.partialorder %v500_v33, 0.5 }
 0x1d3   :  { %v504_v34 = vsel %vm501_vm6, 0.0, %v500_v33  ;;  %v990_v35 = vsel %vm501_vm6, 1.0, %v1212_v0 }
 0x1d4   :  { %v507_v36 = vadd.f32 %v504_v34, %v1313_v18  ;;  %506 = vst [vmem:[#allocation8 + $0x35] sm:$0x1] %v504_v34  ;;  %505 = vst [vmem:[#allocation7 + $0x35] sm:$0x1] %v990_v35 }
 0x1d6   :  { %vm508_vm7 = vcmp.ge.f32.partialorder %v507_v36, 0.5 }
 0x1d7   :  { %v511_v37 = vsel %vm508_vm7, 0.0, %v507_v36  ;;  %v991_v3 = vsel %vm508_vm7, 1.0, %v1212_v0 }
 0x1d8   :  { %v514_v38 = vadd.f32 %v511_v37, %v1313_v18  ;;  %513 = vst [vmem:[#allocation8 + $0x36] sm:$0x1] %v511_v37  ;;  %512 = vst [vmem:[#allocation7 + $0x36] sm:$0x1] %v991_v3 }
 0x1da   :  { %vm515_vm8 = vcmp.ge.f32.partialorder %v514_v38, 0.5 }
 0x1db   :  { %v518_v2 = vsel %vm515_vm8, 0.0, %v514_v38  ;;  %v992_v39 = vsel %vm515_vm8, 1.0, %v1212_v0 }
 0x1dc   :  { %v521_v40 = vadd.f32 %v518_v2, %v1313_v18  ;;  %520 = vst [vmem:[#allocation8 + $0x37] sm:$0x1] %v518_v2  ;;  %519 = vst [vmem:[#allocation7 + $0x37] sm:$0x1] %v992_v39 }
 0x1de   :  { %vm522_vm9 = vcmp.ge.f32.partialorder %v521_v40, 0.5 }
 0x1df   :  { %v525_v1 = vsel %vm522_vm9, 0.0, %v521_v40  ;;  %v993_v41 = vsel %vm522_vm9, 1.0, %v1212_v0  ;;  %s1090_s0 = spop %1089 }
 0x1e0   :  { %v528_v42 = vadd.f32 %v525_v1, %v1313_v18  ;;  %527 = vst [vmem:[#allocation8 + $0x38] sm:$0x1] %v525_v1  ;;  %526 = vst [vmem:[#allocation7 + $0x38] sm:$0x1] %v993_v41  ;;  %s887_s1 = smul.f32 6.1035156e-05, %s1090_s0 }
 0x1e2   :  { %vm529_vm10 = vcmp.ge.f32.partialorder %v528_v42, 0.5  ;;  %v888_v17 = vstv %s887_s1 }
 0x1e3   :  { %v532_v43 = vsel %vm529_vm10, 0.0, %v528_v42  ;;  %v994_v44 = vsel %vm529_vm10, 1.0, %v1212_v0  ;;  %889 = vst [vmem:[#allocation10] sm:$0x1] %v888_v17 }
 0x1e4   :  { %v535_v45 = vadd.f32 %v532_v43, %v1313_v18  ;;  %534 = vst [vmem:[#allocation8 + $0x39] sm:$0x1] %v532_v43  ;;  %533 = vst [vmem:[#allocation7 + $0x39] sm:$0x1] %v994_v44 }
 0x1e6   :  { %vm536_vm11 = vcmp.ge.f32.partialorder %v535_v45, 0.5 }
 0x1e7   :  { %v539_v46 = vsel %vm536_vm11, 0.0, %v535_v45  ;;  %v995_v47 = vsel %vm536_vm11, 1.0, %v1212_v0 }
 0x1e8   :  { %v542_v48 = vadd.f32 %v539_v46, %v1313_v18  ;;  %541 = vst [vmem:[#allocation8 + $0x3a] sm:$0x1] %v539_v46  ;;  %540 = vst [vmem:[#allocation7 + $0x3a] sm:$0x1] %v995_v47 }
 0x1ea   :  { %vm543_vm12 = vcmp.ge.f32.partialorder %v542_v48, 0.5 }
 0x1eb   :  { %v546_v49 = vsel %vm543_vm12, 0.0, %v542_v48  ;;  %v996_v50 = vsel %vm543_vm12, 1.0, %v1212_v0 }
 0x1ec   :  { %v549_v51 = vadd.f32 %v546_v49, %v1313_v18  ;;  %548 = vst [vmem:[#allocation8 + $0x3b] sm:$0x1] %v546_v49  ;;  %547 = vst [vmem:[#allocation7 + $0x3b] sm:$0x1] %v996_v50 }
 0x1ee   :  { %vm550_vm13 = vcmp.ge.f32.partialorder %v549_v51, 0.5 }
 0x1ef   :  { %v553_v52 = vsel %vm550_vm13, 0.0, %v549_v51  ;;  %v997_v53 = vsel %vm550_vm13, 1.0, %v1212_v0 }
 0x1f0   :  { %v556_v54 = vadd.f32 %v553_v52, %v1313_v18  ;;  %555 = vst [vmem:[#allocation8 + $0x3c] sm:$0x1] %v553_v52  ;;  %554 = vst [vmem:[#allocation7 + $0x3c] sm:$0x1] %v997_v53 }
 0x1f2   :  { %vm557_vm14 = vcmp.ge.f32.partialorder %v556_v54, 0.5 }
 0x1f3   :  { %v560_v55 = vsel %vm557_vm14, 0.0, %v556_v54  ;;  %v998_v56 = vsel %vm557_vm14, 1.0, %v1212_v0 }
 0x1f4   :  { %v563_v57 = vadd.f32 %v560_v55, %v1313_v18  ;;  %562 = vst [vmem:[#allocation8 + $0x3d] sm:$0x1] %v560_v55  ;;  %561 = vst [vmem:[#allocation7 + $0x3d] sm:$0x1] %v998_v56 }
 0x1f6   :  { %vm564_vm15 = vcmp.ge.f32.partialorder %v563_v57, 0.5 }
 0x1f7   :  { %v567_v58 = vsel %vm564_vm15, 0.0, %v563_v57  ;;  %v999_v59 = vsel %vm564_vm15, 1.0, %v1212_v0 }
 0x1f8   :  { %v570_v60 = vadd.f32 %v567_v58, %v1313_v18  ;;  %569 = vst [vmem:[#allocation8 + $0x3e] sm:$0x1] %v567_v58  ;;  %568 = vst [vmem:[#allocation7 + $0x3e] sm:$0x1] %v999_v59 }
 0x1fa   :  { %vm571_vm0 = vcmp.ge.f32.partialorder %v570_v60, 0.5 }
 0x1fb   :  { %v574_v61 = vsel %vm571_vm0, 0.0, %v570_v60  ;;  %v1000_v62 = vsel %vm571_vm0, 1.0, %v1212_v0 }
 0x1fc   :  { %v577_v63 = vadd.f32 %v574_v61, %v1313_v18  ;;  %576 = vst [vmem:[#allocation8 + $0x3f] sm:$0x1] %v574_v61  ;;  %575 = vst [vmem:[#allocation7 + $0x3f] sm:$0x1] %v1000_v62 }
 0x1fe   :  { %vm578_vm1 = vcmp.ge.f32.partialorder %v577_v63, 0.5 }
 0x1ff   :  { %v581_v12 = vsel %vm578_vm1, 0.0, %v577_v63  ;;  %v1001_v13 = vsel %vm578_vm1, 1.0, %v1212_v0 }
 0x200   :  { %v584_v14 = vadd.f32 %v581_v12, %v1313_v18  ;;  %583 = vst [vmem:[#allocation8 + $0x40] sm:$0x1] %v581_v12  ;;  %582 = vst [vmem:[#allocation7 + $0x40] sm:$0x1] %v1001_v13 }
 0x202   :  { %vm585_vm2 = vcmp.ge.f32.partialorder %v584_v14, 0.5 }
 0x203   :  { %v588_v15 = vsel %vm585_vm2, 0.0, %v584_v14  ;;  %v1002_v11 = vsel %vm585_vm2, 1.0, %v1212_v0 }
 0x204   :  { %v591_v16 = vadd.f32 %v588_v15, %v1313_v18  ;;  %590 = vst [vmem:[#allocation8 + $0x41] sm:$0x1] %v588_v15  ;;  %589 = vst [vmem:[#allocation7 + $0x41] sm:$0x1] %v1002_v11 }
 0x206   :  { %vm592_vm3 = vcmp.ge.f32.partialorder %v591_v16, 0.5 }
 0x207   :  { %v595_v10 = vsel %vm592_vm3, 0.0, %v591_v16  ;;  %v1003_v19 = vsel %vm592_vm3, 1.0, %v1212_v0 }
 0x208   :  { %v598_v20 = vadd.f32 %v595_v10, %v1313_v18  ;;  %597 = vst [vmem:[#allocation8 + $0x42] sm:$0x1] %v595_v10  ;;  %596 = vst [vmem:[#allocation7 + $0x42] sm:$0x1] %v1003_v19 }
 0x20a   :  { %vm599_vm4 = vcmp.ge.f32.partialorder %v598_v20, 0.5 }
 0x20b   :  { %v602_v21 = vsel %vm599_vm4, 0.0, %v598_v20  ;;  %v1004_v9 = vsel %vm599_vm4, 1.0, %v1212_v0 }
 0x20c   :  { %v605_v22 = vadd.f32 %v602_v21, %v1313_v18  ;;  %604 = vst [vmem:[#allocation8 + $0x43] sm:$0x1] %v602_v21  ;;  %603 = vst [vmem:[#allocation7 + $0x43] sm:$0x1] %v1004_v9 }
 0x20e   :  { %vm606_vm5 = vcmp.ge.f32.partialorder %v605_v22, 0.5 }
 0x20f   :  { %v609_v23 = vsel %vm606_vm5, 0.0, %v605_v22  ;;  %v1005_v8 = vsel %vm606_vm5, 1.0, %v1212_v0 }
 0x210   :  { %v612_v24 = vadd.f32 %v609_v23, %v1313_v18  ;;  %611 = vst [vmem:[#allocation8 + $0x44] sm:$0x1] %v609_v23  ;;  %610 = vst [vmem:[#allocation7 + $0x44] sm:$0x1] %v1005_v8 }
 0x212   :  { %vm613_vm6 = vcmp.ge.f32.partialorder %v612_v24, 0.5 }
 0x213   :  { %v616_v25 = vsel %vm613_vm6, 0.0, %v612_v24  ;;  %v1006_v26 = vsel %vm613_vm6, 1.0, %v1212_v0 }
 0x214   :  { %v619_v7 = vadd.f32 %v616_v25, %v1313_v18  ;;  %618 = vst [vmem:[#allocation8 + $0x45] sm:$0x1] %v616_v25  ;;  %617 = vst [vmem:[#allocation7 + $0x45] sm:$0x1] %v1006_v26 }
 0x216   :  { %vm620_vm7 = vcmp.ge.f32.partialorder %v619_v7, 0.5 }
 0x217   :  { %v623_v27 = vsel %vm620_vm7, 0.0, %v619_v7  ;;  %v1007_v28 = vsel %vm620_vm7, 1.0, %v1212_v0 }
 0x218   :  { %v626_v6 = vadd.f32 %v623_v27, %v1313_v18  ;;  %625 = vst [vmem:[#allocation8 + $0x46] sm:$0x1] %v623_v27  ;;  %624 = vst [vmem:[#allocation7 + $0x46] sm:$0x1] %v1007_v28 }
 0x21a   :  { %vm627_vm8 = vcmp.ge.f32.partialorder %v626_v6, 0.5 }
 0x21b   :  { %v630_v29 = vsel %vm627_vm8, 0.0, %v626_v6  ;;  %v1008_v30 = vsel %vm627_vm8, 1.0, %v1212_v0 }
 0x21c   :  { %v633_v31 = vadd.f32 %v630_v29, %v1313_v18  ;;  %632 = vst [vmem:[#allocation8 + $0x47] sm:$0x1] %v630_v29  ;;  %631 = vst [vmem:[#allocation7 + $0x47] sm:$0x1] %v1008_v30 }
 0x21e   :  { %vm634_vm9 = vcmp.ge.f32.partialorder %v633_v31, 0.5 }
 0x21f   :  { %v637_v5 = vsel %vm634_vm9, 0.0, %v633_v31  ;;  %v1009_v32 = vsel %vm634_vm9, 1.0, %v1212_v0 }
 0x220   :  { %v640_v33 = vadd.f32 %v637_v5, %v1313_v18  ;;  %639 = vst [vmem:[#allocation8 + $0x48] sm:$0x1] %v637_v5  ;;  %638 = vst [vmem:[#allocation7 + $0x48] sm:$0x1] %v1009_v32 }
 0x222   :  { %vm641_vm10 = vcmp.ge.f32.partialorder %v640_v33, 0.5 }
 0x223   :  { %v644_v4 = vsel %vm641_vm10, 0.0, %v640_v33  ;;  %v1010_v34 = vsel %vm641_vm10, 1.0, %v1212_v0 }
 0x224   :  { %v647_v35 = vadd.f32 %v644_v4, %v1313_v18  ;;  %646 = vst [vmem:[#allocation8 + $0x49] sm:$0x1] %v644_v4  ;;  %645 = vst [vmem:[#allocation7 + $0x49] sm:$0x1] %v1010_v34 }
 0x226   :  { %vm648_vm11 = vcmp.ge.f32.partialorder %v647_v35, 0.5 }
 0x227   :  { %v651_v36 = vsel %vm648_vm11, 0.0, %v647_v35  ;;  %v1011_v37 = vsel %vm648_vm11, 1.0, %v1212_v0 }
 0x228   :  { %v654_v3 = vadd.f32 %v651_v36, %v1313_v18  ;;  %653 = vst [vmem:[#allocation8 + $0x4a] sm:$0x1] %v651_v36  ;;  %652 = vst [vmem:[#allocation7 + $0x4a] sm:$0x1] %v1011_v37 }
 0x22a   :  { %vm655_vm12 = vcmp.ge.f32.partialorder %v654_v3, 0.5 }
 0x22b   :  { %v658_v38 = vsel %vm655_vm12, 0.0, %v654_v3  ;;  %v1012_v2 = vsel %vm655_vm12, 1.0, %v1212_v0 }
 0x22c   :  { %v661_v39 = vadd.f32 %v658_v38, %v1313_v18  ;;  %660 = vst [vmem:[#allocation8 + $0x4b] sm:$0x1] %v658_v38  ;;  %659 = vst [vmem:[#allocation7 + $0x4b] sm:$0x1] %v1012_v2 }
 0x22e   :  { %vm662_vm13 = vcmp.ge.f32.partialorder %v661_v39, 0.5 }
 0x22f   :  { %v665_v40 = vsel %vm662_vm13, 0.0, %v661_v39  ;;  %v1013_v1 = vsel %vm662_vm13, 1.0, %v1212_v0 }
 0x230   :  { %v668_v41 = vadd.f32 %v665_v40, %v1313_v18  ;;  %667 = vst [vmem:[#allocation8 + $0x4c] sm:$0x1] %v665_v40  ;;  %666 = vst [vmem:[#allocation7 + $0x4c] sm:$0x1] %v1013_v1 }
 0x232   :  { %vm669_vm14 = vcmp.ge.f32.partialorder %v668_v41, 0.5 }
 0x233   :  { %v672_v42 = vsel %vm669_vm14, 0.0, %v668_v41  ;;  %v1014_v43 = vsel %vm669_vm14, 1.0, %v1212_v0 }
 0x234   :  { %v675_v44 = vadd.f32 %v672_v42, %v1313_v18  ;;  %674 = vst [vmem:[#allocation8 + $0x4d] sm:$0x1] %v672_v42  ;;  %673 = vst [vmem:[#allocation7 + $0x4d] sm:$0x1] %v1014_v43 }
 0x236   :  { %vm676_vm15 = vcmp.ge.f32.partialorder %v675_v44, 0.5 }
 0x237   :  { %v679_v45 = vsel %vm676_vm15, 0.0, %v675_v44  ;;  %v1015_v46 = vsel %vm676_vm15, 1.0, %v1212_v0 }
 0x238   :  { %v682_v47 = vadd.f32 %v679_v45, %v1313_v18  ;;  %681 = vst [vmem:[#allocation8 + $0x4e] sm:$0x1] %v679_v45  ;;  %680 = vst [vmem:[#allocation7 + $0x4e] sm:$0x1] %v1015_v46 }
 0x23a   :  { %vm683_vm0 = vcmp.ge.f32.partialorder %v682_v47, 0.5 }
 0x23b   :  { %v686_v48 = vsel %vm683_vm0, 0.0, %v682_v47  ;;  %v1016_v49 = vsel %vm683_vm0, 1.0, %v1212_v0 }
 0x23c   :  { %v689_v50 = vadd.f32 %v686_v48, %v1313_v18  ;;  %688 = vst [vmem:[#allocation8 + $0x4f] sm:$0x1] %v686_v48  ;;  %687 = vst [vmem:[#allocation7 + $0x4f] sm:$0x1] %v1016_v49 }
 0x23e   :  { %vm690_vm1 = vcmp.ge.f32.partialorder %v689_v50, 0.5 }
 0x23f   :  { %v693_v51 = vsel %vm690_vm1, 0.0, %v689_v50  ;;  %v1017_v52 = vsel %vm690_vm1, 1.0, %v1212_v0 }
 0x240   :  { %v696_v53 = vadd.f32 %v693_v51, %v1313_v18  ;;  %695 = vst [vmem:[#allocation8 + $0x50] sm:$0x1] %v693_v51  ;;  %694 = vst [vmem:[#allocation7 + $0x50] sm:$0x1] %v1017_v52 }
 0x242   :  { %vm697_vm2 = vcmp.ge.f32.partialorder %v696_v53, 0.5 }
 0x243   :  { %v700_v54 = vsel %vm697_vm2, 0.0, %v696_v53  ;;  %v1018_v55 = vsel %vm697_vm2, 1.0, %v1212_v0 }
 0x244   :  { %v703_v56 = vadd.f32 %v700_v54, %v1313_v18  ;;  %702 = vst [vmem:[#allocation8 + $0x51] sm:$0x1] %v700_v54  ;;  %701 = vst [vmem:[#allocation7 + $0x51] sm:$0x1] %v1018_v55 }
 0x246   :  { %vm704_vm3 = vcmp.ge.f32.partialorder %v703_v56, 0.5 }
 0x247   :  { %v707_v57 = vsel %vm704_vm3, 0.0, %v703_v56  ;;  %v1019_v58 = vsel %vm704_vm3, 1.0, %v1212_v0 }
 0x248   :  { %v710_v59 = vadd.f32 %v707_v57, %v1313_v18  ;;  %709 = vst [vmem:[#allocation8 + $0x52] sm:$0x1] %v707_v57  ;;  %708 = vst [vmem:[#allocation7 + $0x52] sm:$0x1] %v1019_v58 }
 0x24a   :  { %vm711_vm4 = vcmp.ge.f32.partialorder %v710_v59, 0.5 }
 0x24b   :  { %v714_v60 = vsel %vm711_vm4, 0.0, %v710_v59  ;;  %v1020_v61 = vsel %vm711_vm4, 1.0, %v1212_v0 }
 0x24c   :  { %v717_v62 = vadd.f32 %v714_v60, %v1313_v18  ;;  %716 = vst [vmem:[#allocation8 + $0x53] sm:$0x1] %v714_v60  ;;  %715 = vst [vmem:[#allocation7 + $0x53] sm:$0x1] %v1020_v61 }
 0x24e   :  { %vm718_vm5 = vcmp.ge.f32.partialorder %v717_v62, 0.5 }
 0x24f   :  { %v721_v63 = vsel %vm718_vm5, 0.0, %v717_v62  ;;  %v1021_v12 = vsel %vm718_vm5, 1.0, %v1212_v0 }
 0x250   :  { %v724_v13 = vadd.f32 %v721_v63, %v1313_v18  ;;  %723 = vst [vmem:[#allocation8 + $0x54] sm:$0x1] %v721_v63  ;;  %722 = vst [vmem:[#allocation7 + $0x54] sm:$0x1] %v1021_v12 }
 0x252   :  { %vm725_vm6 = vcmp.ge.f32.partialorder %v724_v13, 0.5 }
 0x253   :  { %v728_v14 = vsel %vm725_vm6, 0.0, %v724_v13  ;;  %v1022_v15 = vsel %vm725_vm6, 1.0, %v1212_v0 }
 0x254   :  { %v731_v11 = vadd.f32 %v728_v14, %v1313_v18  ;;  %730 = vst [vmem:[#allocation8 + $0x55] sm:$0x1] %v728_v14  ;;  %729 = vst [vmem:[#allocation7 + $0x55] sm:$0x1] %v1022_v15 }
 0x256   :  { %vm732_vm7 = vcmp.ge.f32.partialorder %v731_v11, 0.5 }
 0x257   :  { %v735_v16 = vsel %vm732_vm7, 0.0, %v731_v11  ;;  %v1023_v17 = vsel %vm732_vm7, 1.0, %v1212_v0 }
 0x258   :  { %v738_v10 = vadd.f32 %v735_v16, %v1313_v18  ;;  %737 = vst [vmem:[#allocation8 + $0x56] sm:$0x1] %v735_v16  ;;  %736 = vst [vmem:[#allocation7 + $0x56] sm:$0x1] %v1023_v17 }
 0x25a   :  { %vm739_vm8 = vcmp.ge.f32.partialorder %v738_v10, 0.5 }
 0x25b   :  { %v742_v19 = vsel %vm739_vm8, 0.0, %v738_v10  ;;  %v1024_v20 = vsel %vm739_vm8, 1.0, %v1212_v0 }
 0x25c   :  { %v745_v21 = vadd.f32 %v742_v19, %v1313_v18  ;;  %744 = vst [vmem:[#allocation8 + $0x57] sm:$0x1] %v742_v19  ;;  %743 = vst [vmem:[#allocation7 + $0x57] sm:$0x1] %v1024_v20 }
 0x25e   :  { %vm746_vm9 = vcmp.ge.f32.partialorder %v745_v21, 0.5 }
 0x25f   :  { %v749_v9 = vsel %vm746_vm9, 0.0, %v745_v21  ;;  %v1025_v22 = vsel %vm746_vm9, 1.0, %v1212_v0 }
 0x260   :  { %v752_v23 = vadd.f32 %v749_v9, %v1313_v18  ;;  %751 = vst [vmem:[#allocation8 + $0x58] sm:$0x1] %v749_v9  ;;  %750 = vst [vmem:[#allocation7 + $0x58] sm:$0x1] %v1025_v22 }
 0x262   :  { %vm753_vm10 = vcmp.ge.f32.partialorder %v752_v23, 0.5 }
 0x263   :  { %v756_v8 = vsel %vm753_vm10, 0.0, %v752_v23  ;;  %v1026_v24 = vsel %vm753_vm10, 1.0, %v1212_v0 }
 0x264   :  { %v759_v25 = vadd.f32 %v756_v8, %v1313_v18  ;;  %758 = vst [vmem:[#allocation8 + $0x59] sm:$0x1] %v756_v8  ;;  %757 = vst [vmem:[#allocation7 + $0x59] sm:$0x1] %v1026_v24 }
 0x266   :  { %vm760_vm11 = vcmp.ge.f32.partialorder %v759_v25, 0.5 }
 0x267   :  { %v763_v26 = vsel %vm760_vm11, 0.0, %v759_v25  ;;  %v1027_v7 = vsel %vm760_vm11, 1.0, %v1212_v0 }
 0x268   :  { %v766_v27 = vadd.f32 %v763_v26, %v1313_v18  ;;  %765 = vst [vmem:[#allocation8 + $0x5a] sm:$0x1] %v763_v26  ;;  %764 = vst [vmem:[#allocation7 + $0x5a] sm:$0x1] %v1027_v7 }
 0x26a   :  { %vm767_vm12 = vcmp.ge.f32.partialorder %v766_v27, 0.5 }
 0x26b   :  { %v770_v28 = vsel %vm767_vm12, 0.0, %v766_v27  ;;  %v1028_v6 = vsel %vm767_vm12, 1.0, %v1212_v0 }
 0x26c   :  { %v773_v29 = vadd.f32 %v770_v28, %v1313_v18  ;;  %772 = vst [vmem:[#allocation8 + $0x5b] sm:$0x1] %v770_v28  ;;  %771 = vst [vmem:[#allocation7 + $0x5b] sm:$0x1] %v1028_v6 }
 0x26e   :  { %vm774_vm13 = vcmp.ge.f32.partialorder %v773_v29, 0.5 }
 0x26f   :  { %v777_v30 = vsel %vm774_vm13, 0.0, %v773_v29  ;;  %v1029_v31 = vsel %vm774_vm13, 1.0, %v1212_v0 }
 0x270   :  { %v780_v5 = vadd.f32 %v777_v30, %v1313_v18  ;;  %779 = vst [vmem:[#allocation8 + $0x5c] sm:$0x1] %v777_v30  ;;  %778 = vst [vmem:[#allocation7 + $0x5c] sm:$0x1] %v1029_v31 }
 0x272   :  { %vm781_vm14 = vcmp.ge.f32.partialorder %v780_v5, 0.5 }
 0x273   :  { %v784_v32 = vsel %vm781_vm14, 0.0, %v780_v5  ;;  %v1030_v33 = vsel %vm781_vm14, 1.0, %v1212_v0 }
 0x274   :  { %v787_v4 = vadd.f32 %v784_v32, %v1313_v18  ;;  %786 = vst [vmem:[#allocation8 + $0x5d] sm:$0x1] %v784_v32  ;;  %785 = vst [vmem:[#allocation7 + $0x5d] sm:$0x1] %v1030_v33 }
 0x276   :  { %vm788_vm15 = vcmp.ge.f32.partialorder %v787_v4, 0.5 }
 0x277   :  { %v791_v34 = vsel %vm788_vm15, 0.0, %v787_v4  ;;  %v1031_v35 = vsel %vm788_vm15, 1.0, %v1212_v0 }
 0x278   :  { %v794_v36 = vadd.f32 %v791_v34, %v1313_v18  ;;  %793 = vst [vmem:[#allocation8 + $0x5e] sm:$0x1] %v791_v34  ;;  %792 = vst [vmem:[#allocation7 + $0x5e] sm:$0x1] %v1031_v35 }
 0x27a   :  { %vm795_vm0 = vcmp.ge.f32.partialorder %v794_v36, 0.5 }
 0x27b   :  { %v798_v37 = vsel %vm795_vm0, 0.0, %v794_v36  ;;  %v1032_v3 = vsel %vm795_vm0, 1.0, %v1212_v0 }
 0x27c   :  { %v801_v38 = vadd.f32 %v798_v37, %v1313_v18  ;;  %800 = vst [vmem:[#allocation8 + $0x5f] sm:$0x1] %v798_v37  ;;  %799 = vst [vmem:[#allocation7 + $0x5f] sm:$0x1] %v1032_v3 }
 0x27e   :  { %vm802_vm1 = vcmp.ge.f32.partialorder %v801_v38, 0.5 }
 0x27f   :  { %v805_v2 = vsel %vm802_vm1, 0.0, %v801_v38  ;;  %v1033_v39 = vsel %vm802_vm1, 1.0, %v1212_v0 }
 0x280   :  { %v808_v40 = vadd.f32 %v805_v2, %v1313_v18  ;;  %807 = vst [vmem:[#allocation8 + $0x60] sm:$0x1] %v805_v2  ;;  %806 = vst [vmem:[#allocation7 + $0x60] sm:$0x1] %v1033_v39 }
 0x282   :  { %vm809_vm2 = vcmp.ge.f32.partialorder %v808_v40, 0.5 }
 0x283   :  { %v812_v1 = vsel %vm809_vm2, 0.0, %v808_v40  ;;  %v1034_v41 = vsel %vm809_vm2, 1.0, %v1212_v0 }
 0x284   :  { %v815_v42 = vadd.f32 %v812_v1, %v1313_v18  ;;  %814 = vst [vmem:[#allocation8 + $0x61] sm:$0x1] %v812_v1  ;;  %813 = vst [vmem:[#allocation7 + $0x61] sm:$0x1] %v1034_v41 }
 0x286   :  { %vm816_vm3 = vcmp.ge.f32.partialorder %v815_v42, 0.5 }
 0x287   :  { %v819_v43 = vsel %vm816_vm3, 0.0, %v815_v42  ;;  %v1035_v44 = vsel %vm816_vm3, 1.0, %v1212_v0 }
 0x288   :  { %v822_v45 = vadd.f32 %v819_v43, %v1313_v18  ;;  %821 = vst [vmem:[#allocation8 + $0x62] sm:$0x1] %v819_v43  ;;  %820 = vst [vmem:[#allocation7 + $0x62] sm:$0x1] %v1035_v44 }
 0x28a   :  { %vm823_vm4 = vcmp.ge.f32.partialorder %v822_v45, 0.5 }
 0x28b   :  { %v826_v46 = vsel %vm823_vm4, 0.0, %v822_v45  ;;  %v1036_v47 = vsel %vm823_vm4, 1.0, %v1212_v0 }
 0x28c   :  { %828 = vst [vmem:[#allocation8 + $0x63] sm:$0x1] %v826_v46  ;;  %827 = vst [vmem:[#allocation7 + $0x63] sm:$0x1] %v1036_v47 }
 0x28d   :  { %1151 = shalt.err (!%p1148_p0)
}
 0x28e   :  { %913 = dma.vmem_to_hbm [thread:$0]  %s908_s29, 1664, %s1549_s3, [#allocation9], %s1210_s24, %s1210_s24, %s1211_s25  }
 0x28f   :  { %s1160_s11 = scalar_lea.vmem %s896_s5, 1664  ;;  %p1165_p2 = scmp.lt.s32.totalorder %s896_s5, %s896_s5 }
 0x290   :  { %p1161_p1 = scmp.ne.s32.totalorder %s896_s5, %s1160_s11  ;;  %p1166_p3 = scmp.lt.s32.totalorder %s1160_s11, %s1160_s11 }
 0x292   :  { %p1167_p4 = por %p1166_p3, %p1165_p2 }
 0x294   :  { %p1168_p5 = pnand %p1167_p4, %p1161_p1 }
 0x296   :  { %1171 = shalt.err (!%p1168_p5)
}
 0x297   :  { %901 = dma.vmem_to_hbm [thread:$0]  %s896_s5, 1664, %s1548_s2, [#allocation4], %s1210_s24, %s1210_s24, %s1211_s25  }
 0x298   :  { %s1180_s14 = scalar_lea.vmem %s921_s7, 16  ;;  %s1184_s15 = scalar_lea.vmem %s921_s7, 32 }
 0x299   :  { %p1181_p6 = scmp.ne.s32.totalorder %s921_s7, %s1180_s14  ;;  %p1185_p7 = scmp.lt.s32.totalorder %s921_s7, %s921_s7 }
 0x29a   :  { %p1186_p8 = scmp.lt.s32.totalorder %s1184_s15, %s1180_s14 }
 0x29c   :  { %p1187_p9 = por %p1186_p8, %p1185_p7 }
 0x29e   :  { %p1188_p10 = pnand %p1187_p9, %p1181_p6 }
 0x2a0   :  { %1191 = shalt.err (!%p1188_p10)
}
 0x2a1   :  { %923 = dma.vmem_to_hbm [thread:$0]  %s921_s7, 16, %s1550_s4, [#allocation9]  }
 0x2a2   :  { %1204 = dma.done.wait [#allocation4], 1664  }
 0x2a3   :  { %1205 = vsyncadd [#allocation4], 4294965632 }
 0x2a4   :  { %1206 = dma.done.wait [#allocation9], 1680  }
 0x2a5   :  { %1207 = vsyncadd [#allocation9], 4294965616 }
 0x2a6   :  { %933 = vsyncpa [#allocation3], 1 }
 0x2a7   :  { %934 = vsyncpa [#allocation6], 1 }
 0x2a8   :  { %935 = vsyncpa [#allocation4], 1 }
 0x2a9   :  { %936 = vsyncpa [#allocation9], 1 }

</bundles_post_ra>
